<compile_context>
chip_gen: v5e
topology: v5e:2x2
jax: 0.10.0
libtpu: 0.0.40
codegen_flags: <defaults>
</compile_context>

<pallas_src>
import functools

import jax
import jax.numpy as jnp
import numpy as np
from jax.experimental import pallas as pl
from jax.experimental.pallas import tpu as pltpu


# ----------------------------------------------------------------------------
# Pallas kernels
# ----------------------------------------------------------------------------

def attn_weight_kernel(x_ref, o_ref):
    """Per-batch spatial attention weight.

    x_ref: (1, C, H, W) original input block (f32)
    o_ref: (1, 1, H, W) attention weight (requires H == W, as in the reference)
    """
    _, C, H, W = x_ref.shape
    x = x_ref[0]                                    # (C, H, W)

    # Bake the "/ 4.0" channel pattern in with an iota (no scale operand DMA).
    cidx = jax.lax.broadcasted_iota(jnp.int32, (C, H, W), 0)
    m4 = cidx % 4
    G = 4 * (C // 16)
    C2 = C // 2
    C3 = 3 * C // 4
    scaled = (((m4 == 1) & (cidx < G)) |
              ((m4 == 2) & (cidx >= C2) & (cidx < C2 + G)) |
              ((m4 == 3) & (cidx >= C3) & (cidx < C3 + G)))
    xs = jnp.where(scaled, x * 0.25, x)

    c2, c4 = C // 2, C // 4

    def agg(g):                                     # mean + max over channels
        return jnp.mean(g, axis=0) + jnp.max(g, axis=0)

    w1 = agg(xs[:c2])                               # (H, W)
    w2 = agg(xs[c2:c2 + c4])
    w3 = agg(xs[c2 + c4:])

    inv = float(W) ** -0.5

    def mm_nt(a, b):                                # a @ b.T on the MXU
        return jax.lax.dot_general(
            a, b, (((1,), (1,)), ((), ())), preferred_element_type=jnp.float32)

    def sig(a):                                     # exp + reciprocal -> EUP slot
        return pl.reciprocal(1.0 + jnp.exp(-a), approx=True)

    a1 = sig(mm_nt(w1, w2) * inv)
    a2 = sig(mm_nt(w1, w3) * inv)
    a3 = sig(mm_nt(w2, w3) * inv)
    o_ref[0, 0] = (a1 + a2 + a3) * 0.33             # matches the reference * 0.33


def conv1x1_kernel(*refs, pre_norm):
    """Lane-dense 1x1 conv: y(Cout, St) = W(Cout, Cin) @ x(Cin, St) + b.

    Optionally fuses the previous layer's BatchNorm + ReLU into the input stage
    (pre_norm).  Also emits per-tile partial BN statistics (sum, sum of squares).
    """
    if pre_norm:
        x_ref, w_ref, b_ref, pn_ref, y_ref, st_ref = refs
    else:
        x_ref, w_ref, b_ref, y_ref, st_ref = refs

    x = x_ref[0]                                    # (Cin, St)
    if pre_norm:
        x = jnp.maximum(x.astype(jnp.float32) * pn_ref[:, 0:1] + pn_ref[:, 1:2],
                        0.0)
    xb = x.astype(jnp.bfloat16)

    y = jnp.dot(w_ref[...], xb, preferred_element_type=jnp.float32)
    y = y + b_ref[...]                              # (Cout, 1) sublane broadcast
    y_ref[0] = y.astype(y_ref.dtype)

    st_ref[0, 0] = jnp.concatenate(
        [jnp.sum(y, axis=1, keepdims=True),
         jnp.sum(y * y, axis=1, keepdims=True)], axis=1)   # (Cout, 2)


def conv3x3_kernel(*refs, Wp, pre_norm):
    """3x3 conv (padding=1) as 9 shifted-tap matmuls, no im2col in HBM.

    x_ref:  (1, Cin, Lp)  zero-padded activation, flattened padded rows (bf16)
    w_ref:  (9, Cout, Cin) per-tap weights (bf16)
    b_ref:  (Cout, 1) bias
    m_ref:  (1, Lm) 1/0 mask of valid (non-pad) output columns
    pn_ref: (Cin, 2) previous BN (scale, shift)       [pre_norm only]
    pm_ref: (1, Lp) 1/0 mask of valid padded-input positions [pre_norm only]
    y_ref:  (1, Cout, Lm) extended output (valid columns extracted by glue)
    st_ref: (1, Cout, 2)  partial BN statistics over valid columns
    xn_ref: (Cin, Lp) bf16 VMEM scratch for normalized input [pre_norm only]
    """
    if pre_norm:
        x_ref, w_ref, b_ref, m_ref, pn_ref, pm_ref, y_ref, st_ref, xn_ref = refs
    else:
        x_ref, w_ref, b_ref, m_ref, y_ref, st_ref = refs

    Cout = y_ref.shape[1]
    Lm = y_ref.shape[2]

    if pre_norm:
        # bn + ReLU of the previous layer, computed once; pad positions are
        # forced back to exactly 0 (the conv's zero padding) with pm_ref.
        x = x_ref[0].astype(jnp.float32)            # (Cin, Lp)
        xn_ref[...] = (jnp.maximum(x * pn_ref[:, 0:1] + pn_ref[:, 1:2], 0.0)
                       * pm_ref[...]).astype(jnp.bfloat16)

        def tap(off):
            return xn_ref[:, pl.ds(off, Lm)]        # (Cin, Lm) shifted tap
    else:
        def tap(off):
            return x_ref[0, :, pl.ds(off, Lm)].astype(jnp.bfloat16)

    acc = jnp.zeros((Cout, Lm), jnp.float32)
    for dy in range(3):
        for dx in range(3):
            off = dy * Wp + dx
            acc = acc + jnp.dot(w_ref[dy * 3 + dx], tap(off),
                                preferred_element_type=jnp.float32)
    acc = acc + b_ref[...]
    y_ref[0] = acc.astype(y_ref.dtype)

    mask = m_ref[...]                               # (1, Lm) broadcast over Cout
    ym = acc * mask
    st_ref[0] = jnp.concatenate(
        [jnp.sum(ym, axis=1, keepdims=True),
         jnp.sum(ym * acc, axis=1, keepdims=True)], axis=1)


def bn_act_kernel(y_ref, pn_ref, o_ref):
    """o = relu(y * scale + shift) with per-channel scale/shift (sublane bcast)."""
    y = y_ref[0].astype(jnp.float32)
    o_ref[0] = jnp.maximum(y * pn_ref[:, 0:1] + pn_ref[:, 1:2],
                           0.0).astype(o_ref.dtype)


def bn_combine_kernel(y_ref, x_ref, w_ref, pn_ref, o_ref):
    """Fused bn4 + bottleneck residual + spatial attention:

    o = x * weight + relu(bn4(conv4_out) + x)
    """
    y = y_ref[0].astype(jnp.float32)                # (C, St) conv4 raw
    x = x_ref[0].astype(jnp.float32)                # (C, St) original input
    wgt = w_ref[0]                                  # (1, St) attention weight
    yn = y * pn_ref[:, 0:1] + pn_ref[:, 1:2]
    o_ref[0] = (x * wgt + jnp.maximum(yn + x, 0.0)).astype(o_ref.dtype)


# ----------------------------------------------------------------------------
# Wrappers (grids, BlockSpecs, glue)
# ----------------------------------------------------------------------------

def _pick_spatial_tile(hw, max_tile=2048):
    if hw <= max_tile:
        return hw
    for t in range(max_tile, 0, -128):
        if t % 128 == 0 and hw % t == 0:
            return t
    return hw


_PAR = pltpu.CompilerParams  # shorthand


def attention_weight(x):
    """x: (B, C, H, W) f32 -> attention weight (B, 1, H, W) f32."""
    B, C, H, W = x.shape
    assert H == W, "reference broadcasting (x * attn) requires H == W"
    return pl.pallas_call(
        attn_weight_kernel,
        out_shape=jax.ShapeDtypeStruct((B, 1, H, W), jnp.float32),
        grid=(B,),
        in_specs=[pl.BlockSpec((1, C, H, W), lambda b: (b, 0, 0, 0))],
        out_specs=pl.BlockSpec((1, 1, H, W), lambda b: (b, 0, 0, 0)),
        compiler_params=_PAR(dimension_semantics=("parallel",)),
    )(x)


def conv1x1(x, w, b, pn=None, *, out_dtype=jnp.bfloat16):
    """x: (B, Cin, HW); w: (Cout, Cin) bf16; b: (Cout,1); pn: (Cin,2) or None."""
    B, Cin, HW = x.shape
    Cout = w.shape[0]
    St = _pick_spatial_tile(HW)
    S = HW // St
    pre = pn is not None

    in_specs = [pl.BlockSpec((1, Cin, St), lambda bb, ss: (bb, 0, ss)),
                pl.BlockSpec((Cout, Cin), lambda bb, ss: (0, 0)),
                pl.BlockSpec((Cout, 1), lambda bb, ss: (0, 0))]
    args = [x, w, b]
    if pre:
        in_specs.append(pl.BlockSpec((Cin, 2), lambda bb, ss: (0, 0)))
        args.append(pn)

    y, st = pl.pallas_call(
        functools.partial(conv1x1_kernel, pre_norm=pre),
        out_shape=(jax.ShapeDtypeStruct((B, Cout, HW), out_dtype),
                   jax.ShapeDtypeStruct((B, S, Cout, 2), jnp.float32)),
        grid=(B, S),
        in_specs=in_specs,
        out_specs=(pl.BlockSpec((1, Cout, St), lambda bb, ss: (bb, 0, ss)),
                   pl.BlockSpec((1, 1, Cout, 2), lambda bb, ss: (bb, ss, 0, 0))),
        compiler_params=_PAR(dimension_semantics=("parallel", "parallel")),
    )(*args)
    return y, st.sum(axis=(0, 1))                   # (Cout, 2) global sums


def conv3x3(xpad, wtaps, b, colmask, *, H, W, pn=None, padmask=None,
            out_dtype=jnp.bfloat16):
    """xpad: (B, Cin, (H+3)*(W+2)) padded flat bf16; wtaps: (9, Cout, Cin) bf16.

    If pn is given, the previous layer's BN + ReLU is fused into the input stage
    (padmask restores exact zeros at the pad positions).
    """
    B, Cin, Lp = xpad.shape
    Cout = wtaps.shape[1]
    Wp = W + 2
    Lm = H * Wp
    pre = pn is not None

    in_specs = [pl.BlockSpec((1, Cin, Lp), lambda bb: (bb, 0, 0)),
                pl.BlockSpec((9, Cout, Cin), lambda bb: (0, 0, 0)),
                pl.BlockSpec((Cout, 1), lambda bb: (0, 0)),
                pl.BlockSpec((1, Lm), lambda bb: (0, 0))]
    args = [xpad, wtaps, b, colmask]
    scratch = []
    if pre:
        in_specs += [pl.BlockSpec((Cin, 2), lambda bb: (0, 0)),
                     pl.BlockSpec((1, Lp), lambda bb: (0, 0))]
        args += [pn, padmask]
        scratch = [pltpu.VMEM((Cin, Lp), jnp.bfloat16)]

    y, st = pl.pallas_call(
        functools.partial(conv3x3_kernel, Wp=Wp, pre_norm=pre),
        out_shape=(jax.ShapeDtypeStruct((B, Cout, Lm), out_dtype),
                   jax.ShapeDtypeStruct((B, Cout, 2), jnp.float32)),
        grid=(B,),
        in_specs=in_specs,
        out_specs=(pl.BlockSpec((1, Cout, Lm), lambda bb: (bb, 0, 0)),
                   pl.BlockSpec((1, Cout, 2), lambda bb: (bb, 0, 0))),
        scratch_shapes=tuple(scratch),
        compiler_params=_PAR(dimension_semantics=("parallel",)),
    )(*args)

    # extract the valid (non right-pad) columns; contiguous reshapes otherwise
    y = y.reshape(B, Cout, H, Wp)[:, :, :, :W].reshape(B, Cout, H * W)
    return y, st.sum(axis=0)


def bn_act(y, pn, *, out_dtype):
    B, C, HW = y.shape
    St = _pick_spatial_tile(HW)
    S = HW // St
    return pl.pallas_call(
        bn_act_kernel,
        out_shape=jax.ShapeDtypeStruct((B, C, HW), out_dtype),
        grid=(B, S),
        in_specs=[pl.BlockSpec((1, C, St), lambda bb, ss: (bb, 0, ss)),
                  pl.BlockSpec((C, 2), lambda bb, ss: (0, 0))],
        out_specs=pl.BlockSpec((1, C, St), lambda bb, ss: (bb, 0, ss)),
        compiler_params=_PAR(dimension_semantics=("parallel", "parallel")),
    )(y, pn)


def bn_combine(y4, x, wgt, pn, *, out_dtype=jnp.bfloat16):
    B, C, HW = y4.shape
    St = _pick_spatial_tile(HW)
    S = HW // St
    return pl.pallas_call(
        bn_combine_kernel,
        out_shape=jax.ShapeDtypeStruct((B, C, HW), out_dtype),
        grid=(B, S),
        in_specs=[pl.BlockSpec((1, C, St), lambda bb, ss: (bb, 0, ss)),
                  pl.BlockSpec((1, C, St), lambda bb, ss: (bb, 0, ss)),
                  pl.BlockSpec((1, 1, St), lambda bb, ss: (bb, 0, ss)),
                  pl.BlockSpec((C, 2), lambda bb, ss: (0, 0))],
        out_specs=pl.BlockSpec((1, C, St), lambda bb, ss: (bb, 0, ss)),
        compiler_params=_PAR(dimension_semantics=("parallel", "parallel")),
    )(y4, x, wgt, pn)


def pad_for_3x3(act, H, W):
    """(B, C, H*W) -> zero-padded flat (B, C, (H+3)*(W+2)) bf16.

    Pads 1 row/col like the reference conv (padding=1); the two extra bottom rows
    only feed discarded columns of the extended output.
    """
    B, C, _ = act.shape
    a = act.reshape(B, C, H, W)
    a = jnp.pad(a, ((0, 0), (0, 0), (1, 2), (1, 1)))
    return a.reshape(B, C, (H + 3) * (W + 2)).astype(jnp.bfloat16)


def make_colmask(H, W):
    """1/0 mask of valid output columns in the extended (H, W+2) output rows."""
    Wp = W + 2
    m = (np.arange(H * Wp) % Wp) < W
    return jnp.asarray(m, jnp.float32).reshape(1, H * Wp)


def make_padmask(H, W):
    """1/0 mask of valid (non-pad) positions of the padded flat activation."""
    Wp = W + 2
    m = np.zeros((H + 3, Wp), np.float32)
    m[1:H + 1, 1:W + 1] = 1.0
    return jnp.asarray(m.reshape(1, (H + 3) * Wp))


def finalize_bn(stats, gamma, beta, count, eps=1e-5):
    """Fold global (sum, sumsq) into a per-channel (scale, shift) pair (C, 2)."""
    mean = stats[:, 0] / count
    var = jnp.maximum(stats[:, 1] / count - mean * mean, 0.0)
    scale = gamma * jax.lax.rsqrt(var + eps)
    shift = beta - mean * scale
    return jnp.stack([scale, shift], axis=1).astype(jnp.float32)


# ----------------------------------------------------------------------------
# Parameter construction (deterministic, synthetic)
# ----------------------------------------------------------------------------

def quaternion_conv_params(key, in_ch, out_ch, k):
    """Hamilton-product weight of a QuaternionConv2d, pre-shaped for the kernels."""
    kr, ki, kj, kk, kb = jax.random.split(key, 5)
    shape = (out_ch // 4, in_ch // 4, k, k)
    r = 0.1 * jax.random.normal(kr, shape, jnp.float32)
    i = 0.1 * jax.random.normal(ki, shape, jnp.float32)
    j = 0.1 * jax.random.normal(kj, shape, jnp.float32)
    q = 0.1 * jax.random.normal(kk, shape, jnp.float32)
    row_r = jnp.concatenate([r, -i, -j, -q], axis=1)
    row_i = jnp.concatenate([i, r, -q, j], axis=1)
    row_j = jnp.concatenate([j, q, r, -i], axis=1)
    row_k = jnp.concatenate([q, -j, i, r], axis=1)
    w = jnp.concatenate([row_r, row_i, row_j, row_k], axis=0)   # (out, in, k, k)
    b = 0.05 * jax.random.normal(kb, (out_ch,), jnp.float32)
    if k == 1:
        wm = w[:, :, 0, 0].astype(jnp.bfloat16)                 # (Cout, Cin)
    else:
        wm = jnp.transpose(w, (2, 3, 0, 1)).reshape(
            k * k, out_ch, in_ch).astype(jnp.bfloat16)          # (k*k, Cout, Cin)
    return wm, b.reshape(out_ch, 1)


def bn_params(key, ch):
    kg, kb = jax.random.split(key)
    gamma = 1.0 + 0.1 * jax.random.normal(kg, (ch,), jnp.float32)
    beta = 0.1 * jax.random.normal(kb, (ch,), jnp.float32)
    return gamma, beta


def init_params(key, in_channels, out_channels):
    width = in_channels // 4
    keys = jax.random.split(key, 8)
    p = {}
    p["conv1"] = quaternion_conv_params(keys[0], in_channels, width, 1)
    p["bn1"] = bn_params(keys[1], width)
    p["conv2"] = quaternion_conv_params(keys[2], width, width, 3)
    p["bn2"] = bn_params(keys[3], width)
    # conv3/bn3 exist in Bottleneck.__init__ but are unused in its forward.
    p["conv4"] = quaternion_conv_params(keys[4], width, in_channels, 1)
    p["bn4"] = bn_params(keys[5], in_channels)
    p["convT_down"] = quaternion_conv_params(keys[6], in_channels, out_channels, 3)
    p["norm"] = bn_params(keys[7], out_channels)
    # self.convT exists in Quaternion_pyramid.__init__ but is unused in forward.
    return p


# ----------------------------------------------------------------------------
# Full forward
# ----------------------------------------------------------------------------

def quaternion_pyramid_forward(x, p):
    B, C, H, W = x.shape
    HW = H * W
    x_flat = x.reshape(B, C, HW)                    # free reshape, layout preserved
    colmask = make_colmask(H, W)
    padmask = make_padmask(H, W)
    cnt = B * HW                                    # BN statistics count (N*H*W)

    # spatial attention weight (channel scaling + mean/max + HxH matmuls + sigmoid)
    wgt = attention_weight(x).reshape(B, 1, HW)     # (B, 1, HW) f32

    # ---- Bottleneck: conv1/bn1/relu -> conv2/bn2/relu -> conv4/bn4 (+res, fused) ----
    w1, b1 = p["conv1"]; g1, be1 = p["bn1"]
    y1, st1 = conv1x1(x_flat, w1, b1)               # raw conv1 + stats
    pn1 = finalize_bn(st1, g1, be1, cnt)

    w2, b2 = p["conv2"]; g2, be2 = p["bn2"]
    # bn1 + ReLU fused into conv2's input stage (padmask keeps pad positions 0)
    y2, st2 = conv3x3(pad_for_3x3(y1, H, W), w2, b2, colmask,
                      H=H, W=W, pn=pn1, padmask=padmask)
    pn2 = finalize_bn(st2, g2, be2, cnt)

    w4, b4 = p["conv4"]; g4, be4 = p["bn4"]
    y4, st4 = conv1x1(y2, w4, b4, pn=pn2)           # bn2 + ReLU fused into conv4 input
    pn4 = finalize_bn(st4, g4, be4, cnt)

    # out = x * weight + relu(bn4_out + x)   (bn4 + residual + attention, one kernel)
    out = bn_combine(y4, x_flat, wgt, pn4)          # (B, C, HW) bf16

    # ---- convT_dowdimension + BatchNorm + ReLU ----
    wt, bt = p["convT_down"]; gn, ben = p["norm"]
    yT, stT = conv3x3(pad_for_3x3(out, H, W), wt, bt, colmask, H=H, W=W)
    pnN = finalize_bn(stT, gn, ben, cnt)
    outT = bn_act(yT, pnN, out_dtype=jnp.float32)   # (B, Cout, HW) f32
    return outT.reshape(B, -1, H, W)


if __name__ == "__main__":
    key = jax.random.PRNGKey(0)
    kx, kp = jax.random.split(key)

    B, C, H, W = 2, 16, 16, 16       # C must be divisible by 16; H == W
    out_channels = 8                 # divisible by 4 (quaternion conv)

    x = jax.random.normal(kx, (B, C, H, W), jnp.float32)
    params = init_params(kp, C, out_channels)

    fwd = jax.jit(quaternion_pyramid_forward)
    y = jax.block_until_ready(fwd(x, params))

    assert y.shape == (B, out_channels, H, W), y.shape
    assert bool(jnp.all(jnp.isfinite(y)))
    print("KERNEL_OK")
</pallas_src>

<mosaic_0001>
module attributes {stable_mosaic.version = 11 : i64} {
  func.func @conv1x1_kernel(%arg0: i32, %arg1: i32, %arg2: memref<1x16x256xf32, #tpu.memory_space<vmem>>, %arg3: memref<4x16xbf16, #tpu.memory_space<vmem>>, %arg4: memref<4x1xf32, #tpu.memory_space<vmem>>, %arg5: memref<1x4x256xbf16, #tpu.memory_space<vmem>>, %arg6: memref<1x1x4x2xf32, #tpu.memory_space<vmem>>) attributes {dimension_semantics = [#tpu.dimension_semantics<parallel>, #tpu.dimension_semantics<parallel>], iteration_bounds = array<i64: 2, 1>, scalar_prefetch = 0 : i64, scratch_operands = 0 : i64, tpu.core_type = #tpu.core_type<tc>, window_params = [{transform_indices = @transform_0, window_bounds = array<i64: 1, 16, 256>}, {pipeline_mode = #tpu.pipeline_mode<synchronous>, transform_indices = @transform_1, window_bounds = array<i64: 4, 16>}, {pipeline_mode = #tpu.pipeline_mode<synchronous>, transform_indices = @transform_2, window_bounds = array<i64: 4, 1>}, {transform_indices = @transform_3, window_bounds = array<i64: 1, 4, 256>}, {transform_indices = @transform_4, window_bounds = array<i64: 1, 1, 4, 2>}]} {
    %c0 = arith.constant 0 : index
    %c0_0 = arith.constant 0 : index
    %c0_1 = arith.constant 0 : index
    %0 = vector.load %arg2[%c0, %c0_0, %c0_1] : memref<1x16x256xf32, #tpu.memory_space<vmem>>, vector<1x16x256xf32>
    %1 = vector.shape_cast %0 : vector<1x16x256xf32> to vector<16x256xf32>
    %2 = arith.truncf %1 : vector<16x256xf32> to vector<16x256xbf16>
    %c0_2 = arith.constant 0 : index
    %c0_3 = arith.constant 0 : index
    %3 = vector.load %arg3[%c0_2, %c0_3] : memref<4x16xbf16, #tpu.memory_space<vmem>>, vector<4x16xbf16>
    %cst = arith.constant dense<0.000000e+00> : vector<4x256xf32>
    %4 = tpu.matmul %3, %2, %cst {dimension_numbers = #tpu.dot_dimension_numbers<[1], [0], [0], [1], [0, 0, 1, 1], [], []>} : vector<4x16xbf16>, vector<16x256xbf16>, vector<4x256xf32> -> vector<4x256xf32>
    %c0_4 = arith.constant 0 : index
    %c0_5 = arith.constant 0 : index
    %5 = vector.load %arg4[%c0_4, %c0_5] : memref<4x1xf32, #tpu.memory_space<vmem>>, vector<4x1xf32>
    %6 = vector.broadcast %5 : vector<4x1xf32> to vector<4x256xf32>
    %7 = arith.addf %4, %6 : vector<4x256xf32>
    %8 = arith.truncf %7 : vector<4x256xf32> to vector<4x256xbf16>
    %c0_6 = arith.constant 0 : index
    %c0_7 = arith.constant 0 : index
    %c0_8 = arith.constant 0 : index
    %9 = vector.load %arg5[%c0_6, %c0_7, %c0_8] : memref<1x4x256xbf16, #tpu.memory_space<vmem>>, vector<1x4x256xbf16>
    %10 = vector.shape_cast %9 : vector<1x4x256xbf16> to vector<4x256xbf16>
    %11 = vector.shape_cast %8 : vector<4x256xbf16> to vector<1x4x256xbf16>
    tpu.vector_store %arg5[%c0_6, %c0_7, %c0_8], %11 {strides = array<i32>} : memref<1x4x256xbf16, #tpu.memory_space<vmem>>, vector<1x4x256xbf16>,
    %cst_9 = arith.constant dense<0.000000e+00> : vector<4xf32>
    %12 = vector.multi_reduction <add>, %7, %cst_9 [1] : vector<4x256xf32> to vector<4xf32>
    %13 = vector.shape_cast %12 : vector<4xf32> to vector<4x1xf32>
    %14 = arith.mulf %7, %7 : vector<4x256xf32>
    %cst_10 = arith.constant dense<0.000000e+00> : vector<4xf32>
    %15 = vector.multi_reduction <add>, %14, %cst_10 [1] : vector<4x256xf32> to vector<4xf32>
    %16 = vector.shape_cast %15 : vector<4xf32> to vector<4x1xf32>
    %17 = tpu.concatenate %13, %16 in 1 : vector<4x1xf32>, vector<4x1xf32> -> vector<4x2xf32>
    %c0_11 = arith.constant 0 : index
    %c0_12 = arith.constant 0 : index
    %c0_13 = arith.constant 0 : index
    %c0_14 = arith.constant 0 : index
    %18 = vector.load %arg6[%c0_11, %c0_12, %c0_13, %c0_14] : memref<1x1x4x2xf32, #tpu.memory_space<vmem>>, vector<1x1x4x2xf32>
    %19 = vector.shape_cast %18 : vector<1x1x4x2xf32> to vector<4x2xf32>
    %20 = vector.shape_cast %17 : vector<4x2xf32> to vector<1x1x4x2xf32>
    tpu.vector_store %arg6[%c0_11, %c0_12, %c0_13, %c0_14], %20 {strides = array<i32>} : memref<1x1x4x2xf32, #tpu.memory_space<vmem>>, vector<1x1x4x2xf32>,
    return
  }
  func.func @transform_0(%arg0: i32, %arg1: i32) -> (i32, i32, i32) {
    %c0_i32 = arith.constant 0 : i32
    %c0_i32_0 = arith.constant 0 : i32
    return %arg0, %c0_i32, %arg1 : i32, i32, i32
  }
  func.func @transform_1(%arg0: i32, %arg1: i32) -> (i32, i32) {
    %c0_i32 = arith.constant 0 : i32
    %c0_i32_0 = arith.constant 0 : i32
    %c0_i32_1 = arith.constant 0 : i32
    return %c0_i32, %c0_i32_0 : i32, i32
  }
  func.func @transform_2(%arg0: i32, %arg1: i32) -> (i32, i32) {
    %c0_i32 = arith.constant 0 : i32
    %c0_i32_0 = arith.constant 0 : i32
    %c0_i32_1 = arith.constant 0 : i32
    return %c0_i32, %c0_i32_0 : i32, i32
  }
  func.func @transform_3(%arg0: i32, %arg1: i32) -> (i32, i32, i32) {
    %c0_i32 = arith.constant 0 : i32
    %c0_i32_0 = arith.constant 0 : i32
    return %arg0, %c0_i32, %arg1 : i32, i32, i32
  }
  func.func @transform_4(%arg0: i32, %arg1: i32) -> (i32, i32, i32, i32) {
    %c0_i32 = arith.constant 0 : i32
    %c0_i32_0 = arith.constant 0 : i32
    %c0_i32_1 = arith.constant 0 : i32
    return %arg0, %arg1, %c0_i32, %c0_i32_0 : i32, i32, i32, i32
  }
}

module attributes {stable_mosaic.version = 11 : i64} {
  func.func @conv3x3_kernel(%arg0: i32, %arg1: memref<1x4x342xbf16, #tpu.memory_space<vmem>>, %arg2: memref<9x4x4xbf16, #tpu.memory_space<vmem>>, %arg3: memref<4x1xf32, #tpu.memory_space<vmem>>, %arg4: memref<1x288xf32, #tpu.memory_space<vmem>>, %arg5: memref<4x2xf32, #tpu.memory_space<vmem>>, %arg6: memref<1x342xf32, #tpu.memory_space<vmem>>, %arg7: memref<1x4x288xbf16, #tpu.memory_space<vmem>>, %arg8: memref<1x4x2xf32, #tpu.memory_space<vmem>>, %arg9: memref<4x342xbf16, #tpu.memory_space<vmem>>) attributes {dimension_semantics = [#tpu.dimension_semantics<parallel>], iteration_bounds = array<i64: 2>, scalar_prefetch = 0 : i64, scratch_operands = 1 : i64, tpu.core_type = #tpu.core_type<tc>, window_params = [{transform_indices = @transform_0, window_bounds = array<i64: 1, 4, 342>}, {pipeline_mode = #tpu.pipeline_mode<synchronous>, transform_indices = @transform_1, window_bounds = array<i64: 9, 4, 4>}, {pipeline_mode = #tpu.pipeline_mode<synchronous>, transform_indices = @transform_2, window_bounds = array<i64: 4, 1>}, {pipeline_mode = #tpu.pipeline_mode<synchronous>, transform_indices = @transform_3, window_bounds = array<i64: 1, 288>}, {pipeline_mode = #tpu.pipeline_mode<synchronous>, transform_indices = @transform_4, window_bounds = array<i64: 4, 2>}, {pipeline_mode = #tpu.pipeline_mode<synchronous>, transform_indices = @transform_5, window_bounds = array<i64: 1, 342>}, {transform_indices = @transform_6, window_bounds = array<i64: 1, 4, 288>}, {transform_indices = @transform_7, window_bounds = array<i64: 1, 4, 2>}]} {
    %c0 = arith.constant 0 : index
    %c0_0 = arith.constant 0 : index
    %c0_1 = arith.constant 0 : index
    %0 = vector.load %arg1[%c0, %c0_0, %c0_1] : memref<1x4x342xbf16, #tpu.memory_space<vmem>>, vector<1x4x342xbf16>
    %1 = vector.shape_cast %0 : vector<1x4x342xbf16> to vector<4x342xbf16>
    %2 = arith.extf %1 : vector<4x342xbf16> to vector<4x342xf32>
    %c0_2 = arith.constant 0 : index
    %c0_3 = arith.constant 0 : index
    %3 = vector.load %arg5[%c0_2, %c0_3] : memref<4x2xf32, #tpu.memory_space<vmem>>, vector<4x1xf32>
    %4 = vector.broadcast %3 : vector<4x1xf32> to vector<4x342xf32>
    %5 = arith.mulf %2, %4 : vector<4x342xf32>
    %c0_4 = arith.constant 0 : index
    %c1 = arith.constant 1 : index
    %6 = vector.load %arg5[%c0_4, %c1] : memref<4x2xf32, #tpu.memory_space<vmem>>, vector<4x1xf32>
    %7 = vector.broadcast %6 : vector<4x1xf32> to vector<4x342xf32>
    %8 = arith.addf %5, %7 : vector<4x342xf32>
    %cst = arith.constant 0.000000e+00 : f32
    %9 = vector.broadcast %cst : f32 to vector<4x342xf32>
    %10 = arith.maximumf %8, %9 : vector<4x342xf32>
    %c0_5 = arith.constant 0 : index
    %c0_6 = arith.constant 0 : index
    %11 = vector.load %arg6[%c0_5, %c0_6] : memref<1x342xf32, #tpu.memory_space<vmem>>, vector<1x342xf32>
    %12 = vector.broadcast %11 : vector<1x342xf32> to vector<4x342xf32>
    %13 = arith.mulf %10, %12 : vector<4x342xf32>
    %14 = arith.truncf %13 : vector<4x342xf32> to vector<4x342xbf16>
    %c0_7 = arith.constant 0 : index
    %c0_8 = arith.constant 0 : index
    %15 = vector.load %arg9[%c0_7, %c0_8] : memref<4x342xbf16, #tpu.memory_space<vmem>>, vector<4x342xbf16>
    tpu.vector_store %arg9[%c0_7, %c0_8], %14 {strides = array<i32>} : memref<4x342xbf16, #tpu.memory_space<vmem>>, vector<4x342xbf16>,
    %cst_9 = arith.constant 0.000000e+00 : f32
    %16 = vector.broadcast %cst_9 : f32 to vector<4x288xf32>
    %c0_10 = arith.constant 0 : index
    %c0_11 = arith.constant 0 : index
    %c0_12 = arith.constant 0 : index
    %17 = vector.load %arg2[%c0_10, %c0_11, %c0_12] : memref<9x4x4xbf16, #tpu.memory_space<vmem>>, vector<1x4x4xbf16>
    %18 = vector.shape_cast %17 : vector<1x4x4xbf16> to vector<4x4xbf16>
    %c0_13 = arith.constant 0 : index
    %c0_14 = arith.constant 0 : index
    %19 = vector.load %arg9[%c0_13, %c0_14] : memref<4x342xbf16, #tpu.memory_space<vmem>>, vector<4x288xbf16>
    %cst_15 = arith.constant dense<0.000000e+00> : vector<4x288xf32>
    %20 = tpu.matmul %18, %19, %cst_15 {dimension_numbers = #tpu.dot_dimension_numbers<[1], [0], [0], [1], [0, 0, 1, 1], [], []>} : vector<4x4xbf16>, vector<4x288xbf16>, vector<4x288xf32> -> vector<4x288xf32>
    %21 = arith.addf %16, %20 : vector<4x288xf32>
    %c1_16 = arith.constant 1 : index
    %c0_17 = arith.constant 0 : index
    %c0_18 = arith.constant 0 : index
    %22 = vector.load %arg2[%c1_16, %c0_17, %c0_18] : memref<9x4x4xbf16, #tpu.memory_space<vmem>>, vector<1x4x4xbf16>
    %23 = vector.shape_cast %22 : vector<1x4x4xbf16> to vector<4x4xbf16>
    %c0_19 = arith.constant 0 : index
    %c1_20 = arith.constant 1 : index
    %24 = vector.load %arg9[%c0_19, %c1_20] : memref<4x342xbf16, #tpu.memory_space<vmem>>, vector<4x288xbf16>
    %cst_21 = arith.constant dense<0.000000e+00> : vector<4x288xf32>
    %25 = tpu.matmul %23, %24, %cst_21 {dimension_numbers = #tpu.dot_dimension_numbers<[1], [0], [0], [1], [0, 0, 1, 1], [], []>} : vector<4x4xbf16>, vector<4x288xbf16>, vector<4x288xf32> -> vector<4x288xf32>
    %26 = arith.addf %21, %25 : vector<4x288xf32>
    %c2 = arith.constant 2 : index
    %c0_22 = arith.constant 0 : index
    %c0_23 = arith.constant 0 : index
    %27 = vector.load %arg2[%c2, %c0_22, %c0_23] : memref<9x4x4xbf16, #tpu.memory_space<vmem>>, vector<1x4x4xbf16>
    %28 = vector.shape_cast %27 : vector<1x4x4xbf16> to vector<4x4xbf16>
    %c0_24 = arith.constant 0 : index
    %c2_25 = arith.constant 2 : index
    %29 = vector.load %arg9[%c0_24, %c2_25] : memref<4x342xbf16, #tpu.memory_space<vmem>>, vector<4x288xbf16>
    %cst_26 = arith.constant dense<0.000000e+00> : vector<4x288xf32>
    %30 = tpu.matmul %28, %29, %cst_26 {dimension_numbers = #tpu.dot_dimension_numbers<[1], [0], [0], [1], [0, 0, 1, 1], [], []>} : vector<4x4xbf16>, vector<4x288xbf16>, vector<4x288xf32> -> vector<4x288xf32>
    %31 = arith.addf %26, %30 : vector<4x288xf32>
    %c3 = arith.constant 3 : index
    %c0_27 = arith.constant 0 : index
    %c0_28 = arith.constant 0 : index
    %32 = vector.load %arg2[%c3, %c0_27, %c0_28] : memref<9x4x4xbf16, #tpu.memory_space<vmem>>, vector<1x4x4xbf16>
    %33 = vector.shape_cast %32 : vector<1x4x4xbf16> to vector<4x4xbf16>
    %c0_29 = arith.constant 0 : index
    %c18 = arith.constant 18 : index
    %34 = vector.load %arg9[%c0_29, %c18] : memref<4x342xbf16, #tpu.memory_space<vmem>>, vector<4x288xbf16>
    %cst_30 = arith.constant dense<0.000000e+00> : vector<4x288xf32>
    %35 = tpu.matmul %33, %34, %cst_30 {dimension_numbers = #tpu.dot_dimension_numbers<[1], [0], [0], [1], [0, 0, 1, 1], [], []>} : vector<4x4xbf16>, vector<4x288xbf16>, vector<4x288xf32> -> vector<4x288xf32>
    %36 = arith.addf %31, %35 : vector<4x288xf32>
    %c4 = arith.constant 4 : index
    %c0_31 = arith.constant 0 : index
    %c0_32 = arith.constant 0 : index
    %37 = vector.load %arg2[%c4, %c0_31, %c0_32] : memref<9x4x4xbf16, #tpu.memory_space<vmem>>, vector<1x4x4xbf16>
    %38 = vector.shape_cast %37 : vector<1x4x4xbf16> to vector<4x4xbf16>
    %c0_33 = arith.constant 0 : index
    %c19 = arith.constant 19 : index
    %39 = vector.load %arg9[%c0_33, %c19] : memref<4x342xbf16, #tpu.memory_space<vmem>>, vector<4x288xbf16>
    %cst_34 = arith.constant dense<0.000000e+00> : vector<4x288xf32>
    %40 = tpu.matmul %38, %39, %cst_34 {dimension_numbers = #tpu.dot_dimension_numbers<[1], [0], [0], [1], [0, 0, 1, 1], [], []>} : vector<4x4xbf16>, vector<4x288xbf16>, vector<4x288xf32> -> vector<4x288xf32>
    %41 = arith.addf %36, %40 : vector<4x288xf32>
    %c5 = arith.constant 5 : index
    %c0_35 = arith.constant 0 : index
    %c0_36 = arith.constant 0 : index
    %42 = vector.load %arg2[%c5, %c0_35, %c0_36] : memref<9x4x4xbf16, #tpu.memory_space<vmem>>, vector<1x4x4xbf16>
    %43 = vector.shape_cast %42 : vector<1x4x4xbf16> to vector<4x4xbf16>
    %c0_37 = arith.constant 0 : index
    %c20 = arith.constant 20 : index
    %44 = vector.load %arg9[%c0_37, %c20] : memref<4x342xbf16, #tpu.memory_space<vmem>>, vector<4x288xbf16>
    %cst_38 = arith.constant dense<0.000000e+00> : vector<4x288xf32>
    %45 = tpu.matmul %43, %44, %cst_38 {dimension_numbers = #tpu.dot_dimension_numbers<[1], [0], [0], [1], [0, 0, 1, 1], [], []>} : vector<4x4xbf16>, vector<4x288xbf16>, vector<4x288xf32> -> vector<4x288xf32>
    %46 = arith.addf %41, %45 : vector<4x288xf32>
    %c6 = arith.constant 6 : index
    %c0_39 = arith.constant 0 : index
    %c0_40 = arith.constant 0 : index
    %47 = vector.load %arg2[%c6, %c0_39, %c0_40] : memref<9x4x4xbf16, #tpu.memory_space<vmem>>, vector<1x4x4xbf16>
    %48 = vector.shape_cast %47 : vector<1x4x4xbf16> to vector<4x4xbf16>
    %c0_41 = arith.constant 0 : index
    %c36 = arith.constant 36 : index
    %49 = vector.load %arg9[%c0_41, %c36] : memref<4x342xbf16, #tpu.memory_space<vmem>>, vector<4x288xbf16>
    %cst_42 = arith.constant dense<0.000000e+00> : vector<4x288xf32>
    %50 = tpu.matmul %48, %49, %cst_42 {dimension_numbers = #tpu.dot_dimension_numbers<[1], [0], [0], [1], [0, 0, 1, 1], [], []>} : vector<4x4xbf16>, vector<4x288xbf16>, vector<4x288xf32> -> vector<4x288xf32>
    %51 = arith.addf %46, %50 : vector<4x288xf32>
    %c7 = arith.constant 7 : index
    %c0_43 = arith.constant 0 : index
    %c0_44 = arith.constant 0 : index
    %52 = vector.load %arg2[%c7, %c0_43, %c0_44] : memref<9x4x4xbf16, #tpu.memory_space<vmem>>, vector<1x4x4xbf16>
    %53 = vector.shape_cast %52 : vector<1x4x4xbf16> to vector<4x4xbf16>
    %c0_45 = arith.constant 0 : index
    %c37 = arith.constant 37 : index
    %54 = vector.load %arg9[%c0_45, %c37] : memref<4x342xbf16, #tpu.memory_space<vmem>>, vector<4x288xbf16>
    %cst_46 = arith.constant dense<0.000000e+00> : vector<4x288xf32>
    %55 = tpu.matmul %53, %54, %cst_46 {dimension_numbers = #tpu.dot_dimension_numbers<[1], [0], [0], [1], [0, 0, 1, 1], [], []>} : vector<4x4xbf16>, vector<4x288xbf16>, vector<4x288xf32> -> vector<4x288xf32>
    %56 = arith.addf %51, %55 : vector<4x288xf32>
    %c8 = arith.constant 8 : index
    %c0_47 = arith.constant 0 : index
    %c0_48 = arith.constant 0 : index
    %57 = vector.load %arg2[%c8, %c0_47, %c0_48] : memref<9x4x4xbf16, #tpu.memory_space<vmem>>, vector<1x4x4xbf16>
    %58 = vector.shape_cast %57 : vector<1x4x4xbf16> to vector<4x4xbf16>
    %c0_49 = arith.constant 0 : index
    %c38 = arith.constant 38 : index
    %59 = vector.load %arg9[%c0_49, %c38] : memref<4x342xbf16, #tpu.memory_space<vmem>>, vector<4x288xbf16>
    %cst_50 = arith.constant dense<0.000000e+00> : vector<4x288xf32>
    %60 = tpu.matmul %58, %59, %cst_50 {dimension_numbers = #tpu.dot_dimension_numbers<[1], [0], [0], [1], [0, 0, 1, 1], [], []>} : vector<4x4xbf16>, vector<4x288xbf16>, vector<4x288xf32> -> vector<4x288xf32>
    %61 = arith.addf %56, %60 : vector<4x288xf32>
    %c0_51 = arith.constant 0 : index
    %c0_52 = arith.constant 0 : index
    %62 = vector.load %arg3[%c0_51, %c0_52] : memref<4x1xf32, #tpu.memory_space<vmem>>, vector<4x1xf32>
    %63 = vector.broadcast %62 : vector<4x1xf32> to vector<4x288xf32>
    %64 = arith.addf %61, %63 : vector<4x288xf32>
    %65 = arith.truncf %64 : vector<4x288xf32> to vector<4x288xbf16>
    %c0_53 = arith.constant 0 : index
    %c0_54 = arith.constant 0 : index
    %c0_55 = arith.constant 0 : index
    %66 = vector.load %arg7[%c0_53, %c0_54, %c0_55] : memref<1x4x288xbf16, #tpu.memory_space<vmem>>, vector<1x4x288xbf16>
    %67 = vector.shape_cast %66 : vector<1x4x288xbf16> to vector<4x288xbf16>
    %68 = vector.shape_cast %65 : vector<4x288xbf16> to vector<1x4x288xbf16>
    tpu.vector_store %arg7[%c0_53, %c0_54, %c0_55], %68 {strides = array<i32>} : memref<1x4x288xbf16, #tpu.memory_space<vmem>>, vector<1x4x288xbf16>,
    %c0_56 = arith.constant 0 : index
    %c0_57 = arith.constant 0 : index
    %69 = vector.load %arg4[%c0_56, %c0_57] : memref<1x288xf32, #tpu.memory_space<vmem>>, vector<1x288xf32>
    %70 = vector.broadcast %69 : vector<1x288xf32> to vector<4x288xf32>
    %71 = arith.mulf %64, %70 : vector<4x288xf32>
    %cst_58 = arith.constant dense<0.000000e+00> : vector<4xf32>
    %72 = vector.multi_reduction <add>, %71, %cst_58 [1] : vector<4x288xf32> to vector<4xf32>
    %73 = vector.shape_cast %72 : vector<4xf32> to vector<4x1xf32>
    %74 = arith.mulf %71, %64 : vector<4x288xf32>
    %cst_59 = arith.constant dense<0.000000e+00> : vector<4xf32>
    %75 = vector.multi_reduction <add>, %74, %cst_59 [1] : vector<4x288xf32> to vector<4xf32>
    %76 = vector.shape_cast %75 : vector<4xf32> to vector<4x1xf32>
    %77 = tpu.concatenate %73, %76 in 1 : vector<4x1xf32>, vector<4x1xf32> -> vector<4x2xf32>
    %c0_60 = arith.constant 0 : index
    %c0_61 = arith.constant 0 : index
    %c0_62 = arith.constant 0 : index
    %78 = vector.load %arg8[%c0_60, %c0_61, %c0_62] : memref<1x4x2xf32, #tpu.memory_space<vmem>>, vector<1x4x2xf32>
    %79 = vector.shape_cast %78 : vector<1x4x2xf32> to vector<4x2xf32>
    %80 = vector.shape_cast %77 : vector<4x2xf32> to vector<1x4x2xf32>
    tpu.vector_store %arg8[%c0_60, %c0_61, %c0_62], %80 {strides = array<i32>} : memref<1x4x2xf32, #tpu.memory_space<vmem>>, vector<1x4x2xf32>,
    return
  }
  func.func @transform_0(%arg0: i32) -> (i32, i32, i32) {
    %c0_i32 = arith.constant 0 : i32
    %c0_i32_0 = arith.constant 0 : i32
    %c0_i32_1 = arith.constant 0 : i32
    return %arg0, %c0_i32, %c0_i32_0 : i32, i32, i32
  }
  func.func @transform_1(%arg0: i32) -> (i32, i32, i32) {
    %c0_i32 = arith.constant 0 : i32
    %c0_i32_0 = arith.constant 0 : i32
    %c0_i32_1 = arith.constant 0 : i32
    %c0_i32_2 = arith.constant 0 : i32
    return %c0_i32, %c0_i32_0, %c0_i32_1 : i32, i32, i32
  }
  func.func @transform_2(%arg0: i32) -> (i32, i32) {
    %c0_i32 = arith.constant 0 : i32
    %c0_i32_0 = arith.constant 0 : i32
    %c0_i32_1 = arith.constant 0 : i32
    return %c0_i32, %c0_i32_0 : i32, i32
  }
  func.func @transform_3(%arg0: i32) -> (i32, i32) {
    %c0_i32 = arith.constant 0 : i32
    %c0_i32_0 = arith.constant 0 : i32
    %c0_i32_1 = arith.constant 0 : i32
    return %c0_i32, %c0_i32_0 : i32, i32
  }
  func.func @transform_4(%arg0: i32) -> (i32, i32) {
    %c0_i32 = arith.constant 0 : i32
    %c0_i32_0 = arith.constant 0 : i32
    %c0_i32_1 = arith.constant 0 : i32
    return %c0_i32, %c0_i32_0 : i32, i32
  }
  func.func @transform_5(%arg0: i32) -> (i32, i32) {
    %c0_i32 = arith.constant 0 : i32
    %c0_i32_0 = arith.constant 0 : i32
    %c0_i32_1 = arith.constant 0 : i32
    return %c0_i32, %c0_i32_0 : i32, i32
  }
  func.func @transform_6(%arg0: i32) -> (i32, i32, i32) {
    %c0_i32 = arith.constant 0 : i32
    %c0_i32_0 = arith.constant 0 : i32
    %c0_i32_1 = arith.constant 0 : i32
    return %arg0, %c0_i32, %c0_i32_0 : i32, i32, i32
  }
  func.func @transform_7(%arg0: i32) -> (i32, i32, i32) {
    %c0_i32 = arith.constant 0 : i32
    %c0_i32_0 = arith.constant 0 : i32
    %c0_i32_1 = arith.constant 0 : i32
    return %arg0, %c0_i32, %c0_i32_0 : i32, i32, i32
  }
}

module attributes {stable_mosaic.version = 11 : i64} {
  func.func @conv1x1_kernel(%arg0: i32, %arg1: i32, %arg2: memref<1x4x256xbf16, #tpu.memory_space<vmem>>, %arg3: memref<16x4xbf16, #tpu.memory_space<vmem>>, %arg4: memref<16x1xf32, #tpu.memory_space<vmem>>, %arg5: memref<4x2xf32, #tpu.memory_space<vmem>>, %arg6: memref<1x16x256xbf16, #tpu.memory_space<vmem>>, %arg7: memref<1x1x16x2xf32, #tpu.memory_space<vmem>>) attributes {dimension_semantics = [#tpu.dimension_semantics<parallel>, #tpu.dimension_semantics<parallel>], iteration_bounds = array<i64: 2, 1>, scalar_prefetch = 0 : i64, scratch_operands = 0 : i64, tpu.core_type = #tpu.core_type<tc>, window_params = [{transform_indices = @transform_0, window_bounds = array<i64: 1, 4, 256>}, {pipeline_mode = #tpu.pipeline_mode<synchronous>, transform_indices = @transform_1, window_bounds = array<i64: 16, 4>}, {pipeline_mode = #tpu.pipeline_mode<synchronous>, transform_indices = @transform_2, window_bounds = array<i64: 16, 1>}, {pipeline_mode = #tpu.pipeline_mode<synchronous>, transform_indices = @transform_3, window_bounds = array<i64: 4, 2>}, {transform_indices = @transform_4, window_bounds = array<i64: 1, 16, 256>}, {transform_indices = @transform_5, window_bounds = array<i64: 1, 1, 16, 2>}]} {
    %c0 = arith.constant 0 : index
    %c0_0 = arith.constant 0 : index
    %c0_1 = arith.constant 0 : index
    %0 = vector.load %arg2[%c0, %c0_0, %c0_1] : memref<1x4x256xbf16, #tpu.memory_space<vmem>>, vector<1x4x256xbf16>
    %1 = vector.shape_cast %0 : vector<1x4x256xbf16> to vector<4x256xbf16>
    %2 = arith.extf %1 : vector<4x256xbf16> to vector<4x256xf32>
    %c0_2 = arith.constant 0 : index
    %c0_3 = arith.constant 0 : index
    %3 = vector.load %arg5[%c0_2, %c0_3] : memref<4x2xf32, #tpu.memory_space<vmem>>, vector<4x1xf32>
    %4 = vector.broadcast %3 : vector<4x1xf32> to vector<4x256xf32>
    %5 = arith.mulf %2, %4 : vector<4x256xf32>
    %c0_4 = arith.constant 0 : index
    %c1 = arith.constant 1 : index
    %6 = vector.load %arg5[%c0_4, %c1] : memref<4x2xf32, #tpu.memory_space<vmem>>, vector<4x1xf32>
    %7 = vector.broadcast %6 : vector<4x1xf32> to vector<4x256xf32>
    %8 = arith.addf %5, %7 : vector<4x256xf32>
    %cst = arith.constant 0.000000e+00 : f32
    %9 = vector.broadcast %cst : f32 to vector<4x256xf32>
    %10 = arith.maximumf %8, %9 : vector<4x256xf32>
    %11 = arith.truncf %10 : vector<4x256xf32> to vector<4x256xbf16>
    %c0_5 = arith.constant 0 : index
    %c0_6 = arith.constant 0 : index
    %12 = vector.load %arg3[%c0_5, %c0_6] : memref<16x4xbf16, #tpu.memory_space<vmem>>, vector<16x4xbf16>
    %cst_7 = arith.constant dense<0.000000e+00> : vector<16x256xf32>
    %13 = tpu.matmul %12, %11, %cst_7 {dimension_numbers = #tpu.dot_dimension_numbers<[1], [0], [0], [1], [0, 0, 1, 1], [], []>} : vector<16x4xbf16>, vector<4x256xbf16>, vector<16x256xf32> -> vector<16x256xf32>
    %c0_8 = arith.constant 0 : index
    %c0_9 = arith.constant 0 : index
    %14 = vector.load %arg4[%c0_8, %c0_9] : memref<16x1xf32, #tpu.memory_space<vmem>>, vector<16x1xf32>
    %15 = vector.broadcast %14 : vector<16x1xf32> to vector<16x256xf32>
    %16 = arith.addf %13, %15 : vector<16x256xf32>
    %17 = arith.truncf %16 : vector<16x256xf32> to vector<16x256xbf16>
    %c0_10 = arith.constant 0 : index
    %c0_11 = arith.constant 0 : index
    %c0_12 = arith.constant 0 : index
    %18 = vector.load %arg6[%c0_10, %c0_11, %c0_12] : memref<1x16x256xbf16, #tpu.memory_space<vmem>>, vector<1x16x256xbf16>
    %19 = vector.shape_cast %18 : vector<1x16x256xbf16> to vector<16x256xbf16>
    %20 = vector.shape_cast %17 : vector<16x256xbf16> to vector<1x16x256xbf16>
    tpu.vector_store %arg6[%c0_10, %c0_11, %c0_12], %20 {strides = array<i32>} : memref<1x16x256xbf16, #tpu.memory_space<vmem>>, vector<1x16x256xbf16>,
    %cst_13 = arith.constant dense<0.000000e+00> : vector<16xf32>
    %21 = vector.multi_reduction <add>, %16, %cst_13 [1] : vector<16x256xf32> to vector<16xf32>
    %22 = vector.shape_cast %21 : vector<16xf32> to vector<16x1xf32>
    %23 = arith.mulf %16, %16 : vector<16x256xf32>
    %cst_14 = arith.constant dense<0.000000e+00> : vector<16xf32>
    %24 = vector.multi_reduction <add>, %23, %cst_14 [1] : vector<16x256xf32> to vector<16xf32>
    %25 = vector.shape_cast %24 : vector<16xf32> to vector<16x1xf32>
    %26 = tpu.concatenate %22, %25 in 1 : vector<16x1xf32>, vector<16x1xf32> -> vector<16x2xf32>
    %c0_15 = arith.constant 0 : index
    %c0_16 = arith.constant 0 : index
    %c0_17 = arith.constant 0 : index
    %c0_18 = arith.constant 0 : index
    %27 = vector.load %arg7[%c0_15, %c0_16, %c0_17, %c0_18] : memref<1x1x16x2xf32, #tpu.memory_space<vmem>>, vector<1x1x16x2xf32>
    %28 = vector.shape_cast %27 : vector<1x1x16x2xf32> to vector<16x2xf32>
    %29 = vector.shape_cast %26 : vector<16x2xf32> to vector<1x1x16x2xf32>
    tpu.vector_store %arg7[%c0_15, %c0_16, %c0_17, %c0_18], %29 {strides = array<i32>} : memref<1x1x16x2xf32, #tpu.memory_space<vmem>>, vector<1x1x16x2xf32>,
    return
  }
  func.func @transform_0(%arg0: i32, %arg1: i32) -> (i32, i32, i32) {
    %c0_i32 = arith.constant 0 : i32
    %c0_i32_0 = arith.constant 0 : i32
    return %arg0, %c0_i32, %arg1 : i32, i32, i32
  }
  func.func @transform_1(%arg0: i32, %arg1: i32) -> (i32, i32) {
    %c0_i32 = arith.constant 0 : i32
    %c0_i32_0 = arith.constant 0 : i32
    %c0_i32_1 = arith.constant 0 : i32
    return %c0_i32, %c0_i32_0 : i32, i32
  }
  func.func @transform_2(%arg0: i32, %arg1: i32) -> (i32, i32) {
    %c0_i32 = arith.constant 0 : i32
    %c0_i32_0 = arith.constant 0 : i32
    %c0_i32_1 = arith.constant 0 : i32
    return %c0_i32, %c0_i32_0 : i32, i32
  }
  func.func @transform_3(%arg0: i32, %arg1: i32) -> (i32, i32) {
    %c0_i32 = arith.constant 0 : i32
    %c0_i32_0 = arith.constant 0 : i32
    %c0_i32_1 = arith.constant 0 : i32
    return %c0_i32, %c0_i32_0 : i32, i32
  }
  func.func @transform_4(%arg0: i32, %arg1: i32) -> (i32, i32, i32) {
    %c0_i32 = arith.constant 0 : i32
    %c0_i32_0 = arith.constant 0 : i32
    return %arg0, %c0_i32, %arg1 : i32, i32, i32
  }
  func.func @transform_5(%arg0: i32, %arg1: i32) -> (i32, i32, i32, i32) {
    %c0_i32 = arith.constant 0 : i32
    %c0_i32_0 = arith.constant 0 : i32
    %c0_i32_1 = arith.constant 0 : i32
    return %arg0, %arg1, %c0_i32, %c0_i32_0 : i32, i32, i32, i32
  }
}

module attributes {stable_mosaic.version = 11 : i64} {
  func.func @attn_weight_kernel(%arg0: i32, %arg1: memref<1x16x16x16xf32, #tpu.memory_space<vmem>>, %arg2: memref<1x1x16x16xf32, #tpu.memory_space<vmem>>) attributes {dimension_semantics = [#tpu.dimension_semantics<parallel>], iteration_bounds = array<i64: 2>, scalar_prefetch = 0 : i64, scratch_operands = 0 : i64, tpu.core_type = #tpu.core_type<tc>, window_params = [{transform_indices = @transform_0, window_bounds = array<i64: 1, 16, 16, 16>}, {transform_indices = @transform_1, window_bounds = array<i64: 1, 1, 16, 16>}]} {
    %c0 = arith.constant 0 : index
    %c0_0 = arith.constant 0 : index
    %c0_1 = arith.constant 0 : index
    %c0_2 = arith.constant 0 : index
    %0 = vector.load %arg1[%c0, %c0_0, %c0_1, %c0_2] : memref<1x16x16x16xf32, #tpu.memory_space<vmem>>, vector<1x16x16x16xf32>
    %1 = vector.shape_cast %0 : vector<1x16x16x16xf32> to vector<16x16x16xf32>
    %2 = tpu.iota {dimensions = array<i32: 0>} : vector<16x16x16xi32>
    %c4_i32 = arith.constant 4 : i32
    %c0_i32 = arith.constant 0 : i32
    %3 = arith.cmpi eq, %c4_i32, %c0_i32 : i32
    %c1_i32 = arith.constant 1 : i32
    %4 = arith.select %3, %c1_i32, %c4_i32 : i32
    %5 = vector.broadcast %4 : i32 to vector<16x16x16xi32>
    %6 = arith.remsi %2, %5 : vector<16x16x16xi32>
    %c0_i32_3 = arith.constant 0 : i32
    %7 = vector.broadcast %c0_i32_3 : i32 to vector<16x16x16xi32>
    %8 = arith.cmpi ne, %6, %7 : vector<16x16x16xi32>
    %c0_i32_4 = arith.constant 0 : i32
    %9 = vector.broadcast %c0_i32_4 : i32 to vector<16x16x16xi32>
    %10 = arith.cmpi slt, %6, %9 : vector<16x16x16xi32>
    %c0_i32_5 = arith.constant 0 : i32
    %11 = arith.cmpi slt, %4, %c0_i32_5 : i32
    %12 = vector.broadcast %11 : i1 to vector<16x16x16xi1>
    %13 = vector.broadcast %12 : vector<16x16x16xi1> to vector<16x16x16xi1>
    %14 = arith.xori %10, %13 : vector<16x16x16xi1>
    %15 = arith.andi %14, %8 : vector<16x16x16xi1>
    %16 = vector.broadcast %4 : i32 to vector<16x16x16xi32>
    %17 = arith.addi %6, %16 : vector<16x16x16xi32>
    %18 = arith.select %15, %17, %6 : vector<16x16x16xi1>, vector<16x16x16xi32>
    %c1_i32_6 = arith.constant 1 : i32
    %19 = vector.broadcast %c1_i32_6 : i32 to vector<16x16x16xi32>
    %20 = arith.cmpi eq, %18, %19 : vector<16x16x16xi32>
    %c4_i32_7 = arith.constant 4 : i32
    %21 = vector.broadcast %c4_i32_7 : i32 to vector<16x16x16xi32>
    %22 = arith.cmpi slt, %2, %21 : vector<16x16x16xi32>
    %23 = arith.andi %20, %22 : vector<16x16x16xi1>
    %c2_i32 = arith.constant 2 : i32
    %24 = vector.broadcast %c2_i32 : i32 to vector<16x16x16xi32>
    %25 = arith.cmpi eq, %18, %24 : vector<16x16x16xi32>
    %c8_i32 = arith.constant 8 : i32
    %26 = vector.broadcast %c8_i32 : i32 to vector<16x16x16xi32>
    %27 = arith.cmpi sge, %2, %26 : vector<16x16x16xi32>
    %28 = arith.andi %25, %27 : vector<16x16x16xi1>
    %c12_i32 = arith.constant 12 : i32
    %29 = vector.broadcast %c12_i32 : i32 to vector<16x16x16xi32>
    %30 = arith.cmpi slt, %2, %29 : vector<16x16x16xi32>
    %31 = arith.andi %28, %30 : vector<16x16x16xi1>
    %32 = arith.ori %23, %31 : vector<16x16x16xi1>
    %c3_i32 = arith.constant 3 : i32
    %33 = vector.broadcast %c3_i32 : i32 to vector<16x16x16xi32>
    %34 = arith.cmpi eq, %18, %33 : vector<16x16x16xi32>
    %c12_i32_8 = arith.constant 12 : i32
    %35 = vector.broadcast %c12_i32_8 : i32 to vector<16x16x16xi32>
    %36 = arith.cmpi sge, %2, %35 : vector<16x16x16xi32>
    %37 = arith.andi %34, %36 : vector<16x16x16xi1>
    %c16_i32 = arith.constant 16 : i32
    %38 = vector.broadcast %c16_i32 : i32 to vector<16x16x16xi32>
    %39 = arith.cmpi slt, %2, %38 : vector<16x16x16xi32>
    %40 = arith.andi %37, %39 : vector<16x16x16xi1>
    %41 = arith.ori %32, %40 : vector<16x16x16xi1>
    %cst = arith.constant 2.500000e-01 : f32
    %42 = vector.broadcast %cst : f32 to vector<16x16x16xf32>
    %43 = arith.mulf %1, %42 : vector<16x16x16xf32>
    %44 = arith.select %41, %43, %1 : vector<16x16x16xi1>, vector<16x16x16xf32>
    %45 = vector.extract_strided_slice %44 {offsets = [0, 0, 0], sizes = [8, 16, 16], strides = [1, 1, 1]} : vector<16x16x16xf32> to vector<8x16x16xf32>
    %cst_9 = arith.constant dense<0.000000e+00> : vector<16x16xf32>
    %46 = vector.multi_reduction <add>, %45, %cst_9 [0] : vector<8x16x16xf32> to vector<16x16xf32>
    %cst_10 = arith.constant 8.000000e+00 : f32
    %47 = vector.broadcast %cst_10 : f32 to vector<16x16xf32>
    %48 = arith.divf %46, %47 : vector<16x16xf32>
    %cst_11 = arith.constant dense<0xFF800000> : vector<16x16xf32>
    %49 = vector.multi_reduction <maximumf>, %45, %cst_11 [0] : vector<8x16x16xf32> to vector<16x16xf32>
    %50 = arith.addf %48, %49 : vector<16x16xf32>
    %51 = vector.extract_strided_slice %44 {offsets = [8, 0, 0], sizes = [4, 16, 16], strides = [1, 1, 1]} : vector<16x16x16xf32> to vector<4x16x16xf32>
    %cst_12 = arith.constant dense<0.000000e+00> : vector<16x16xf32>
    %52 = vector.multi_reduction <add>, %51, %cst_12 [0] : vector<4x16x16xf32> to vector<16x16xf32>
    %cst_13 = arith.constant 4.000000e+00 : f32
    %53 = vector.broadcast %cst_13 : f32 to vector<16x16xf32>
    %54 = arith.divf %52, %53 : vector<16x16xf32>
    %cst_14 = arith.constant dense<0xFF800000> : vector<16x16xf32>
    %55 = vector.multi_reduction <maximumf>, %51, %cst_14 [0] : vector<4x16x16xf32> to vector<16x16xf32>
    %56 = arith.addf %54, %55 : vector<16x16xf32>
    %57 = vector.extract_strided_slice %44 {offsets = [12, 0, 0], sizes = [4, 16, 16], strides = [1, 1, 1]} : vector<16x16x16xf32> to vector<4x16x16xf32>
    %cst_15 = arith.constant dense<0.000000e+00> : vector<16x16xf32>
    %58 = vector.multi_reduction <add>, %57, %cst_15 [0] : vector<4x16x16xf32> to vector<16x16xf32>
    %cst_16 = arith.constant 4.000000e+00 : f32
    %59 = vector.broadcast %cst_16 : f32 to vector<16x16xf32>
    %60 = arith.divf %58, %59 : vector<16x16xf32>
    %cst_17 = arith.constant dense<0xFF800000> : vector<16x16xf32>
    %61 = vector.multi_reduction <maximumf>, %57, %cst_17 [0] : vector<4x16x16xf32> to vector<16x16xf32>
    %62 = arith.addf %60, %61 : vector<16x16xf32>
    %cst_18 = arith.constant dense<0.000000e+00> : vector<16x16xf32>
    %63 = tpu.matmul %50, %56, %cst_18 {dimension_numbers = #tpu.dot_dimension_numbers<[1], [1], [0], [0], [0, 0, 1, 0], [], []>} : vector<16x16xf32>, vector<16x16xf32>, vector<16x16xf32> -> vector<16x16xf32>
    %cst_19 = arith.constant 2.500000e-01 : f32
    %64 = vector.broadcast %cst_19 : f32 to vector<16x16xf32>
    %65 = arith.mulf %63, %64 : vector<16x16xf32>
    %cst_20 = arith.constant 0.000000e+00 : f32
    %66 = vector.broadcast %cst_20 : f32 to vector<16x16xf32>
    %67 = arith.subf %66, %65 : vector<16x16xf32>
    %68 = math.exp %67 : vector<16x16xf32>
    %cst_21 = arith.constant 1.000000e+00 : f32
    %69 = vector.broadcast %cst_21 : f32 to vector<16x16xf32>
    %70 = arith.addf %69, %68 : vector<16x16xf32>
    %71 = tpu.reciprocal %70 {approx = true} : vector<16x16xf32> -> vector<16x16xf32>
    %cst_22 = arith.constant dense<0.000000e+00> : vector<16x16xf32>
    %72 = tpu.matmul %50, %62, %cst_22 {dimension_numbers = #tpu.dot_dimension_numbers<[1], [1], [0], [0], [0, 0, 1, 0], [], []>} : vector<16x16xf32>, vector<16x16xf32>, vector<16x16xf32> -> vector<16x16xf32>
    %cst_23 = arith.constant 2.500000e-01 : f32
    %73 = vector.broadcast %cst_23 : f32 to vector<16x16xf32>
    %74 = arith.mulf %72, %73 : vector<16x16xf32>
    %cst_24 = arith.constant 0.000000e+00 : f32
    %75 = vector.broadcast %cst_24 : f32 to vector<16x16xf32>
    %76 = arith.subf %75, %74 : vector<16x16xf32>
    %77 = math.exp %76 : vector<16x16xf32>
    %cst_25 = arith.constant 1.000000e+00 : f32
    %78 = vector.broadcast %cst_25 : f32 to vector<16x16xf32>
    %79 = arith.addf %78, %77 : vector<16x16xf32>
    %80 = tpu.reciprocal %79 {approx = true} : vector<16x16xf32> -> vector<16x16xf32>
    %cst_26 = arith.constant dense<0.000000e+00> : vector<16x16xf32>
    %81 = tpu.matmul %56, %62, %cst_26 {dimension_numbers = #tpu.dot_dimension_numbers<[1], [1], [0], [0], [0, 0, 1, 0], [], []>} : vector<16x16xf32>, vector<16x16xf32>, vector<16x16xf32> -> vector<16x16xf32>
    %cst_27 = arith.constant 2.500000e-01 : f32
    %82 = vector.broadcast %cst_27 : f32 to vector<16x16xf32>
    %83 = arith.mulf %81, %82 : vector<16x16xf32>
    %cst_28 = arith.constant 0.000000e+00 : f32
    %84 = vector.broadcast %cst_28 : f32 to vector<16x16xf32>
    %85 = arith.subf %84, %83 : vector<16x16xf32>
    %86 = math.exp %85 : vector<16x16xf32>
    %cst_29 = arith.constant 1.000000e+00 : f32
    %87 = vector.broadcast %cst_29 : f32 to vector<16x16xf32>
    %88 = arith.addf %87, %86 : vector<16x16xf32>
    %89 = tpu.reciprocal %88 {approx = true} : vector<16x16xf32> -> vector<16x16xf32>
    %90 = arith.addf %71, %80 : vector<16x16xf32>
    %91 = arith.addf %90, %89 : vector<16x16xf32>
    %cst_30 = arith.constant 3.300000e-01 : f32
    %92 = vector.broadcast %cst_30 : f32 to vector<16x16xf32>
    %93 = arith.mulf %91, %92 : vector<16x16xf32>
    %c0_31 = arith.constant 0 : index
    %c0_32 = arith.constant 0 : index
    %c0_33 = arith.constant 0 : index
    %c0_34 = arith.constant 0 : index
    %94 = vector.load %arg2[%c0_31, %c0_32, %c0_33, %c0_34] : memref<1x1x16x16xf32, #tpu.memory_space<vmem>>, vector<1x1x16x16xf32>
    %95 = vector.shape_cast %94 : vector<1x1x16x16xf32> to vector<16x16xf32>
    %96 = vector.shape_cast %93 : vector<16x16xf32> to vector<1x1x16x16xf32>
    tpu.vector_store %arg2[%c0_31, %c0_32, %c0_33, %c0_34], %96 {strides = array<i32>} : memref<1x1x16x16xf32, #tpu.memory_space<vmem>>, vector<1x1x16x16xf32>,
    return
  }
  func.func @transform_0(%arg0: i32) -> (i32, i32, i32, i32) {
    %c0_i32 = arith.constant 0 : i32
    %c0_i32_0 = arith.constant 0 : i32
    %c0_i32_1 = arith.constant 0 : i32
    %c0_i32_2 = arith.constant 0 : i32
    return %arg0, %c0_i32, %c0_i32_0, %c0_i32_1 : i32, i32, i32, i32
  }
  func.func @transform_1(%arg0: i32) -> (i32, i32, i32, i32) {
    %c0_i32 = arith.constant 0 : i32
    %c0_i32_0 = arith.constant 0 : i32
    %c0_i32_1 = arith.constant 0 : i32
    %c0_i32_2 = arith.constant 0 : i32
    return %arg0, %c0_i32, %c0_i32_0, %c0_i32_1 : i32, i32, i32, i32
  }
}

module attributes {stable_mosaic.version = 11 : i64} {
  func.func @bn_combine_kernel(%arg0: i32, %arg1: i32, %arg2: memref<1x16x256xbf16, #tpu.memory_space<vmem>>, %arg3: memref<1x16x256xf32, #tpu.memory_space<vmem>>, %arg4: memref<1x1x256xf32, #tpu.memory_space<vmem>>, %arg5: memref<16x2xf32, #tpu.memory_space<vmem>>, %arg6: memref<1x16x256xbf16, #tpu.memory_space<vmem>>) attributes {dimension_semantics = [#tpu.dimension_semantics<parallel>, #tpu.dimension_semantics<parallel>], iteration_bounds = array<i64: 2, 1>, scalar_prefetch = 0 : i64, scratch_operands = 0 : i64, tpu.core_type = #tpu.core_type<tc>, window_params = [{transform_indices = @transform_0, window_bounds = array<i64: 1, 16, 256>}, {transform_indices = @transform_1, window_bounds = array<i64: 1, 16, 256>}, {transform_indices = @transform_2, window_bounds = array<i64: 1, 1, 256>}, {pipeline_mode = #tpu.pipeline_mode<synchronous>, transform_indices = @transform_3, window_bounds = array<i64: 16, 2>}, {transform_indices = @transform_4, window_bounds = array<i64: 1, 16, 256>}]} {
    %c0 = arith.constant 0 : index
    %c0_0 = arith.constant 0 : index
    %c0_1 = arith.constant 0 : index
    %0 = vector.load %arg2[%c0, %c0_0, %c0_1] : memref<1x16x256xbf16, #tpu.memory_space<vmem>>, vector<1x16x256xbf16>
    %1 = vector.shape_cast %0 : vector<1x16x256xbf16> to vector<16x256xbf16>
    %2 = arith.extf %1 : vector<16x256xbf16> to vector<16x256xf32>
    %c0_2 = arith.constant 0 : index
    %c0_3 = arith.constant 0 : index
    %c0_4 = arith.constant 0 : index
    %3 = vector.load %arg3[%c0_2, %c0_3, %c0_4] : memref<1x16x256xf32, #tpu.memory_space<vmem>>, vector<1x16x256xf32>
    %4 = vector.shape_cast %3 : vector<1x16x256xf32> to vector<16x256xf32>
    %c0_5 = arith.constant 0 : index
    %c0_6 = arith.constant 0 : index
    %c0_7 = arith.constant 0 : index
    %5 = vector.load %arg4[%c0_5, %c0_6, %c0_7] : memref<1x1x256xf32, #tpu.memory_space<vmem>>, vector<1x1x256xf32>
    %6 = vector.shape_cast %5 : vector<1x1x256xf32> to vector<1x256xf32>
    %c0_8 = arith.constant 0 : index
    %c0_9 = arith.constant 0 : index
    %7 = vector.load %arg5[%c0_8, %c0_9] : memref<16x2xf32, #tpu.memory_space<vmem>>, vector<16x1xf32>
    %8 = vector.broadcast %7 : vector<16x1xf32> to vector<16x256xf32>
    %9 = arith.mulf %2, %8 : vector<16x256xf32>
    %c0_10 = arith.constant 0 : index
    %c1 = arith.constant 1 : index
    %10 = vector.load %arg5[%c0_10, %c1] : memref<16x2xf32, #tpu.memory_space<vmem>>, vector<16x1xf32>
    %11 = vector.broadcast %10 : vector<16x1xf32> to vector<16x256xf32>
    %12 = arith.addf %9, %11 : vector<16x256xf32>
    %13 = vector.broadcast %6 : vector<1x256xf32> to vector<16x256xf32>
    %14 = arith.mulf %4, %13 : vector<16x256xf32>
    %15 = arith.addf %12, %4 : vector<16x256xf32>
    %cst = arith.constant 0.000000e+00 : f32
    %16 = vector.broadcast %cst : f32 to vector<16x256xf32>
    %17 = arith.maximumf %15, %16 : vector<16x256xf32>
    %18 = arith.addf %14, %17 : vector<16x256xf32>
    %19 = arith.truncf %18 : vector<16x256xf32> to vector<16x256xbf16>
    %c0_11 = arith.constant 0 : index
    %c0_12 = arith.constant 0 : index
    %c0_13 = arith.constant 0 : index
    %20 = vector.load %arg6[%c0_11, %c0_12, %c0_13] : memref<1x16x256xbf16, #tpu.memory_space<vmem>>, vector<1x16x256xbf16>
    %21 = vector.shape_cast %20 : vector<1x16x256xbf16> to vector<16x256xbf16>
    %22 = vector.shape_cast %19 : vector<16x256xbf16> to vector<1x16x256xbf16>
    tpu.vector_store %arg6[%c0_11, %c0_12, %c0_13], %22 {strides = array<i32>} : memref<1x16x256xbf16, #tpu.memory_space<vmem>>, vector<1x16x256xbf16>,
    return
  }
  func.func @transform_0(%arg0: i32, %arg1: i32) -> (i32, i32, i32) {
    %c0_i32 = arith.constant 0 : i32
    %c0_i32_0 = arith.constant 0 : i32
    return %arg0, %c0_i32, %arg1 : i32, i32, i32
  }
  func.func @transform_1(%arg0: i32, %arg1: i32) -> (i32, i32, i32) {
    %c0_i32 = arith.constant 0 : i32
    %c0_i32_0 = arith.constant 0 : i32
    return %arg0, %c0_i32, %arg1 : i32, i32, i32
  }
  func.func @transform_2(%arg0: i32, %arg1: i32) -> (i32, i32, i32) {
    %c0_i32 = arith.constant 0 : i32
    %c0_i32_0 = arith.constant 0 : i32
    return %arg0, %c0_i32, %arg1 : i32, i32, i32
  }
  func.func @transform_3(%arg0: i32, %arg1: i32) -> (i32, i32) {
    %c0_i32 = arith.constant 0 : i32
    %c0_i32_0 = arith.constant 0 : i32
    %c0_i32_1 = arith.constant 0 : i32
    return %c0_i32, %c0_i32_0 : i32, i32
  }
  func.func @transform_4(%arg0: i32, %arg1: i32) -> (i32, i32, i32) {
    %c0_i32 = arith.constant 0 : i32
    %c0_i32_0 = arith.constant 0 : i32
    return %arg0, %c0_i32, %arg1 : i32, i32, i32
  }
}

module attributes {stable_mosaic.version = 11 : i64} {
  func.func @conv3x3_kernel(%arg0: i32, %arg1: memref<1x16x342xbf16, #tpu.memory_space<vmem>>, %arg2: memref<9x8x16xbf16, #tpu.memory_space<vmem>>, %arg3: memref<8x1xf32, #tpu.memory_space<vmem>>, %arg4: memref<1x288xf32, #tpu.memory_space<vmem>>, %arg5: memref<1x8x288xbf16, #tpu.memory_space<vmem>>, %arg6: memref<1x8x2xf32, #tpu.memory_space<vmem>>) attributes {dimension_semantics = [#tpu.dimension_semantics<parallel>], iteration_bounds = array<i64: 2>, scalar_prefetch = 0 : i64, scratch_operands = 0 : i64, tpu.core_type = #tpu.core_type<tc>, window_params = [{transform_indices = @transform_0, window_bounds = array<i64: 1, 16, 342>}, {pipeline_mode = #tpu.pipeline_mode<synchronous>, transform_indices = @transform_1, window_bounds = array<i64: 9, 8, 16>}, {pipeline_mode = #tpu.pipeline_mode<synchronous>, transform_indices = @transform_2, window_bounds = array<i64: 8, 1>}, {pipeline_mode = #tpu.pipeline_mode<synchronous>, transform_indices = @transform_3, window_bounds = array<i64: 1, 288>}, {transform_indices = @transform_4, window_bounds = array<i64: 1, 8, 288>}, {transform_indices = @transform_5, window_bounds = array<i64: 1, 8, 2>}]} {
    %cst = arith.constant 0.000000e+00 : f32
    %0 = vector.broadcast %cst : f32 to vector<8x288xf32>
    %c0 = arith.constant 0 : index
    %c0_0 = arith.constant 0 : index
    %c0_1 = arith.constant 0 : index
    %1 = vector.load %arg2[%c0, %c0_0, %c0_1] : memref<9x8x16xbf16, #tpu.memory_space<vmem>>, vector<1x8x16xbf16>
    %2 = vector.shape_cast %1 : vector<1x8x16xbf16> to vector<8x16xbf16>
    %c0_2 = arith.constant 0 : index
    %c0_3 = arith.constant 0 : index
    %c0_4 = arith.constant 0 : index
    %3 = vector.load %arg1[%c0_2, %c0_3, %c0_4] : memref<1x16x342xbf16, #tpu.memory_space<vmem>>, vector<1x16x288xbf16>
    %4 = vector.shape_cast %3 : vector<1x16x288xbf16> to vector<16x288xbf16>
    %cst_5 = arith.constant dense<0.000000e+00> : vector<8x288xf32>
    %5 = tpu.matmul %2, %4, %cst_5 {dimension_numbers = #tpu.dot_dimension_numbers<[1], [0], [0], [1], [0, 0, 1, 1], [], []>} : vector<8x16xbf16>, vector<16x288xbf16>, vector<8x288xf32> -> vector<8x288xf32>
    %6 = arith.addf %0, %5 : vector<8x288xf32>
    %c1 = arith.constant 1 : index
    %c0_6 = arith.constant 0 : index
    %c0_7 = arith.constant 0 : index
    %7 = vector.load %arg2[%c1, %c0_6, %c0_7] : memref<9x8x16xbf16, #tpu.memory_space<vmem>>, vector<1x8x16xbf16>
    %8 = vector.shape_cast %7 : vector<1x8x16xbf16> to vector<8x16xbf16>
    %c0_8 = arith.constant 0 : index
    %c0_9 = arith.constant 0 : index
    %c1_10 = arith.constant 1 : index
    %9 = vector.load %arg1[%c0_8, %c0_9, %c1_10] : memref<1x16x342xbf16, #tpu.memory_space<vmem>>, vector<1x16x288xbf16>
    %10 = vector.shape_cast %9 : vector<1x16x288xbf16> to vector<16x288xbf16>
    %cst_11 = arith.constant dense<0.000000e+00> : vector<8x288xf32>
    %11 = tpu.matmul %8, %10, %cst_11 {dimension_numbers = #tpu.dot_dimension_numbers<[1], [0], [0], [1], [0, 0, 1, 1], [], []>} : vector<8x16xbf16>, vector<16x288xbf16>, vector<8x288xf32> -> vector<8x288xf32>
    %12 = arith.addf %6, %11 : vector<8x288xf32>
    %c2 = arith.constant 2 : index
    %c0_12 = arith.constant 0 : index
    %c0_13 = arith.constant 0 : index
    %13 = vector.load %arg2[%c2, %c0_12, %c0_13] : memref<9x8x16xbf16, #tpu.memory_space<vmem>>, vector<1x8x16xbf16>
    %14 = vector.shape_cast %13 : vector<1x8x16xbf16> to vector<8x16xbf16>
    %c0_14 = arith.constant 0 : index
    %c0_15 = arith.constant 0 : index
    %c2_16 = arith.constant 2 : index
    %15 = vector.load %arg1[%c0_14, %c0_15, %c2_16] : memref<1x16x342xbf16, #tpu.memory_space<vmem>>, vector<1x16x288xbf16>
    %16 = vector.shape_cast %15 : vector<1x16x288xbf16> to vector<16x288xbf16>
    %cst_17 = arith.constant dense<0.000000e+00> : vector<8x288xf32>
    %17 = tpu.matmul %14, %16, %cst_17 {dimension_numbers = #tpu.dot_dimension_numbers<[1], [0], [0], [1], [0, 0, 1, 1], [], []>} : vector<8x16xbf16>, vector<16x288xbf16>, vector<8x288xf32> -> vector<8x288xf32>
    %18 = arith.addf %12, %17 : vector<8x288xf32>
    %c3 = arith.constant 3 : index
    %c0_18 = arith.constant 0 : index
    %c0_19 = arith.constant 0 : index
    %19 = vector.load %arg2[%c3, %c0_18, %c0_19] : memref<9x8x16xbf16, #tpu.memory_space<vmem>>, vector<1x8x16xbf16>
    %20 = vector.shape_cast %19 : vector<1x8x16xbf16> to vector<8x16xbf16>
    %c0_20 = arith.constant 0 : index
    %c0_21 = arith.constant 0 : index
    %c18 = arith.constant 18 : index
    %21 = vector.load %arg1[%c0_20, %c0_21, %c18] : memref<1x16x342xbf16, #tpu.memory_space<vmem>>, vector<1x16x288xbf16>
    %22 = vector.shape_cast %21 : vector<1x16x288xbf16> to vector<16x288xbf16>
    %cst_22 = arith.constant dense<0.000000e+00> : vector<8x288xf32>
    %23 = tpu.matmul %20, %22, %cst_22 {dimension_numbers = #tpu.dot_dimension_numbers<[1], [0], [0], [1], [0, 0, 1, 1], [], []>} : vector<8x16xbf16>, vector<16x288xbf16>, vector<8x288xf32> -> vector<8x288xf32>
    %24 = arith.addf %18, %23 : vector<8x288xf32>
    %c4 = arith.constant 4 : index
    %c0_23 = arith.constant 0 : index
    %c0_24 = arith.constant 0 : index
    %25 = vector.load %arg2[%c4, %c0_23, %c0_24] : memref<9x8x16xbf16, #tpu.memory_space<vmem>>, vector<1x8x16xbf16>
    %26 = vector.shape_cast %25 : vector<1x8x16xbf16> to vector<8x16xbf16>
    %c0_25 = arith.constant 0 : index
    %c0_26 = arith.constant 0 : index
    %c19 = arith.constant 19 : index
    %27 = vector.load %arg1[%c0_25, %c0_26, %c19] : memref<1x16x342xbf16, #tpu.memory_space<vmem>>, vector<1x16x288xbf16>
    %28 = vector.shape_cast %27 : vector<1x16x288xbf16> to vector<16x288xbf16>
    %cst_27 = arith.constant dense<0.000000e+00> : vector<8x288xf32>
    %29 = tpu.matmul %26, %28, %cst_27 {dimension_numbers = #tpu.dot_dimension_numbers<[1], [0], [0], [1], [0, 0, 1, 1], [], []>} : vector<8x16xbf16>, vector<16x288xbf16>, vector<8x288xf32> -> vector<8x288xf32>
    %30 = arith.addf %24, %29 : vector<8x288xf32>
    %c5 = arith.constant 5 : index
    %c0_28 = arith.constant 0 : index
    %c0_29 = arith.constant 0 : index
    %31 = vector.load %arg2[%c5, %c0_28, %c0_29] : memref<9x8x16xbf16, #tpu.memory_space<vmem>>, vector<1x8x16xbf16>
    %32 = vector.shape_cast %31 : vector<1x8x16xbf16> to vector<8x16xbf16>
    %c0_30 = arith.constant 0 : index
    %c0_31 = arith.constant 0 : index
    %c20 = arith.constant 20 : index
    %33 = vector.load %arg1[%c0_30, %c0_31, %c20] : memref<1x16x342xbf16, #tpu.memory_space<vmem>>, vector<1x16x288xbf16>
    %34 = vector.shape_cast %33 : vector<1x16x288xbf16> to vector<16x288xbf16>
    %cst_32 = arith.constant dense<0.000000e+00> : vector<8x288xf32>
    %35 = tpu.matmul %32, %34, %cst_32 {dimension_numbers = #tpu.dot_dimension_numbers<[1], [0], [0], [1], [0, 0, 1, 1], [], []>} : vector<8x16xbf16>, vector<16x288xbf16>, vector<8x288xf32> -> vector<8x288xf32>
    %36 = arith.addf %30, %35 : vector<8x288xf32>
    %c6 = arith.constant 6 : index
    %c0_33 = arith.constant 0 : index
    %c0_34 = arith.constant 0 : index
    %37 = vector.load %arg2[%c6, %c0_33, %c0_34] : memref<9x8x16xbf16, #tpu.memory_space<vmem>>, vector<1x8x16xbf16>
    %38 = vector.shape_cast %37 : vector<1x8x16xbf16> to vector<8x16xbf16>
    %c0_35 = arith.constant 0 : index
    %c0_36 = arith.constant 0 : index
    %c36 = arith.constant 36 : index
    %39 = vector.load %arg1[%c0_35, %c0_36, %c36] : memref<1x16x342xbf16, #tpu.memory_space<vmem>>, vector<1x16x288xbf16>
    %40 = vector.shape_cast %39 : vector<1x16x288xbf16> to vector<16x288xbf16>
    %cst_37 = arith.constant dense<0.000000e+00> : vector<8x288xf32>
    %41 = tpu.matmul %38, %40, %cst_37 {dimension_numbers = #tpu.dot_dimension_numbers<[1], [0], [0], [1], [0, 0, 1, 1], [], []>} : vector<8x16xbf16>, vector<16x288xbf16>, vector<8x288xf32> -> vector<8x288xf32>
    %42 = arith.addf %36, %41 : vector<8x288xf32>
    %c7 = arith.constant 7 : index
    %c0_38 = arith.constant 0 : index
    %c0_39 = arith.constant 0 : index
    %43 = vector.load %arg2[%c7, %c0_38, %c0_39] : memref<9x8x16xbf16, #tpu.memory_space<vmem>>, vector<1x8x16xbf16>
    %44 = vector.shape_cast %43 : vector<1x8x16xbf16> to vector<8x16xbf16>
    %c0_40 = arith.constant 0 : index
    %c0_41 = arith.constant 0 : index
    %c37 = arith.constant 37 : index
    %45 = vector.load %arg1[%c0_40, %c0_41, %c37] : memref<1x16x342xbf16, #tpu.memory_space<vmem>>, vector<1x16x288xbf16>
    %46 = vector.shape_cast %45 : vector<1x16x288xbf16> to vector<16x288xbf16>
    %cst_42 = arith.constant dense<0.000000e+00> : vector<8x288xf32>
    %47 = tpu.matmul %44, %46, %cst_42 {dimension_numbers = #tpu.dot_dimension_numbers<[1], [0], [0], [1], [0, 0, 1, 1], [], []>} : vector<8x16xbf16>, vector<16x288xbf16>, vector<8x288xf32> -> vector<8x288xf32>
    %48 = arith.addf %42, %47 : vector<8x288xf32>
    %c8 = arith.constant 8 : index
    %c0_43 = arith.constant 0 : index
    %c0_44 = arith.constant 0 : index
    %49 = vector.load %arg2[%c8, %c0_43, %c0_44] : memref<9x8x16xbf16, #tpu.memory_space<vmem>>, vector<1x8x16xbf16>
    %50 = vector.shape_cast %49 : vector<1x8x16xbf16> to vector<8x16xbf16>
    %c0_45 = arith.constant 0 : index
    %c0_46 = arith.constant 0 : index
    %c38 = arith.constant 38 : index
    %51 = vector.load %arg1[%c0_45, %c0_46, %c38] : memref<1x16x342xbf16, #tpu.memory_space<vmem>>, vector<1x16x288xbf16>
    %52 = vector.shape_cast %51 : vector<1x16x288xbf16> to vector<16x288xbf16>
    %cst_47 = arith.constant dense<0.000000e+00> : vector<8x288xf32>
    %53 = tpu.matmul %50, %52, %cst_47 {dimension_numbers = #tpu.dot_dimension_numbers<[1], [0], [0], [1], [0, 0, 1, 1], [], []>} : vector<8x16xbf16>, vector<16x288xbf16>, vector<8x288xf32> -> vector<8x288xf32>
    %54 = arith.addf %48, %53 : vector<8x288xf32>
    %c0_48 = arith.constant 0 : index
    %c0_49 = arith.constant 0 : index
    %55 = vector.load %arg3[%c0_48, %c0_49] : memref<8x1xf32, #tpu.memory_space<vmem>>, vector<8x1xf32>
    %56 = vector.broadcast %55 : vector<8x1xf32> to vector<8x288xf32>
    %57 = arith.addf %54, %56 : vector<8x288xf32>
    %58 = arith.truncf %57 : vector<8x288xf32> to vector<8x288xbf16>
    %c0_50 = arith.constant 0 : index
    %c0_51 = arith.constant 0 : index
    %c0_52 = arith.constant 0 : index
    %59 = vector.load %arg5[%c0_50, %c0_51, %c0_52] : memref<1x8x288xbf16, #tpu.memory_space<vmem>>, vector<1x8x288xbf16>
    %60 = vector.shape_cast %59 : vector<1x8x288xbf16> to vector<8x288xbf16>
    %61 = vector.shape_cast %58 : vector<8x288xbf16> to vector<1x8x288xbf16>
    tpu.vector_store %arg5[%c0_50, %c0_51, %c0_52], %61 {strides = array<i32>} : memref<1x8x288xbf16, #tpu.memory_space<vmem>>, vector<1x8x288xbf16>,
    %c0_53 = arith.constant 0 : index
    %c0_54 = arith.constant 0 : index
    %62 = vector.load %arg4[%c0_53, %c0_54] : memref<1x288xf32, #tpu.memory_space<vmem>>, vector<1x288xf32>
    %63 = vector.broadcast %62 : vector<1x288xf32> to vector<8x288xf32>
    %64 = arith.mulf %57, %63 : vector<8x288xf32>
    %cst_55 = arith.constant dense<0.000000e+00> : vector<8xf32>
    %65 = vector.multi_reduction <add>, %64, %cst_55 [1] : vector<8x288xf32> to vector<8xf32>
    %66 = vector.shape_cast %65 : vector<8xf32> to vector<8x1xf32>
    %67 = arith.mulf %64, %57 : vector<8x288xf32>
    %cst_56 = arith.constant dense<0.000000e+00> : vector<8xf32>
    %68 = vector.multi_reduction <add>, %67, %cst_56 [1] : vector<8x288xf32> to vector<8xf32>
    %69 = vector.shape_cast %68 : vector<8xf32> to vector<8x1xf32>
    %70 = tpu.concatenate %66, %69 in 1 : vector<8x1xf32>, vector<8x1xf32> -> vector<8x2xf32>
    %c0_57 = arith.constant 0 : index
    %c0_58 = arith.constant 0 : index
    %c0_59 = arith.constant 0 : index
    %71 = vector.load %arg6[%c0_57, %c0_58, %c0_59] : memref<1x8x2xf32, #tpu.memory_space<vmem>>, vector<1x8x2xf32>
    %72 = vector.shape_cast %71 : vector<1x8x2xf32> to vector<8x2xf32>
    %73 = vector.shape_cast %70 : vector<8x2xf32> to vector<1x8x2xf32>
    tpu.vector_store %arg6[%c0_57, %c0_58, %c0_59], %73 {strides = array<i32>} : memref<1x8x2xf32, #tpu.memory_space<vmem>>, vector<1x8x2xf32>,
    return
  }
  func.func @transform_0(%arg0: i32) -> (i32, i32, i32) {
    %c0_i32 = arith.constant 0 : i32
    %c0_i32_0 = arith.constant 0 : i32
    %c0_i32_1 = arith.constant 0 : i32
    return %arg0, %c0_i32, %c0_i32_0 : i32, i32, i32
  }
  func.func @transform_1(%arg0: i32) -> (i32, i32, i32) {
    %c0_i32 = arith.constant 0 : i32
    %c0_i32_0 = arith.constant 0 : i32
    %c0_i32_1 = arith.constant 0 : i32
    %c0_i32_2 = arith.constant 0 : i32
    return %c0_i32, %c0_i32_0, %c0_i32_1 : i32, i32, i32
  }
  func.func @transform_2(%arg0: i32) -> (i32, i32) {
    %c0_i32 = arith.constant 0 : i32
    %c0_i32_0 = arith.constant 0 : i32
    %c0_i32_1 = arith.constant 0 : i32
    return %c0_i32, %c0_i32_0 : i32, i32
  }
  func.func @transform_3(%arg0: i32) -> (i32, i32) {
    %c0_i32 = arith.constant 0 : i32
    %c0_i32_0 = arith.constant 0 : i32
    %c0_i32_1 = arith.constant 0 : i32
    return %c0_i32, %c0_i32_0 : i32, i32
  }
  func.func @transform_4(%arg0: i32) -> (i32, i32, i32) {
    %c0_i32 = arith.constant 0 : i32
    %c0_i32_0 = arith.constant 0 : i32
    %c0_i32_1 = arith.constant 0 : i32
    return %arg0, %c0_i32, %c0_i32_0 : i32, i32, i32
  }
  func.func @transform_5(%arg0: i32) -> (i32, i32, i32) {
    %c0_i32 = arith.constant 0 : i32
    %c0_i32_0 = arith.constant 0 : i32
    %c0_i32_1 = arith.constant 0 : i32
    return %arg0, %c0_i32, %c0_i32_0 : i32, i32, i32
  }
}

module attributes {stable_mosaic.version = 11 : i64} {
  func.func @bn_act_kernel(%arg0: i32, %arg1: i32, %arg2: memref<1x8x256xbf16, #tpu.memory_space<vmem>>, %arg3: memref<8x2xf32, #tpu.memory_space<vmem>>, %arg4: memref<1x8x256xf32, #tpu.memory_space<vmem>>) attributes {dimension_semantics = [#tpu.dimension_semantics<parallel>, #tpu.dimension_semantics<parallel>], iteration_bounds = array<i64: 2, 1>, scalar_prefetch = 0 : i64, scratch_operands = 0 : i64, tpu.core_type = #tpu.core_type<tc>, window_params = [{transform_indices = @transform_0, window_bounds = array<i64: 1, 8, 256>}, {pipeline_mode = #tpu.pipeline_mode<synchronous>, transform_indices = @transform_1, window_bounds = array<i64: 8, 2>}, {transform_indices = @transform_2, window_bounds = array<i64: 1, 8, 256>}]} {
    %c0 = arith.constant 0 : index
    %c0_0 = arith.constant 0 : index
    %c0_1 = arith.constant 0 : index
    %0 = vector.load %arg2[%c0, %c0_0, %c0_1] : memref<1x8x256xbf16, #tpu.memory_space<vmem>>, vector<1x8x256xbf16>
    %1 = vector.shape_cast %0 : vector<1x8x256xbf16> to vector<8x256xbf16>
    %2 = arith.extf %1 : vector<8x256xbf16> to vector<8x256xf32>
    %c0_2 = arith.constant 0 : index
    %c0_3 = arith.constant 0 : index
    %3 = vector.load %arg3[%c0_2, %c0_3] : memref<8x2xf32, #tpu.memory_space<vmem>>, vector<8x1xf32>
    %4 = vector.broadcast %3 : vector<8x1xf32> to vector<8x256xf32>
    %5 = arith.mulf %2, %4 : vector<8x256xf32>
    %c0_4 = arith.constant 0 : index
    %c1 = arith.constant 1 : index
    %6 = vector.load %arg3[%c0_4, %c1] : memref<8x2xf32, #tpu.memory_space<vmem>>, vector<8x1xf32>
    %7 = vector.broadcast %6 : vector<8x1xf32> to vector<8x256xf32>
    %8 = arith.addf %5, %7 : vector<8x256xf32>
    %cst = arith.constant 0.000000e+00 : f32
    %9 = vector.broadcast %cst : f32 to vector<8x256xf32>
    %10 = arith.maximumf %8, %9 : vector<8x256xf32>
    %c0_5 = arith.constant 0 : index
    %c0_6 = arith.constant 0 : index
    %c0_7 = arith.constant 0 : index
    %11 = vector.load %arg4[%c0_5, %c0_6, %c0_7] : memref<1x8x256xf32, #tpu.memory_space<vmem>>, vector<1x8x256xf32>
    %12 = vector.shape_cast %11 : vector<1x8x256xf32> to vector<8x256xf32>
    %13 = vector.shape_cast %10 : vector<8x256xf32> to vector<1x8x256xf32>
    tpu.vector_store %arg4[%c0_5, %c0_6, %c0_7], %13 {strides = array<i32>} : memref<1x8x256xf32, #tpu.memory_space<vmem>>, vector<1x8x256xf32>,
    return
  }
  func.func @transform_0(%arg0: i32, %arg1: i32) -> (i32, i32, i32) {
    %c0_i32 = arith.constant 0 : i32
    %c0_i32_0 = arith.constant 0 : i32
    return %arg0, %c0_i32, %arg1 : i32, i32, i32
  }
  func.func @transform_1(%arg0: i32, %arg1: i32) -> (i32, i32) {
    %c0_i32 = arith.constant 0 : i32
    %c0_i32_0 = arith.constant 0 : i32
    %c0_i32_1 = arith.constant 0 : i32
    return %c0_i32, %c0_i32_0 : i32, i32
  }
  func.func @transform_2(%arg0: i32, %arg1: i32) -> (i32, i32, i32) {
    %c0_i32 = arith.constant 0 : i32
    %c0_i32_0 = arith.constant 0 : i32
    return %arg0, %c0_i32, %arg1 : i32, i32, i32
  }
}

</mosaic_0001>

<bundles_post_ra>
// kernel: quaternion_pyramid_forward.8
= control target key start
LH: loop header
LB: loop body
LE: loop exit
PB: predicated region body
PF: predicated region fallthrough
CT: control target
= control target key end

     0   :  { %s546_s15 = smov 0   ;;  %s548_s16 = smov 0   ;;  %s592_s0 = inlined_call_operand.vmem [shape: f32[2,16,256], index: 0, kind: input, shape index: {}]   ;;  %s593_s1 = inlined_call_operand.vmem [shape: bf16[4,16], index: 1, kind: input, shape index: {}]   ;;  %s594_s2 = inlined_call_operand.vmem [shape: f32[4,1], index: 2, kind: input, shape index: {}]   ;;  %s595_s3 = inlined_call_operand.vmem [shape: bf16[2,4,256], index: 3, kind: output, shape index: {0}]   ;;  %s596_s4 = inlined_call_operand.vmem [shape: f32[2,1,4,2], index: 4, kind: output, shape index: {1}]  }
   0x1   :  { %s550_s17 = smov 0  }
   0x2 LB: > { %s27_s18 = sadd.s32 1, %s514_s16  ;;  %p458_p0 = scmp.ge.s32.totalorder %s518_s17, 1  ;;  %s518_s17 = sphi %s550_s17, %s15_s17   ;;  %s514_s16 = sphi %s548_s16, %s598_s16   ;;  %s510_s15 = sphi %s546_s15, %s597_s15  }
   0x3   : > { %p29_p1 = scmp.ge.s32.totalorder %s27_s18, 2  ;;  %p188_p2 = scmp.lt.s32.totalorder %s518_s17, 3 }
   0x5   : > { %s600_s18 = smov (%p29_p1, %s27_s18), 0  ;;  %p189_p3 = pnand %p458_p0, %p188_p2 }
   0x6   : > { %p230_p4 = scmp.lt.s32.totalorder (!%p189_p3), %s510_s15, 1 }
   0x7   : > { %192 = sbr.rel (%p189_p3) target bundleno = 273 (0x111), region = 32 }
   0xc   : > { %v520_v0 = vmov 0   ;;  %v264_v1 = vld [vmem:[%s594_s2] sm:$0xf]  ;;  %s602_s15 = smov (!%p230_p4, %s510_s15), 1  ;;  %vm270_vm0 = vcmask 130048   ;;  %vm309_vm1 = vcmask 1043456  }
   0xd   : > { %495 = vset.pattern.permute.xlu0 %v520_v0  ;;  %s468_s21 = sshll.u32 %s602_s15, 5  ;;  %v263_v8 = vld [vmem:[%s593_s1] sm:$0x3]  ;;  %s469_s27 = sshll.u32 %s602_s15, 2  ;;  %vm303_vm2 = vcmask 1041408   ;;  %vm322_vm3 = vcmask 7168  }
   0xe   : > { %267 = vperm.xlu0 %495, %v264_v1   ;;  %s237_s24 = scalar_lea.vmem %s592_s0, %s468_s21  ;;  %s247_s30 = scalar_lea.vmem %s595_s3, %s469_s27  ;;  %vm324_vm4 = vcmask 11264  }
   0xf   : > { %v257_v2 = vld [vmem:[%s237_s24] sm:$0xff]  ;;  %v259_v3 = vld [vmem:[%s237_s24 + $0x10] sm:$0xff]  ;;  %v258_v4 = vld [vmem:[%s237_s24 + $0x8] sm:$0xff]  ;;  %s255_s7 = scalar_lea.vmem %s596_s4, %s469_s27 }
  0x10   : > { %v261_v5 = vpack.c.bf16 %v259_v3, %v257_v2  ;;  %v260_v6 = vld [vmem:[%s237_s24 + $0x18] sm:$0xff] }
  0x11   : > { %v262_v7 = vpack.c.bf16 %v260_v6, %v258_v4 }
  0x12   : > { %281 = vmatpush.bf16.msra.mxu0 %v261_v5 }
  0x13   : > { %294 = vmatpush.bf16.msra.mxu1 %v262_v7 }
  0x15   : > { %464 = vmatmul.msk.bf16.vlgmr.msra.gmra.mxu0 %vm270_vm0, %v263_v8 }
  0x16   : > { %465 = vmatmul.msk.bf16.vlgmr.msra.gmra.mxu1 %vm270_vm0, %v263_v8 }
  0x80   : > { %v268_v9 = vpop.permute.xlu0 %267 }
  0x92   : > { %v283_v10 = vpop.f32.mrf.mxu0 }
  0x93   : > { %v284_v11 = vadd.f32 %v283_v10, %v268_v9  ;;  %v296_v12 = vpop.f32.mrf.mxu1 }
  0x94   : > { %v297_v13 = vadd.f32 %v296_v12, %v268_v9 }
  0x95   : > { %v310_v14 = vsel %vm309_vm1, %v284_v11, 0.0  ;;  %v315_v15 = vmul.f32 %v284_v11, %v284_v11 }
  0x96   : > { %v300_v16 = vpack.c.bf16 %v297_v13, %v284_v11  ;;  %v311_v17 = vsel %vm309_vm1, %v297_v13, 0.0  ;;  %v316_v18 = vmul.f32 %v297_v13, %v297_v13 }
  0x97   : > { %v312_v19 = vadd.f32 %v311_v17, %v310_v14  ;;  %v317_v20 = vsel %vm309_vm1, %v315_v15, 0.0 }
  0x98   : > { %v302_v21 = vrot.slane %v300_v16, 2  ;;  %v318_v22 = vsel %vm309_vm1, %v316_v18, 0.0 }
  0x99   : > { %313 = vadd.xlane.f32.xlu0 %v312_v19  ;;  %v319_v23 = vadd.f32 %v318_v22, %v317_v20 }
  0x9a   : > { %v306_v24 = vsel %vm303_vm2, %v300_v16, %v302_v21  ;;  %v285_v25 = vpop.f32.mrf.mxu0 }
  0x9b   : > { %v298_v26 = vpop.f32.mrf.mxu1  ;;  %320 = vadd.xlane.f32.xlu1 %v319_v23  ;;  %308 = vst [vmem:[%s247_s30] sm:$0xf] %v306_v24 }
 0x10c   : > { %v314_v27 = vpop.xlane.xlu0 %313 }
 0x10e   : > { %v321_v28 = vpop.xlane.xlu1 %320 }
 0x10f   : > { %v323_v29 = vsel %vm322_vm3, %v314_v27, %v321_v28 }
 0x110   : > { %325 = vst.msk [vmem:[%s255_s7] sm:$0xf] %vm324_vm4, %v323_v29 }
 0x111 PF: > { %s15_s17 = sadd.s32 1, %s518_s17   ;;  %s597_s15 = smov %s514_s16 }
 0x112   : > { %p12_p5 = scmp.ge.s32.totalorder %s15_s17, 4   ;;  %s598_s16 = smov %s600_s18 }
 0x114   :  { %14 = sbr.rel (!%p12_p5) target bundleno = 2 (0x2), region = 74 }

// kernel: quaternion_pyramid_forward.10
= control target key start
LH: loop header
LB: loop body
LE: loop exit
PB: predicated region body
PF: predicated region fallthrough
CT: control target
= control target key end

     0   :  { %s654_s18 = smov 0   ;;  %s656_s19 = smov 0   ;;  %s710_s0 = inlined_call_operand.vmem [shape: bf16[2,4,256], index: 0, kind: input, shape index: {}]   ;;  %s711_s1 = inlined_call_operand.vmem [shape: bf16[16,4], index: 1, kind: input, shape index: {}]   ;;  %s712_s2 = inlined_call_operand.vmem [shape: f32[16,1], index: 2, kind: input, shape index: {}]   ;;  %s713_s3 = inlined_call_operand.vmem [shape: f32[4,2], index: 3, kind: input, shape index: {}]   ;;  %s714_s4 = inlined_call_operand.vmem [shape: bf16[2,16,256], index: 4, kind: output, shape index: {0}]   ;;  %s715_s5 = inlined_call_operand.vmem [shape: f32[2,1,16,2], index: 5, kind: output, shape index: {1}]  }
   0x1   :  { %s658_s20 = smov 0  }
   0x2 LB: > { %s28_s21 = sadd.s32 1, %s615_s19  ;;  %p547_p0 = scmp.ge.s32.totalorder %s619_s20, 1  ;;  %s619_s20 = sphi %s658_s20, %s16_s20   ;;  %s615_s19 = sphi %s656_s19, %s717_s19   ;;  %s611_s18 = sphi %s654_s18, %s716_s18  }
   0x3   : > { %p30_p1 = scmp.ge.s32.totalorder %s28_s21, 2  ;;  %p213_p2 = scmp.lt.s32.totalorder %s619_s20, 3 }
   0x5   : > { %s719_s21 = smov (%p30_p1, %s28_s21), 0  ;;  %p214_p3 = pnand %p547_p0, %p213_p2 }
   0x6   : > { %p259_p4 = scmp.lt.s32.totalorder (!%p214_p3), %s611_s18, 1 }
   0x7   : > { %217 = sbr.rel (%p214_p3) target bundleno = 422 (0x1a6), region = 36 }
   0xc   : > { %v290_v0 = vld [vmem:[%s713_s3] sm:$0xf]  ;;  %v621_v1 = vmov 0   ;;  %v622_v2 = vmov 1   ;;  %s721_s18 = smov (!%p259_p4, %s611_s18), 1  ;;  %v322_v9 = vld [vmem:[%s712_s2 + $0x8] sm:$0xff] }
   0xd   : > { %593 = vset.pattern.permute.xlu0 %v621_v1  ;;  %595 = vset.pattern.permute.xlu1 %v621_v1  ;;  %s562_s24 = sshll.u32 %s721_s18, 2  ;;  %v623_v3 = vmov 839922192   ;;  %v321_v5 = vld [vmem:[%s712_s2] sm:$0xff]  ;;  %vm342_vm0 = vcmask 1041408   ;;  %vm338_vm1 = vcmask 31744  }
   0xe   : > { %293 = vperm.xlu0 %593, %v290_v0   ;;  %v296_v4 = vunpack.c.l.s4 %v623_v3  ;;  %325 = vperm.xlu1 %595, %v321_v5   ;;  %s266_s29 = scalar_lea.vmem %s710_s0, %s562_s24  ;;  %v565_v23 = vld [vmem:[%s711_s1] sm:$0xff]  ;;  %s563_s9 = sshll.u32 %s721_s18, 4  ;;  %vm397_vm2 = vcmask 7168   ;;  %vm400_vm3 = vcmask 15360  }
   0xf   : > { %v288_v8 = vld [vmem:[%s266_s29] sm:$0xf]  ;;  %s276_s12 = scalar_lea.vmem %s714_s4, %s563_s9  ;;  %s286_s15 = scalar_lea.vmem %s715_s5, %s563_s9 }
  0x10   : > { %v297_v7 = vunpack.c.0.s8 %v296_v4  ;;  %v289_v10 = vunpack.c.l.bf16 %v288_v8 }
  0x16   : > { %594 = vset.pattern.permute.xlu0 %v622_v2  ;;  %330 = vperm.xlu1 %595, %v322_v9  }
  0x17   : > { %302 = vperm.xlu0 %594, %v290_v0  }
  0x1f   : > { %596 = vset.pattern.permute.xlu0 %v621_v1 }
  0x80   : > { %v294_v6 = vpop.permute.xlu0 %293  ;;  %v326_v24 = vpop.permute.xlu1 %325 }
  0x81   : > { %v298_v11 = vperm.slane %v294_v6, %v297_v7 }
  0x83   : > { %v300_v13 = vmul.f32 %v298_v11, %v289_v10 }
  0x88   : > { %v331_v34 = vpop.permute.xlu1 %330 }
  0x89   : > { %v303_v12 = vpop.permute.xlu0 %302 }
  0x8a   : > { %v307_v14 = vperm.slane %v303_v12, %v297_v7 }
  0x8c   : > { %v309_v15 = vadd.f32 %v307_v14, %v300_v13 }
  0x8e   : > { %v310_v16 = vmax.f32 %v309_v15, 0.0 }
  0x90   : > { %312 = vst [vmem:[#allocation1] ss:$2 sm:$0xff] %v310_v16 }
  0x97   : > { %v313_v17 = vld.sshfl [vmem:[#allocation1] sm:$0xff pattern:$0x75316420]  ;;  %v314_v18 = vld.sshfl [vmem:[#allocation1 + $0x8] sm:$0xff pattern:$0x75316420] }
  0x98   : > { %v317_v19 = vpack.c.bf16 %v313_v17, %v313_v17  ;;  %v318_v20 = vpack.c.bf16 %v314_v18, %v314_v18 }
  0x9a   : > { %v344_v21 = vsel %vm342_vm0, %v317_v19, 0  ;;  %v347_v22 = vsel %vm342_vm0, %v318_v20, 0 }
  0x9b   : > { %356 = vmatpush.bf16.msra.mxu0 %v344_v21  ;;  %370 = vmatpush.bf16.msra.mxu1 %v347_v22 }
  0x9e   : > { %558 = vmatmul.msk.bf16.vlgmr.msra.gmra.mxu0 %vm338_vm1, %v565_v23  ;;  %559 = vmatmul.msk.bf16.vlgmr.msra.gmra.mxu1 %vm338_vm1, %v565_v23 }
 0x11b   : > { %v358_v25 = vpop.f32.mrf.mxu0  ;;  %v372_v26 = vpop.f32.mrf.mxu1 }
 0x11c   : > { %v359_v27 = vadd.f32 %v358_v25, %v326_v24  ;;  %v373_v28 = vadd.f32 %v372_v26, %v326_v24 }
 0x11e   : > { %v377_v29 = vpack.c.bf16 %v373_v28, %v359_v27  ;;  %v381_v30 = vadd.f32 %v373_v28, %v359_v27  ;;  %v387_v31 = vmul.f32 %v359_v27, %v359_v27  ;;  %v388_v32 = vmul.f32 %v373_v28, %v373_v28 }
 0x120   : > { %379 = vst [vmem:[%s276_s12] sm:$0xff] %v377_v29  ;;  %382 = vadd.xlane.f32.xlu2 %v381_v30  ;;  %v391_v33 = vadd.f32 %v388_v32, %v387_v31 }
 0x122   : > { %392 = vadd.xlane.f32.xlu1 %v391_v33 }
 0x123   : > { %v360_v35 = vpop.f32.mrf.mxu0  ;;  %v374_v36 = vpop.f32.mrf.mxu1 }
 0x124   : > { %v361_v37 = vadd.f32 %v360_v35, %v331_v34  ;;  %v375_v38 = vadd.f32 %v374_v36, %v331_v34 }
 0x126   : > { %v378_v39 = vpack.c.bf16 %v375_v38, %v361_v37  ;;  %v384_v40 = vadd.f32 %v375_v38, %v361_v37  ;;  %v389_v41 = vmul.f32 %v361_v37, %v361_v37  ;;  %v390_v42 = vmul.f32 %v375_v38, %v375_v38 }
 0x128   : > { %380 = vst [vmem:[%s276_s12 + $0x8] sm:$0xff] %v378_v39  ;;  %385 = vadd.xlane.f32.xlu2 %v384_v40  ;;  %v394_v43 = vadd.f32 %v390_v42, %v389_v41 }
 0x130   : > { %395 = vadd.xlane.f32.xlu2 %v394_v43 }
 0x193   : > { %v383_v44 = vpop.xlane.xlu2 %382 }
 0x195   : > { %v393_v45 = vpop.xlane.xlu1 %392 }
 0x196   : > { %v398_v46 = vsel %vm397_vm2, %v383_v44, %v393_v45 }
 0x197   : > { %401 = vst.msk [vmem:[%s286_s15] sm:$0xff] %vm400_vm3, %v398_v46 }
 0x19b   : > { %v386_v47 = vpop.xlane.xlu2 %385 }
 0x1a3   : > { %v396_v48 = vpop.xlane.xlu2 %395 }
 0x1a4   : > { %v399_v49 = vsel %vm397_vm2, %v386_v47, %v396_v48 }
 0x1a5   : > { %402 = vst.msk [vmem:[%s286_s15 + $0x8] sm:$0xff] %vm400_vm3, %v399_v49 }
 0x1a6 PF: > { %s16_s20 = sadd.s32 1, %s619_s20   ;;  %s716_s18 = smov %s615_s19 }
 0x1a7   : > { %p13_p5 = scmp.ge.s32.totalorder %s16_s20, 4   ;;  %s717_s19 = smov %s719_s21 }
 0x1a9   :  { %15 = sbr.rel (!%p13_p5) target bundleno = 2 (0x2), region = 78 }

// kernel: quaternion_pyramid_forward.9
= control target key start
LH: loop header
LB: loop body
LE: loop exit
PB: predicated region body
PF: predicated region fallthrough
CT: control target
= control target key end

     0   :  { %s1279_s24 = smov 0   ;;  %s1428_s0 = inlined_call_operand.vmem [shape: bf16[2,4,342], index: 0, kind: input, shape index: {}]   ;;  %s1429_s1 = inlined_call_operand.vmem [shape: bf16[9,4,4], index: 1, kind: input, shape index: {}]   ;;  %s1430_s2 = inlined_call_operand.vmem [shape: f32[4,1], index: 2, kind: input, shape index: {}]   ;;  %s1431_s3 = inlined_call_operand.vmem [shape: f32[1,288], index: 3, kind: input, shape index: {}]   ;;  %s1432_s4 = inlined_call_operand.vmem [shape: f32[4,2], index: 4, kind: input, shape index: {}]   ;;  %s1433_s5 = inlined_call_operand.vmem [shape: f32[1,342], index: 5, kind: input, shape index: {}]   ;;  %s1434_s6 = inlined_call_operand.vmem [shape: bf16[2,4,288], index: 6, kind: output, shape index: {0}]   ;;  %s1435_s7 = inlined_call_operand.vmem [shape: f32[2,4,2], index: 7, kind: output, shape index: {1}]  }
   0x1 LB: > { %s1152_s25 = sadd.s32 4294967295, %s1226_s24   ;;  %p1156_p0 = scmp.ge.s32.totalorder %s1226_s24, 1  ;;  %s1226_s24 = sphi %s1279_s24, %s18_s24  }
   0x2   : > { %p240_p1 = scmp.lt.s32.totalorder %s1226_s24, 3 }
   0x4   : > { %p241_p2 = pnand %p1156_p0, %p240_p1 }
   0x5   : > { %p276_p3 = scmp.lt.s32.totalorder (!%p241_p2), %s1152_s25, 1  ;;  %s1231_s11 = smov (!%p241_p2), 127  }
   0x6   : > { %244 = sbr.rel (%p241_p2) target bundleno = 658 (0x292), region = 44  ;;  %s1232_s12 = smov (!%p241_p2), 126  }
   0x7   : > { %s1233_s13 = smov (!%p241_p2), 110   ;;  %s1234_s14 = smov (!%p241_p2), 109  }
   0x8   : > { %s1235_s15 = smov (!%p241_p2), 108   ;;  %s1236_s16 = smov (!%p241_p2), 92  }
   0x9   : > { %s1237_s17 = smov (!%p241_p2), 91   ;;  %s1238_s18 = smov (!%p241_p2), 90  }
   0xb   : > { %v294_v0 = vld [vmem:[%s1432_s4] sm:$0xf]  ;;  %v1228_v1 = vmov 0   ;;  %v1229_v2 = vmov 1   ;;  %s1439_s25 = smov (!%p276_p3, %s1152_s25), 1  ;;  %vm325_vm0 = vcmask 1043456  }
   0xc   : > { %1217 = vset.pattern.permute.xlu0 %v1228_v1  ;;  %s1197_s28 = smul.u32 6, %s1439_s25  ;;  %v1230_v3 = vmov 839922192   ;;  %v318_v7 = vld [vmem:[%s1433_s5] sm:$0x7]  ;;  %vm348_vm1 = vcmask 1041408  }
   0xd   : > { %297 = vperm.xlu0 %1217, %v294_v0   ;;  %v300_v4 = vunpack.c.l.s4 %v1230_v3  ;;  %v321_v9 = vperm.slane %v318_v7, 1  ;;  %v320_v13 = vperm.slane %v318_v7, 0  ;;  %v322_v19 = vperm.slane %v318_v7, 2 }
   0xe   : > { %s280_s8 = scalar_lea.vmem %s1428_s0, %s1197_s28  ;;  %vm358_vm2 = vcmask 1043458   ;;  %vm360_vm4 = vcmask 701444   ;;  %vm352_vm5 = vcmask 1045508   ;;  %vm384_vm7 = vcmask 31744   ;;  %s285_s23 = scalar_lea.vmem %s1434_s6, %s1197_s28 }
   0xf   : > { %v301_v6 = vunpack.c.0.s8 %v300_v4  ;;  %v291_v8 = vld [vmem:[%s280_s8] sm:$0x3f]  ;;  %v324_v14 = vrot.slane %v321_v9, 4  ;;  %vm1303_vm3 = vmor %vm358_vm2, %vm348_vm1  ;;  %vm381_vm8 = vcmask 1039360   ;;  %vm505_vm9 = vcmask 1031168   ;;  %s1159_s28 = sshll.u32 %s1439_s25, 2 }
  0x10   : > { %v292_v10 = vunpack.c.l.bf16 %v291_v8  ;;  %v293_v11 = vunpack.c.h.bf16 %v291_v8  ;;  %vm361_vm6 = vmor %vm360_vm4, %vm1303_vm3  ;;  %vm579_vm10 = vcmask 900096   ;;  %vm653_vm11 = vcmask 891904   ;;  %s289_s29 = scalar_lea.vmem %s1435_s7, %s1159_s28 }
  0x11   : > { %v326_v22 = vsel %vm325_vm0, %v320_v13, %v324_v14  ;;  %vm727_vm12 = vcmask 883712   ;;  %vm801_vm13 = vcmask 752640   ;;  %vm875_vm14 = vcmask 744448  }
  0x12   : > { %vm949_vm15 = vcmask 736256   ;;  %vm1030_vm2 = vcmask 259076   ;;  %vm1047_vm4 = vcmask 257024  }
  0x15   : > { %1218 = vset.pattern.permute.xlu0 %v1229_v2 }
  0x16   : > { %307 = vperm.xlu0 %1218, %v294_v0  }
  0x1e   : > { %1219 = vset.pattern.permute.xlu0 %v1228_v1 }
  0x7f   : > { %v298_v5 = vpop.permute.xlu0 %297 }
  0x80   : > { %v302_v12 = vperm.slane %v298_v5, %v301_v6 }
  0x82   : > { %v304_v16 = vmul.f32 %v302_v12, %v292_v10  ;;  %v305_v17 = vmul.f32 %v302_v12, %v293_v11  ;;  %v363_v11 = vld [vmem:[%s1429_s1] sm:$0x3] }
  0x88   : > { %v308_v15 = vpop.permute.xlu0 %307 }
  0x89   : > { %v312_v18 = vperm.slane %v308_v15, %v301_v6 }
  0x8b   : > { %v314_v20 = vadd.f32 %v312_v18, %v304_v16  ;;  %v315_v21 = vadd.f32 %v312_v18, %v305_v17  ;;  %v1160_v18 = vld [vmem:[%s1429_s1 + $0x2] sm:$0x3] }
  0x8d   : > { %v316_v23 = vmax.f32 %v314_v20, 0.0  ;;  %v317_v24 = vmax.f32 %v315_v21, 0.0 }
  0x8f   : > { %v328_v25 = vmul.f32 %v326_v22, %v316_v23  ;;  %v329_v26 = vmul.f32 %v322_v19, %v317_v24 }
  0x91   : > { %332 = vst [vmem:[#allocation1] ss:$2 sm:$0xff] %v328_v25 }
  0x92   : > { %334 = vst [vmem:[#allocation1 + $0x10] ss:$2 sm:$0xff] %v329_v26 }
  0x98   : > { %v335_v27 = vld.sshfl [vmem:[#allocation1] sm:$0xff pattern:$0x75316420]  ;;  %v336_v28 = vld.sshfl [vmem:[#allocation1 + $0x8] sm:$0xff pattern:$0x75316420] }
  0x99   : > { %v337_v29 = vld.sshfl [vmem:[#allocation1 + $0x10] sm:$0xff pattern:$0x75316420]  ;;  %v341_v30 = vpack.c.bf16 %v336_v28, %v335_v27 }
  0x9a   : > { %v342_v32 = vpack.c.bf16 %v337_v29, %v337_v29 }
  0x9b   : > { %v345_v33 = vrot.slane %v341_v30, 2 }
  0x9c   : > { %v346_v34 = vrot.slane %v342_v32, 4  ;;  %v347_v35 = vrot.slane %v342_v32, 6  ;;  %v1167_v32 = vld [vmem:[%s1429_s1 + $0x4] sm:$0x3] }
  0x9d   : > { %v351_v36 = vsel %vm348_vm1, %v341_v30, %v345_v33 }
  0x9e   : > { %v355_v37 = vsel %vm352_vm5, %v346_v34, %v347_v35 }
  0x9f   : > { %v356_v38 = vsel %vm325_vm0, %v351_v36, %v355_v37 }
  0xa0   : > { %362 = vst.msk [vmem:[#allocation2] sm:$0x3f] %vm361_vm6, %v356_v38  ;;  %vm1031_vm6 = vmor %vm1030_vm2, %vm1303_vm3  ;;  %vm1062_vm3 = vcmask 7168  }
  0xa7   : > { %v364_v39 = vld [vmem:[#allocation2] sm:$0x3f] }
  0xa8   : > { %368 = vst [vmem:[#allocation1] ss:$4 sm:$0xff] %v364_v39  ;;  %v490_v45 = vld [vmem:[#allocation2] sm:$0x3f] }
  0xa9   : > { %v564_v50 = vld [vmem:[#allocation2] sm:$0x3f] }
  0xaa   : > { %v638_v54 = vld [vmem:[#allocation2] sm:$0x3f] }
  0xab   : > { %v712_v58 = vld [vmem:[#allocation2] sm:$0x3f] }
  0xac   : > { %v786_v62 = vld [vmem:[#allocation2] sm:$0x3f] }
  0xad   : > { %v860_v2 = vld [vmem:[#allocation2] sm:$0x3f] }
  0xae   : > { %v934_v6 = vld [vmem:[#allocation2] sm:$0x3f] }
  0xaf   : > { %v373_v40 = vld.sshfl [vmem:[#allocation1 + $0x10] sm:$0xff pattern:$0x73625140]  ;;  %v371_v41 = vld.sshfl [vmem:[#allocation1 + $0x8] sm:$0xff pattern:$0x73625140] }
  0xb0   : > { %379 = vrot.lane.b32.xlu1 %v373_v40, %s1231_s11  ;;  %377 = vrot.lane.b32.xlu2 %v371_v41, %s1231_s11  ;;  %v369_v42 = vld.sshfl [vmem:[#allocation1] sm:$0xff pattern:$0x73625140] }
  0xb1   : > { %436 = vst [vmem:[#allocation1] ss:$4 sm:$0xff] %v364_v39 }
  0xb8   : > { %375 = vrot.lane.b32.xlu1 %v369_v42, %s1231_s11  ;;  %v1312_v43 = vld.sshfl [vmem:[#allocation1 + $0x8] sm:$0xff pattern:$0x73625140]  ;;  %v1314_v44 = vld.sshfl [vmem:[#allocation1 + $0x10] sm:$0xff pattern:$0x73625140] }
  0xb9   : > { %v437_v46 = vld.sshfl [vmem:[#allocation1] sm:$0xff pattern:$0x73625140]  ;;  %v447_v19 = vsel %vm348_vm1, %v1314_v44, 0  ;;  %v445_v24 = vsel %vm348_vm1, %v1312_v43, 0 }
  0xba   : > { %v443_v47 = vsel %vm348_vm1, %v437_v46, 0  ;;  %492 = vst [vmem:[#allocation1] ss:$4 sm:$0xff] %v490_v45  ;;  %v1171_v42 = vld [vmem:[%s1429_s1 + $0x6] sm:$0x3] }
  0xbb   : > { %456 = vmatpush.bf16.msra.mxu3 %v443_v47 }
  0xbe   : > { %1164 = vmatmul.msk.bf16.vlgmr.msra.gmra.mxu3 %vm384_vm7, %v363_v11 }
  0xc1   : > { %v495_v48 = vld.sshfl [vmem:[#allocation1 + $0x8] sm:$0xff pattern:$0x73625140]  ;;  %v493_v49 = vld.sshfl [vmem:[#allocation1] sm:$0xff pattern:$0x73625140] }
  0xc2   : > { %501 = vrot.lane.b32.xlu1 %v495_v48, %s1232_s12  ;;  %499 = vrot.lane.b32.xlu2 %v493_v49, %s1232_s12  ;;  %v497_v51 = vld.sshfl [vmem:[#allocation1 + $0x10] sm:$0xff pattern:$0x73625140] }
  0xc3   : > { %566 = vst [vmem:[#allocation1] ss:$4 sm:$0xff] %v564_v50 }
  0xca   : > { %503 = vrot.lane.b32.xlu2 %v497_v51, %s1232_s12  ;;  %v571_v52 = vld.sshfl [vmem:[#allocation1 + $0x10] sm:$0xff pattern:$0x73625140]  ;;  %v569_v53 = vld.sshfl [vmem:[#allocation1 + $0x8] sm:$0xff pattern:$0x73625140] }
  0xcb   : > { %577 = vrot.lane.b32.xlu1 %v571_v52, %s1233_s13  ;;  %575 = vrot.lane.b32.xlu0 %v569_v53, %s1233_s13  ;;  %v567_v55 = vld.sshfl [vmem:[#allocation1] sm:$0xff pattern:$0x73625140] }
  0xcc   : > { %640 = vst [vmem:[#allocation1] ss:$4 sm:$0xff] %v638_v54 }
  0xd2   : > { %573 = vrot.lane.b32.xlu2 %v567_v55, %s1233_s13  ;;  %v1175_v55 = vld [vmem:[%s1429_s1 + $0x8] sm:$0x3] }
  0xd3   : > { %v645_v56 = vld.sshfl [vmem:[#allocation1 + $0x10] sm:$0xff pattern:$0x73625140]  ;;  %v641_v57 = vld.sshfl [vmem:[#allocation1] sm:$0xff pattern:$0x73625140] }
  0xd4   : > { %651 = vrot.lane.b32.xlu0 %v645_v56, %s1234_s14  ;;  %647 = vrot.lane.b32.xlu1 %v641_v57, %s1234_s14  ;;  %v643_v59 = vld.sshfl [vmem:[#allocation1 + $0x8] sm:$0xff pattern:$0x73625140] }
  0xd5   : > { %714 = vst [vmem:[#allocation1] ss:$4 sm:$0xff] %v712_v58 }
  0xda   : > { %649 = vrot.lane.b32.xlu2 %v643_v59, %s1234_s14 }
  0xdc   : > { %v717_v60 = vld.sshfl [vmem:[#allocation1 + $0x8] sm:$0xff pattern:$0x73625140]  ;;  %v715_v61 = vld.sshfl [vmem:[#allocation1] sm:$0xff pattern:$0x73625140] }
  0xdd   : > { %723 = vrot.lane.b32.xlu1 %v717_v60, %s1235_s15  ;;  %721 = vrot.lane.b32.xlu0 %v715_v61, %s1235_s15  ;;  %v719_v63 = vld.sshfl [vmem:[#allocation1 + $0x10] sm:$0xff pattern:$0x73625140] }
  0xde   : > { %788 = vst [vmem:[#allocation1] ss:$4 sm:$0xff] %v786_v62 }
  0xe5   : > { %725 = vrot.lane.b32.xlu1 %v719_v63, %s1235_s15  ;;  %v791_v0 = vld.sshfl [vmem:[#allocation1 + $0x8] sm:$0xff pattern:$0x73625140]  ;;  %v789_v1 = vld.sshfl [vmem:[#allocation1] sm:$0xff pattern:$0x73625140] }
  0xe6   : > { %797 = vrot.lane.b32.xlu0 %v791_v0, %s1236_s16  ;;  %795 = vrot.lane.b32.xlu2 %v789_v1, %s1236_s16  ;;  %v793_v3 = vld.sshfl [vmem:[#allocation1 + $0x10] sm:$0xff pattern:$0x73625140]  ;;  %v1179_v0 = vld [vmem:[%s1429_s1 + $0xa] sm:$0x3] }
  0xe7   : > { %862 = vst [vmem:[#allocation1] ss:$4 sm:$0xff] %v860_v2 }
  0xee   : > { %799 = vrot.lane.b32.xlu2 %v793_v3, %s1236_s16  ;;  %v867_v4 = vld.sshfl [vmem:[#allocation1 + $0x10] sm:$0xff pattern:$0x73625140]  ;;  %v865_v5 = vld.sshfl [vmem:[#allocation1 + $0x8] sm:$0xff pattern:$0x73625140] }
  0xef   : > { %873 = vrot.lane.b32.xlu1 %v867_v4, %s1237_s17  ;;  %871 = vrot.lane.b32.xlu0 %v865_v5, %s1237_s17  ;;  %v863_v7 = vld.sshfl [vmem:[#allocation1] sm:$0xff pattern:$0x73625140] }
  0xf0   : > { %936 = vst [vmem:[#allocation1] ss:$4 sm:$0xff] %v934_v6 }
  0xf6   : > { %869 = vrot.lane.b32.xlu2 %v863_v7, %s1237_s17 }
  0xf7   : > { %v941_v8 = vld.sshfl [vmem:[#allocation1 + $0x10] sm:$0xff pattern:$0x73625140]  ;;  %v937_v9 = vld.sshfl [vmem:[#allocation1] sm:$0xff pattern:$0x73625140] }
  0xf8   : > { %947 = vrot.lane.b32.xlu0 %v941_v8, %s1238_s18  ;;  %943 = vrot.lane.b32.xlu1 %v937_v9, %s1238_s18  ;;  %v939_v10 = vld.sshfl [vmem:[#allocation1 + $0x8] sm:$0xff pattern:$0x73625140] }
  0xfe   : > { %945 = vrot.lane.b32.xlu2 %v939_v10, %s1238_s18 }
 0x10a   : > { %v378_v12 = vpop.permute.xlu2 %377 }
 0x11c   : > { %v500_v14 = vpop.permute.xlu2 %499 }
 0x122   : > { %v380_v13 = vpop.permute.xlu1 %379 }
 0x123   : > { %v395_v15 = vsel %vm348_vm1, %v380_v13, 0  ;;  %v383_v16 = vsel %vm381_vm8, %v378_v12, %v380_v13 }
 0x124   : > { %430 = vmatpush.bf16.msra.mxu2 %v395_v15  ;;  %v392_v17 = vsel %vm348_vm1, %v383_v16, 0  ;;  %v504_v23 = vpop.permute.xlu2 %503 }
 0x125   : > { %417 = vmatpush.bf16.msra.mxu1 %v392_v17  ;;  %v518_v25 = vsel %vm348_vm1, %v504_v23, 0 }
 0x127   : > { %1163 = vmatmul.msk.bf16.vlgmr.msra.gmra.mxu2 %vm384_vm7, %v1160_v18 }
 0x128   : > { %1162 = vmatmul.msk.bf16.vlgmr.msra.gmra.mxu1 %vm384_vm7, %v1160_v18 }
 0x129   : > { %482 = vmatpush.bf16.msrb.mxu1 %v447_v19 }
 0x12a   : > { %v376_v20 = vpop.permute.xlu1 %375 }
 0x12b   : > { %v382_v21 = vsel %vm381_vm8, %v376_v20, %v378_v12  ;;  %v1183_v12 = vld [vmem:[%s1429_s1 + $0xc] sm:$0x3] }
 0x12c   : > { %v389_v22 = vsel %vm348_vm1, %v382_v21, 0  ;;  %v574_v33 = vpop.permute.xlu2 %573  ;;  %v1006_v21 = vld [vmem:[%s1430_s2] sm:$0xf] }
 0x12d   : > { %404 = vmatpush.bf16.msra.mxu0 %v389_v22  ;;  %1009 = vperm.xlu0 %1219, %v1006_v21   ;;  %v1187_v22 = vld [vmem:[%s1429_s1 + $0xe] sm:$0x3] }
 0x130   : > { %1161 = vmatmul.msk.bf16.vlgmr.msra.gmra.mxu0 %vm384_vm7, %v1160_v18 }
 0x131   : > { %469 = vmatpush.bf16.msrb.mxu0 %v445_v24 }
 0x134   : > { %v502_v26 = vpop.permute.xlu1 %501  ;;  %v650_v41 = vpop.permute.xlu2 %649 }
 0x135   : > { %553 = vmatpush.bf16.msra.mxu0 %v518_v25  ;;  %v506_v27 = vsel %vm505_vm9, %v500_v14, %v502_v26  ;;  %v507_v28 = vsel %vm505_vm9, %v502_v26, %v504_v23  ;;  %v1191_v23 = vld [vmem:[%s1429_s1 + $0x10] sm:$0x3] }
 0x136   : > { %v512_v29 = vsel %vm348_vm1, %v506_v27, 0  ;;  %v515_v30 = vsel %vm348_vm1, %v507_v28, 0 }
 0x137   : > { %527 = vmatpush.bf16.msrb.mxu2 %v512_v29  ;;  %540 = vmatpush.bf16.msrb.mxu3 %v515_v30 }
 0x138   : > { %1166 = vmatmul.msk.bf16.vlgmr.msrb.gmra.mxu1 %vm384_vm7, %v363_v11 }
 0x13a   : > { %1168 = vmatmul.msk.bf16.vlgmr.msrb.gmra.mxu2 %vm384_vm7, %v1167_v32  ;;  %1169 = vmatmul.msk.bf16.vlgmr.msrb.gmra.mxu3 %vm384_vm7, %v1167_v32 }
 0x13d   : > { %v578_v34 = vpop.permute.xlu1 %577  ;;  %v576_v35 = vpop.permute.xlu0 %575 }
 0x13e   : > { %v592_v36 = vsel %vm348_vm1, %v578_v34, 0  ;;  %v580_v37 = vsel %vm579_vm10, %v574_v33, %v576_v35  ;;  %v581_v38 = vsel %vm579_vm10, %v576_v35, %v578_v34 }
 0x13f   : > { %v586_v39 = vsel %vm348_vm1, %v580_v37, 0  ;;  %v589_v40 = vsel %vm348_vm1, %v581_v38, 0  ;;  %627 = vmatpush.bf16.msra.mxu3 %v592_v36 }
 0x140   : > { %601 = vmatpush.bf16.msra.mxu1 %v586_v39  ;;  %614 = vmatpush.bf16.msra.mxu2 %v589_v40  ;;  %v796_v50 = vpop.permute.xlu2 %795 }
 0x141   : > { %1165 = vmatmul.msk.bf16.vlgmr.msrb.gmra.mxu0 %vm384_vm7, %v363_v11  ;;  %v458_v24 = vpop.f32.mrf.mxu3 }
 0x146   : > { %v652_v43 = vpop.permute.xlu0 %651  ;;  %v648_v44 = vpop.permute.xlu1 %647 }
 0x147   : > { %v655_v45 = vsel %vm653_vm11, %v650_v41, %v652_v43  ;;  %v666_v46 = vsel %vm348_vm1, %v652_v43, 0  ;;  %v654_v47 = vsel %vm653_vm11, %v648_v44, %v650_v41 }
 0x148   : > { %v663_v48 = vsel %vm348_vm1, %v655_v45, 0  ;;  %v660_v49 = vsel %vm348_vm1, %v654_v47, 0  ;;  %701 = vmatpush.bf16.msrb.mxu2 %v666_v46  ;;  %1172 = vmatmul.msk.bf16.vlgmr.msra.gmra.mxu1 %vm384_vm7, %v1171_v42  ;;  %v800_v56 = vpop.permute.xlu2 %799 }
 0x149   : > { %675 = vmatpush.bf16.msrb.mxu0 %v660_v49  ;;  %688 = vmatpush.bf16.msrb.mxu1 %v663_v48  ;;  %v814_v4 = vsel %vm348_vm1, %v800_v56, 0  ;;  %v460_v25 = vpop.f32.mrf.mxu3 }
 0x14a   : > { %1173 = vmatmul.msk.bf16.vlgmr.msra.gmra.mxu2 %vm384_vm7, %v1171_v42  ;;  %1174 = vmatmul.msk.bf16.vlgmr.msra.gmra.mxu3 %vm384_vm7, %v1171_v42 }
 0x14f   : > { %v724_v51 = vpop.permute.xlu1 %723  ;;  %v722_v52 = vpop.permute.xlu0 %721 }
 0x150   : > { %v728_v53 = vsel %vm727_vm12, %v722_v52, %v724_v51  ;;  %v870_v3 = vpop.permute.xlu2 %869 }
 0x151   : > { %v734_v54 = vsel %vm348_vm1, %v728_v53, 0  ;;  %1170 = vmatmul.msk.bf16.vlgmr.msra.gmra.mxu0 %vm384_vm7, %v1167_v32 }
 0x152   : > { %749 = vmatpush.bf16.msrb.mxu3 %v734_v54 }
 0x157   : > { %v726_v57 = vpop.permute.xlu1 %725 }
 0x158   : > { %v729_v58 = vsel %vm727_vm12, %v724_v51, %v726_v57  ;;  %v740_v59 = vsel %vm348_vm1, %v726_v57, 0  ;;  %v798_v60 = vpop.permute.xlu0 %797  ;;  %1177 = vmatmul.msk.bf16.vlgmr.msrb.gmra.mxu1 %vm384_vm7, %v1175_v55  ;;  %v946_v13 = vpop.permute.xlu2 %945 }
 0x159   : > { %v737_v61 = vsel %vm348_vm1, %v729_v58, 0  ;;  %v802_v62 = vsel %vm801_vm13, %v796_v50, %v798_v60  ;;  %v803_v63 = vsel %vm801_vm13, %v798_v60, %v800_v56  ;;  %775 = vmatpush.bf16.msra.mxu1 %v740_v59 }
 0x15a   : > { %v808_v1 = vsel %vm348_vm1, %v802_v62, 0  ;;  %v811_v2 = vsel %vm348_vm1, %v803_v63, 0  ;;  %762 = vmatpush.bf16.msra.mxu0 %v737_v61  ;;  %1178 = vmatmul.msk.bf16.vlgmr.msrb.gmra.mxu2 %vm384_vm7, %v1175_v55 }
 0x15b   : > { %823 = vmatpush.bf16.msra.mxu2 %v808_v1  ;;  %836 = vmatpush.bf16.msra.mxu3 %v811_v2 }
 0x15c   : > { %1180 = vmatmul.msk.bf16.vlgmr.msrb.gmra.mxu3 %vm384_vm7, %v1179_v0 }
 0x161   : > { %v874_v5 = vpop.permute.xlu1 %873  ;;  %v872_v6 = vpop.permute.xlu0 %871  ;;  %1176 = vmatmul.msk.bf16.vlgmr.msrb.gmra.mxu0 %vm384_vm7, %v1175_v55 }
 0x162   : > { %v888_v7 = vsel %vm348_vm1, %v874_v5, 0  ;;  %v876_v8 = vsel %vm875_vm14, %v870_v3, %v872_v6  ;;  %v877_v9 = vsel %vm875_vm14, %v872_v6, %v874_v5  ;;  %849 = vmatpush.bf16.msrb.mxu0 %v814_v4 }
 0x163   : > { %v882_v10 = vsel %vm348_vm1, %v876_v8, 0  ;;  %v885_v11 = vsel %vm348_vm1, %v877_v9, 0  ;;  %923 = vmatpush.bf16.msrb.mxu3 %v888_v7 }
 0x164   : > { %897 = vmatpush.bf16.msrb.mxu1 %v882_v10  ;;  %910 = vmatpush.bf16.msrb.mxu2 %v885_v11 }
 0x168   : > { %1182 = vmatmul.msk.bf16.vlgmr.msra.gmra.mxu1 %vm384_vm7, %v1179_v0 }
 0x16a   : > { %v948_v14 = vpop.permute.xlu0 %947  ;;  %1184 = vmatmul.msk.bf16.vlgmr.msra.gmra.mxu2 %vm384_vm7, %v1183_v12  ;;  %v944_v17 = vpop.permute.xlu1 %943 }
 0x16b   : > { %v951_v15 = vsel %vm949_vm15, %v946_v13, %v948_v14  ;;  %v962_v16 = vsel %vm348_vm1, %v948_v14, 0  ;;  %v950_v19 = vsel %vm949_vm15, %v944_v17, %v946_v13 }
 0x16c   : > { %v959_v18 = vsel %vm348_vm1, %v951_v15, 0  ;;  %997 = vmatpush.bf16.msra.mxu2 %v962_v16  ;;  %1185 = vmatmul.msk.bf16.vlgmr.msra.gmra.mxu3 %vm384_vm7, %v1183_v12  ;;  %v956_v20 = vsel %vm348_vm1, %v950_v19, 0 }
 0x16d   : > { %984 = vmatpush.bf16.msra.mxu1 %v959_v18 }
 0x171   : > { %1181 = vmatmul.msk.bf16.vlgmr.msra.gmra.mxu0 %vm384_vm7, %v1179_v0 }
 0x172   : > { %971 = vmatpush.bf16.msra.mxu0 %v956_v20 }
 0x178   : > { %1188 = vmatmul.msk.bf16.vlgmr.msrb.gmra.mxu1 %vm384_vm7, %v1187_v22 }
 0x17a   : > { %1189 = vmatmul.msk.bf16.vlgmr.msrb.gmra.mxu2 %vm384_vm7, %v1187_v22 }
 0x17c   : > { %1190 = vmatmul.msk.bf16.vlgmr.msrb.gmra.mxu3 %vm384_vm7, %v1187_v22 }
 0x181   : > { %1186 = vmatmul.msk.bf16.vlgmr.msrb.gmra.mxu0 %vm384_vm7, %v1183_v12 }
 0x188   : > { %1193 = vmatmul.msk.bf16.vlgmr.msra.gmra.mxu1 %vm384_vm7, %v1191_v23 }
 0x18a   : > { %1194 = vmatmul.msk.bf16.vlgmr.msra.gmra.mxu2 %vm384_vm7, %v1191_v23 }
 0x191   : > { %1192 = vmatmul.msk.bf16.vlgmr.msra.gmra.mxu0 %vm384_vm7, %v1191_v23 }
 0x1a5   : > { %v419_v26 = vpop.f32.mrf.mxu1 }
 0x1aa   : > { %v432_v27 = vpop.f32.mrf.mxu2 }
 0x1ad   : > { %v406_v28 = vpop.f32.mrf.mxu0  ;;  %v421_v29 = vpop.f32.mrf.mxu1 }
 0x1ae   : > { %v459_v30 = vadd.f32 %v458_v24, %v406_v28 }
 0x1b2   : > { %v434_v32 = vpop.f32.mrf.mxu2 }
 0x1b5   : > { %v408_v33 = vpop.f32.mrf.mxu0  ;;  %v484_v34 = vpop.f32.mrf.mxu1 }
 0x1b6   : > { %v485_v35 = vadd.f32 %v484_v34, %v432_v27  ;;  %v1010_v27 = vpop.permute.xlu0 %1009 }
 0x1bd   : > { %v529_v36 = vpop.f32.mrf.mxu2  ;;  %v486_v37 = vpop.f32.mrf.mxu1 }
 0x1be   : > { %v559_v38 = vadd.f32 %v529_v36, %v459_v30  ;;  %v471_v39 = vpop.f32.mrf.mxu0  ;;  %v542_v40 = vpop.f32.mrf.mxu3 }
 0x1bf   : > { %v472_v41 = vadd.f32 %v471_v39, %v419_v26  ;;  %v1033_v26 = vld [vmem:[%s1431_s3] sm:$0x7] }
 0x1c0   : > { %v1036_v32 = vperm.slane %v1033_v26, 1 }
 0x1c1   : > { %v560_v42 = vadd.f32 %v542_v40, %v472_v41 }
 0x1c5   : > { %v531_v43 = vpop.f32.mrf.mxu2  ;;  %v603_v44 = vpop.f32.mrf.mxu1 }
 0x1c6   : > { %v473_v45 = vpop.f32.mrf.mxu0  ;;  %v544_v46 = vpop.f32.mrf.mxu3  ;;  %v633_v17 = vadd.f32 %v603_v44, %v559_v38  ;;  %v1035_v44 = vperm.slane %v1033_v26, 0 }
 0x1cd   : > { %v616_v47 = vpop.f32.mrf.mxu2  ;;  %v605_v48 = vpop.f32.mrf.mxu1 }
 0x1ce   : > { %v555_v49 = vpop.f32.mrf.mxu0  ;;  %v629_v50 = vpop.f32.mrf.mxu3  ;;  %v634_v7 = vadd.f32 %v616_v47, %v560_v42  ;;  %v1037_v42 = vperm.slane %v1033_v26, 2 }
 0x1cf   : > { %v561_v11 = vadd.f32 %v555_v49, %v485_v35 }
 0x1d1   : > { %v635_v15 = vadd.f32 %v629_v50, %v561_v11 }
 0x1d5   : > { %v618_v51 = vpop.f32.mrf.mxu2  ;;  %v690_v52 = vpop.f32.mrf.mxu1 }
 0x1d6   : > { %v557_v53 = vpop.f32.mrf.mxu0  ;;  %v631_v54 = vpop.f32.mrf.mxu3  ;;  %v708_v8 = vadd.f32 %v690_v52, %v634_v7 }
 0x1dd   : > { %v703_v55 = vpop.f32.mrf.mxu2  ;;  %v692_v56 = vpop.f32.mrf.mxu1 }
 0x1de   : > { %v677_v57 = vpop.f32.mrf.mxu0  ;;  %v709_v18 = vadd.f32 %v703_v55, %v635_v15 }
 0x1df   : > { %v751_v58 = vpop.f32.mrf.mxu3  ;;  %v707_v20 = vadd.f32 %v677_v57, %v633_v17 }
 0x1e1   : > { %v781_v30 = vadd.f32 %v751_v58, %v707_v20 }
 0x1e5   : > { %v705_v59 = vpop.f32.mrf.mxu2  ;;  %v777_v60 = vpop.f32.mrf.mxu1 }
 0x1e6   : > { %v679_v61 = vpop.f32.mrf.mxu0  ;;  %v783_v23 = vadd.f32 %v777_v60, %v709_v18 }
 0x1e7   : > { %v753_v62 = vpop.f32.mrf.mxu3 }
 0x1ed   : > { %v825_v63 = vpop.f32.mrf.mxu2  ;;  %v779_v0 = vpop.f32.mrf.mxu1 }
 0x1ee   : > { %v764_v1 = vpop.f32.mrf.mxu0  ;;  %v855_v34 = vadd.f32 %v825_v63, %v781_v30 }
 0x1ef   : > { %v838_v2 = vpop.f32.mrf.mxu3  ;;  %v782_v12 = vadd.f32 %v764_v1, %v708_v8 }
 0x1f1   : > { %v856_v16 = vadd.f32 %v838_v2, %v782_v12 }
 0x1f5   : > { %v827_v3 = vpop.f32.mrf.mxu2  ;;  %v899_v4 = vpop.f32.mrf.mxu1 }
 0x1f6   : > { %v766_v5 = vpop.f32.mrf.mxu0  ;;  %v929_v36 = vadd.f32 %v899_v4, %v855_v34 }
 0x1f7   : > { %v840_v6 = vpop.f32.mrf.mxu3 }
 0x1fd   : > { %v912_v9 = vpop.f32.mrf.mxu2  ;;  %v901_v10 = vpop.f32.mrf.mxu1 }
 0x1fe   : > { %v851_v13 = vpop.f32.mrf.mxu0  ;;  %v930_v19 = vadd.f32 %v912_v9, %v856_v16 }
 0x1ff   : > { %v925_v14 = vpop.f32.mrf.mxu3  ;;  %v857_v29 = vadd.f32 %v851_v13, %v783_v23 }
 0x201   : > { %v931_v35 = vadd.f32 %v925_v14, %v857_v29 }
 0x205   : > { %v914_v21 = vpop.f32.mrf.mxu2  ;;  %v986_v22 = vpop.f32.mrf.mxu1 }
 0x206   : > { %v853_v24 = vpop.f32.mrf.mxu0  ;;  %v1004_v25 = vadd.f32 %v986_v22, %v930_v19 }
 0x207   : > { %v927_v28 = vpop.f32.mrf.mxu3 }
 0x208   : > { %v1013_v33 = vadd.f32 %v1010_v27, %v1004_v25 }
 0x20a   : > { %v1042_v39 = vmul.f32 %v1036_v32, %v1013_v33 }
 0x20c   : > { %v1053_v47 = vmul.f32 %v1042_v39, %v1013_v33  ;;  %v1045_v54 = vsel %vm325_vm0, %v1042_v39, 0.0 }
 0x20d   : > { %v999_v37 = vpop.f32.mrf.mxu2  ;;  %v988_v38 = vpop.f32.mrf.mxu1 }
 0x20e   : > { %v1005_v40 = vadd.f32 %v999_v37, %v931_v35  ;;  %v973_v41 = vpop.f32.mrf.mxu0  ;;  %v1056_v62 = vsel %vm325_vm0, %v1053_v47, 0.0 }
 0x20f   : > { %v1003_v43 = vadd.f32 %v973_v41, %v929_v36 }
 0x210   : > { %v1014_v45 = vadd.f32 %v1010_v27, %v1005_v40 }
 0x211   : > { %v1012_v46 = vadd.f32 %v1010_v27, %v1003_v43 }
 0x212   : > { %v1016_v48 = vpack.c.bf16 %v1014_v45, %v1014_v45  ;;  %v1043_v49 = vmul.f32 %v1037_v42, %v1014_v45 }
 0x213   : > { %v1015_v50 = vpack.c.bf16 %v1013_v33, %v1012_v46  ;;  %v1041_v51 = vmul.f32 %v1035_v44, %v1012_v46 }
 0x214   : > { %v1020_v52 = vrot.slane %v1016_v48, 4  ;;  %v1021_v53 = vrot.slane %v1016_v48, 6  ;;  %v1054_v59 = vmul.f32 %v1043_v49, %v1014_v45  ;;  %v1048_v1 = vsel %vm1047_vm4, %v1043_v49, 0.0 }
 0x215   : > { %v1019_v55 = vrot.slane %v1015_v50, 2  ;;  %v1001_v56 = vpop.f32.mrf.mxu2  ;;  %v1044_v57 = vsel %vm325_vm0, %v1041_v51, 0.0  ;;  %v1052_v58 = vmul.f32 %v1041_v51, %v1012_v46 }
 0x216   : > { %v975_v60 = vpop.f32.mrf.mxu0  ;;  %v1046_v61 = vadd.f32 %v1045_v54, %v1044_v57  ;;  %v1027_v63 = vsel %vm352_vm5, %v1020_v52, %v1021_v53  ;;  %v1058_v31 = vsel %vm1047_vm4, %v1054_v59, 0.0 }
 0x217   : > { %v1024_v0 = vsel %vm348_vm1, %v1015_v50, %v1019_v55  ;;  %v1055_v2 = vsel %vm325_vm0, %v1052_v58, 0.0  ;;  %vm1064_vm1 = vcmask 11264  }
 0x218   : > { %v1028_v3 = vsel %vm325_vm0, %v1024_v0, %v1027_v63  ;;  %v1049_v4 = vadd.f32 %v1048_v1, %v1046_v61  ;;  %v1057_v5 = vadd.f32 %v1056_v62, %v1055_v2 }
 0x219   : > { %1032 = vst.msk [vmem:[%s285_s23] sm:$0x3f] %vm1031_vm6, %v1028_v3 }
 0x21a   : > { %1050 = vadd.xlane.f32.xlu1 %v1049_v4  ;;  %v1059_v6 = vadd.f32 %v1058_v31, %v1057_v5 }
 0x21c   : > { %1060 = vadd.xlane.f32.xlu2 %v1059_v6 }
 0x28d   : > { %v1051_v7 = vpop.xlane.xlu1 %1050 }
 0x28f   : > { %v1061_v8 = vpop.xlane.xlu2 %1060 }
 0x290   : > { %v1063_v9 = vsel %vm1062_vm3, %v1051_v7, %v1061_v8 }
 0x291   : > { %1065 = vst.msk [vmem:[%s289_s29] sm:$0xf] %vm1064_vm1, %v1063_v9 }
 0x292 PF: > { %s18_s24 = sadd.s32 1, %s1226_s24  }
 0x293   : > { %p15_p4 = scmp.ge.s32.totalorder %s18_s24, 4  }
 0x295   :  { %17 = sbr.rel (!%p15_p4) target bundleno = 1 (0x1), region = 95 }

// kernel: quaternion_pyramid_forward.11
= control target key start
LH: loop header
LB: loop body
LE: loop exit
PB: predicated region body
PF: predicated region fallthrough
CT: control target
= control target key end

     0   :  { %s587_s15 = smov 0   ;;  %s589_s16 = smov 0   ;;  %s641_s0 = inlined_call_operand.vmem [shape: bf16[2,16,256], index: 0, kind: input, shape index: {}]   ;;  %s642_s1 = inlined_call_operand.vmem [shape: f32[2,16,256], index: 1, kind: input, shape index: {}]   ;;  %s643_s2 = inlined_call_operand.vmem [shape: f32[2,1,256], index: 2, kind: input, shape index: {}]   ;;  %s644_s3 = inlined_call_operand.vmem [shape: f32[16,2], index: 3, kind: input, shape index: {}]   ;;  %s645_s4 = inlined_call_operand.vmem [shape: bf16[2,16,256], index: 4, kind: output, shape index: {}]  }
   0x1   :  { %s591_s17 = smov 0  }
   0x2 LB: > { %s26_s18 = sadd.s32 1, %s554_s16  ;;  %p494_p0 = scmp.ge.s32.totalorder %s558_s17, 1  ;;  %s558_s17 = sphi %s591_s17, %s14_s17   ;;  %s554_s16 = sphi %s589_s16, %s647_s16   ;;  %s550_s15 = sphi %s587_s15, %s646_s15  }
   0x3   : > { %p28_p1 = scmp.ge.s32.totalorder %s26_s18, 2  ;;  %p216_p2 = scmp.lt.s32.totalorder %s558_s17, 3 }
   0x5   : > { %s649_s18 = smov (%p28_p1, %s26_s18), 0  ;;  %p217_p3 = pnand %p494_p0, %p216_p2 }
   0x6   : > { %p268_p4 = scmp.lt.s32.totalorder (!%p217_p3), %s550_s15, 1 }
   0x7   : > { %220 = sbr.rel (%p217_p3) target bundleno = 150 (0x96), region = 36 }
   0xc   : > { %v317_v0 = vld [vmem:[%s644_s3] sm:$0xff]  ;;  %v560_v1 = vmov 1   ;;  %v561_v2 = vmov 0   ;;  %v318_v3 = vld [vmem:[%s644_s3 + $0x8] sm:$0xff]  ;;  %s651_s15 = smov (!%p268_p4, %s550_s15), 1 }
   0xd   : > { %534 = vset.pattern.permute.xlu1 %v560_v1  ;;  %533 = vset.pattern.permute.xlu0 %v561_v2  ;;  %s504_s23 = sshll.u32 %s651_s15, 4  ;;  %s499_s27 = sshll.u32 %s651_s15, 1 }
   0xe   : > { %334 = vperm.xlu1 %534, %v317_v0   ;;  %321 = vperm.xlu0 %533, %v317_v0   ;;  %s275_s26 = scalar_lea.vmem %s641_s0, %s504_s23  ;;  %s294_s30 = scalar_lea.vmem %s643_s2, %s499_s27 }
   0xf   : > { %v306_v4 = vld [vmem:[%s275_s26] sm:$0xff]  ;;  %s505_s5 = sshll.u32 %s651_s15, 5  ;;  %v307_v16 = vld [vmem:[%s275_s26 + $0x8] sm:$0xff]  ;;  %s304_s11 = scalar_lea.vmem %s645_s4, %s504_s23 }
  0x10   : > { %v308_v5 = vunpack.c.l.bf16 %v306_v4  ;;  %v309_v6 = vunpack.c.h.bf16 %v306_v4  ;;  %v316_v7 = vld [vmem:[%s294_s30] sm:$0x3]  ;;  %s285_s8 = scalar_lea.vmem %s642_s1, %s505_s5  ;;  %v310_v23 = vunpack.c.l.bf16 %v307_v16  ;;  %v311_v24 = vunpack.c.h.bf16 %v307_v16 }
  0x11   : > { %v346_v10 = vperm.slane %v316_v7, 0  ;;  %v347_v11 = vperm.slane %v316_v7, 1  ;;  %v312_v14 = vld [vmem:[%s285_s8] sm:$0xff]  ;;  %v313_v15 = vld [vmem:[%s285_s8 + $0x8] sm:$0xff]  ;;  %v314_v33 = vld [vmem:[%s285_s8 + $0x10] sm:$0xff] }
  0x12   : > { %v315_v34 = vld [vmem:[%s285_s8 + $0x18] sm:$0xff] }
  0x13   : > { %v350_v19 = vmul.f32 %v346_v10, %v312_v14  ;;  %v351_v20 = vmul.f32 %v347_v11, %v313_v15  ;;  %v352_v38 = vmul.f32 %v346_v10, %v314_v33  ;;  %v353_v39 = vmul.f32 %v347_v11, %v315_v34 }
  0x16   : > { %338 = vperm.xlu1 %534, %v318_v3   ;;  %326 = vperm.xlu0 %533, %v318_v3  }
  0x1e   : > { %535 = vset.pattern.permute.xlu0 %v560_v1 }
  0x80   : > { %v335_v8 = vpop.permute.xlu1 %334  ;;  %v322_v9 = vpop.permute.xlu0 %321 }
  0x81   : > { %v329_v12 = vmul.f32 %v322_v9, %v308_v5  ;;  %v330_v13 = vmul.f32 %v322_v9, %v309_v6 }
  0x83   : > { %v341_v17 = vadd.f32 %v335_v8, %v329_v12  ;;  %v342_v18 = vadd.f32 %v335_v8, %v330_v13 }
  0x85   : > { %v354_v21 = vadd.f32 %v341_v17, %v312_v14  ;;  %v355_v22 = vadd.f32 %v342_v18, %v313_v15 }
  0x87   : > { %v358_v25 = vmax.f32 %v354_v21, 0.0  ;;  %v359_v26 = vmax.f32 %v355_v22, 0.0 }
  0x88   : > { %v327_v27 = vpop.permute.xlu0 %326  ;;  %v339_v32 = vpop.permute.xlu1 %338 }
  0x89   : > { %v362_v28 = vadd.f32 %v358_v25, %v350_v19  ;;  %v363_v29 = vadd.f32 %v359_v26, %v351_v20  ;;  %v331_v30 = vmul.f32 %v327_v27, %v310_v23  ;;  %v332_v31 = vmul.f32 %v327_v27, %v311_v24 }
  0x8b   : > { %v366_v35 = vpack.c.bf16 %v363_v29, %v362_v28  ;;  %v343_v36 = vadd.f32 %v339_v32, %v331_v30  ;;  %v344_v37 = vadd.f32 %v339_v32, %v332_v31 }
  0x8d   : > { %368 = vst [vmem:[%s304_s11] sm:$0xff] %v366_v35  ;;  %v356_v40 = vadd.f32 %v343_v36, %v314_v33  ;;  %v357_v41 = vadd.f32 %v344_v37, %v315_v34 }
  0x8f   : > { %v360_v42 = vmax.f32 %v356_v40, 0.0  ;;  %v361_v43 = vmax.f32 %v357_v41, 0.0 }
  0x91   : > { %v364_v44 = vadd.f32 %v360_v42, %v352_v38  ;;  %v365_v45 = vadd.f32 %v361_v43, %v353_v39 }
  0x93   : > { %v367_v46 = vpack.c.bf16 %v365_v45, %v364_v44 }
  0x95   : > { %369 = vst [vmem:[%s304_s11 + $0x8] sm:$0xff] %v367_v46 }
  0x96 PF: > { %s14_s17 = sadd.s32 1, %s558_s17   ;;  %s646_s15 = smov %s554_s16 }
  0x97   : > { %p11_p5 = scmp.ge.s32.totalorder %s14_s17, 4   ;;  %s647_s16 = smov %s649_s18 }
  0x99   :  { %13 = sbr.rel (!%p11_p5) target bundleno = 2 (0x2), region = 72 }

// kernel: quaternion_pyramid_forward.7
= control target key start
LH: loop header
LB: loop body
LE: loop exit
PB: predicated region body
PF: predicated region fallthrough
CT: control target
= control target key end

     0   :  { %s627_s6 = smov 0   ;;  %s781_s0 = inlined_call_operand.vmem [shape: f32[2,16,16,16], index: 0, kind: input, shape index: {}]   ;;  %s782_s1 = inlined_call_operand.vmem [shape: f32[2,1,16,16], index: 1, kind: output, shape index: {}]  }
   0x1 LB: > { %s542_s7 = sadd.s32 4294967295, %s613_s6   ;;  %p546_p0 = scmp.ge.s32.totalorder %s613_s6, 1  ;;  %s613_s6 = sphi %s627_s6, %s11_s6  }
   0x2   : > { %p87_p1 = scmp.lt.s32.totalorder %s613_s6, 3 }
   0x4   : > { %p88_p2 = pnand %p546_p0, %p87_p1 }
   0x5   : > { %p107_p3 = scmp.lt.s32.totalorder (!%p88_p2), %s542_s7, 1 }
   0x6   : > { %91 = sbr.rel (%p88_p2) target bundleno = 222 (0xde), region = 24 }
   0xb   : > { %v615_v0 = vmov 4.0   ;;  %s784_s7 = smov (!%p107_p3, %s542_s7), 1  ;;  %vm213_vm0 = vcmask 130048   ;;  %v616_v4 = vmov 8.0  }
   0xc   : > { %579 = vrcp.f32 %v615_v0  ;;  %s565_s8 = sshll.u32 %s784_s7, 8  ;;  %s566_s12 = sshll.u32 %s784_s7, 4 }
   0xd   : > { %s641_s11 = scalar_lea.vmem %s781_s0, %s565_s8  ;;  %581 = vrcp.f32 %v616_v4  ;;  %s116_s15 = scalar_lea.vmem %s782_s1, %s566_s12 }
   0xe   : > { %v142_v1 = vld [vmem:[%s641_s11 + $0xc8] sm:$0xff]  ;;  %v144_v2 = vld [vmem:[%s641_s11 + $0xd8] sm:$0xff]  ;;  %v141_v35 = vld [vmem:[%s641_s11 + $0xc0] sm:$0xff] }
   0xf   : > { %v146_v3 = vld [vmem:[%s641_s11 + $0xe8] sm:$0xff]  ;;  %v148_v6 = vld [vmem:[%s641_s11 + $0xf8] sm:$0xff]  ;;  %v331_v7 = vsel %vm213_vm0, %v142_v1, 0.0  ;;  %v332_v8 = vsel %vm213_vm0, %v144_v2, 0.0  ;;  %v347_v10 = vsel %vm213_vm0, %v142_v1, -inf  ;;  %v348_v18 = vsel %vm213_vm0, %v144_v2, -inf }
  0x10   : > { %v334_v9 = vsel %vm213_vm0, %v146_v3, 0.0  ;;  %v134_v11 = vld [vmem:[%s641_s11 + $0x88] sm:$0xff]  ;;  %v180_v12 = vmul.f32 0.25, %v148_v6  ;;  %v333_v14 = vadd.f32 %v332_v8, %v331_v7  ;;  %v136_v15 = vld [vmem:[%s641_s11 + $0x98] sm:$0xff]  ;;  %v349_v19 = vsel %vm213_vm0, %v146_v3, -inf  ;;  %v143_v36 = vld [vmem:[%s641_s11 + $0xd0] sm:$0xff] }
  0x11   : > { %v138_v16 = vld [vmem:[%s641_s11 + $0xa8] sm:$0xff]  ;;  %v140_v17 = vld [vmem:[%s641_s11 + $0xb8] sm:$0xff]  ;;  %v292_v21 = vsel %vm213_vm0, %v134_v11, 0.0  ;;  %v350_v25 = vmax.f32 %v347_v10, %v349_v19  ;;  %v293_v27 = vsel %vm213_vm0, %v136_v15, 0.0  ;;  %v147_v37 = vld [vmem:[%s641_s11 + $0xf0] sm:$0xff]  ;;  %v315_v38 = vsel %vm213_vm0, %v134_v11, -inf }
  0x12   : > { %v580_v5 = vpop.eup %579  ;;  %v170_v20 = vmul.f32 0.25, %v138_v16  ;;  %v335_v23 = vadd.f32 %v334_v9, %v333_v14  ;;  %v336_v24 = vsel %vm213_vm0, %v180_v12, 0.0  ;;  %v351_v26 = vsel %vm213_vm0, %v180_v12, -inf  ;;  %v145_v42 = vld [vmem:[%s641_s11 + $0xe0] sm:$0xff]  ;;  %v135_v1 = vld [vmem:[%s641_s11 + $0x90] sm:$0xff] }
  0x13   : > { %v300_v13 = vmul.f32 4.0, %v580_v5  ;;  %vm304_vm1 = vweird.f32 %v580_v5  ;;  %v297_v29 = vsel %vm213_vm0, %v140_v17, 0.0  ;;  %v663_v30 = vpop.eup %581  ;;  %v352_v33 = vmax.f32 %v348_v18, %v351_v26  ;;  %v137_v55 = vld [vmem:[%s641_s11 + $0xa0] sm:$0xff]  ;;  %v139_v2 = vld [vmem:[%s641_s11 + $0xb0] sm:$0xff] }
  0x14   : > { %v295_v28 = vsel %vm213_vm0, %v170_v20, 0.0  ;;  %v337_v32 = vadd.f32 %v336_v24, %v335_v23  ;;  %v294_v34 = vadd.f32 %v293_v27, %v292_v21  ;;  %v316_v39 = vsel %vm213_vm0, %v136_v15, -inf  ;;  %v133_v60 = vld [vmem:[%s641_s11 + $0x80] sm:$0xff]  ;;  %v119_v12 = vld [vmem:[%s641_s11 + $0x10] sm:$0xff] }
  0x15   : > { %v301_v22 = vsub.f32 1.0, %v300_v13  ;;  %v317_v40 = vsel %vm213_vm0, %v170_v20, -inf  ;;  %v319_v41 = vsel %vm213_vm0, %v140_v17, -inf  ;;  %v353_v44 = vmax.f32 %v350_v25, %v352_v33  ;;  %v117_v11 = vld [vmem:[%s641_s11] sm:$0xff]  ;;  %v123_v24 = vld [vmem:[%s641_s11 + $0x30] sm:$0xff] }
  0x16   : > { %v296_v45 = vadd.f32 %v295_v28, %v294_v34  ;;  %v318_v46 = vmax.f32 %v315_v38, %v317_v40  ;;  %v320_v47 = vmax.f32 %v316_v39, %v319_v41  ;;  %v179_v48 = vmul.f32 0.25, %v147_v37  ;;  %v121_v21 = vld [vmem:[%s641_s11 + $0x20] sm:$0xff]  ;;  %v127_v33 = vld [vmem:[%s641_s11 + $0x50] sm:$0xff] }
  0x17   : > { %v302_v31 = vmul.f32 %v580_v5, %v301_v22  ;;  %v324_v49 = vsel %vm213_vm0, %v141_v35, 0.0  ;;  %v325_v50 = vsel %vm213_vm0, %v143_v36, 0.0  ;;  %v327_v54 = vsel %vm213_vm0, %v145_v42, 0.0  ;;  %v129_v34 = vld [vmem:[%s641_s11 + $0x60] sm:$0xff] }
  0x18   : > { %v298_v52 = vadd.f32 %v297_v29, %v296_v45  ;;  %v326_v53 = vadd.f32 %v325_v50, %v324_v49  ;;  %v321_v57 = vmax.f32 %v318_v46, %v320_v47  ;;  %v329_v58 = vsel %vm213_vm0, %v179_v48, 0.0  ;;  %v131_v46 = vld [vmem:[%s641_s11 + $0x70] sm:$0xff] }
  0x19   : > { %v303_v43 = vadd.f32 %v580_v5, %v302_v31  ;;  %v340_v59 = vsel %vm213_vm0, %v141_v35, -inf  ;;  %v341_v63 = vsel %vm213_vm0, %v143_v36, -inf  ;;  %v342_v0 = vsel %vm213_vm0, %v145_v42, -inf }
  0x1a   : > { %v328_v62 = vadd.f32 %v327_v54, %v326_v53  ;;  %v343_v4 = vmax.f32 %v340_v59, %v342_v0  ;;  %v169_v6 = vmul.f32 0.25, %v137_v55  ;;  %v285_v10 = vsel %vm213_vm0, %v133_v60, 0.0  ;;  %v120_v55 = vld [vmem:[%s641_s11 + $0x18] sm:$0xff] }
  0x1b   : > { %v676_v51 = vsel %vm304_vm1, %v580_v5, %v303_v43  ;;  %v344_v5 = vsel %vm213_vm0, %v179_v48, -inf  ;;  %v286_v13 = vsel %vm213_vm0, %v135_v1, 0.0  ;;  %v290_v15 = vsel %vm213_vm0, %v139_v2, 0.0 }
  0x1c   : > { %v339_v56 = vmul.f32 %v337_v32, %v676_v51  ;;  %v307_v61 = vmul.f32 %v676_v51, %v298_v52  ;;  %v330_v8 = vadd.f32 %v329_v58, %v328_v62  ;;  %v345_v9 = vmax.f32 %v341_v63, %v344_v5  ;;  %v125_v32 = vld [vmem:[%s641_s11 + $0x40] sm:$0xff] }
  0x1d   : > { %v288_v14 = vsel %vm213_vm0, %v169_v6, 0.0  ;;  %v308_v16 = vsel %vm213_vm0, %v133_v60, -inf  ;;  %v287_v19 = vadd.f32 %v286_v13, %v285_v10  ;;  %v309_v20 = vsel %vm213_vm0, %v135_v1, -inf  ;;  %v122_v60 = vld [vmem:[%s641_s11 + $0x28] sm:$0xff] }
  0x1e   : > { %v355_v3 = vadd.f32 %v353_v44, %v339_v56  ;;  %v690_v7 = vadd.f32 %v321_v57, %v307_v61  ;;  %v338_v17 = vmul.f32 %v330_v8, %v676_v51  ;;  %v346_v18 = vmax.f32 %v343_v4, %v345_v9  ;;  %v124_v4 = vld [vmem:[%s641_s11 + $0x38] sm:$0xff]  ;;  %v126_v8 = vld [vmem:[%s641_s11 + $0x48] sm:$0xff] }
  0x1f   : > { %v310_v22 = vsel %vm213_vm0, %v169_v6, -inf  ;;  %v312_v23 = vsel %vm213_vm0, %v139_v2, -inf  ;;  %v151_v25 = vmul.f32 0.25, %v119_v12  ;;  %v214_v26 = vsel %vm213_vm0, %v117_v11, 0.0 }
  0x20   : > { %559 = vmatpush.xpose.msk.msra.mxu2 %vm213_vm0, %v355_v3  ;;  %555 = vmatpush.xpose.msk.msra.mxu1 %vm213_vm0, %v355_v3  ;;  %v354_v27 = vadd.f32 %v346_v18, %v338_v17  ;;  %v289_v28 = vadd.f32 %v288_v14, %v287_v19  ;;  %v311_v29 = vmax.f32 %v308_v16, %v310_v22  ;;  %v217_v36 = vsel %vm213_vm0, %v121_v21, 0.0 }
  0x21   : > { %551 = vmatpush.xpose.msk.msra.mxu0 %vm213_vm0, %v690_v7  ;;  %567 = vmatpush.xpose.msk.msra.mxu3 %vm213_vm0, %v690_v7  ;;  %v313_v31 = vmax.f32 %v309_v20, %v312_v23  ;;  %v215_v35 = vsel %vm213_vm0, %v151_v25, 0.0  ;;  %v219_v40 = vsel %vm213_vm0, %v123_v24, 0.0  ;;  %v221_v41 = vsel %vm213_vm0, %v125_v32, 0.0  ;;  %v132_v23 = vld [vmem:[%s641_s11 + $0x78] sm:$0xff] }
  0x22   : > { %v291_v37 = vadd.f32 %v290_v15, %v289_v28  ;;  %v216_v39 = vadd.f32 %v215_v35, %v214_v26  ;;  %v223_v42 = vsel %vm213_vm0, %v127_v33, 0.0  ;;  %v225_v43 = vsel %vm213_vm0, %v129_v34, 0.0 }
  0x23   : > { %v314_v38 = vmax.f32 %v311_v29, %v313_v31  ;;  %v245_v44 = vmul.f32 8.0, %v663_v30  ;;  %v253_v48 = vsel %vm213_vm0, %v117_v11, -inf  ;;  %v254_v49 = vsel %vm213_vm0, %v151_v25, -inf }
  0x24   : > { %560 = vmatpush.xpose.msk.msra.mxu2 %vm213_vm0, %v354_v27  ;;  %556 = vmatpush.xpose.msk.msra.mxu1 %vm213_vm0, %v354_v27  ;;  %v306_v45 = vmul.f32 %v676_v51, %v291_v37  ;;  %v218_v47 = vadd.f32 %v217_v36, %v216_v39  ;;  %v255_v52 = vsel %vm213_vm0, %v121_v21, -inf  ;;  %v257_v53 = vsel %vm213_vm0, %v123_v24, -inf  ;;  %v118_v51 = vld [vmem:[%s641_s11 + $0x8] sm:$0xff]  ;;  %v128_v21 = vld [vmem:[%s641_s11 + $0x58] sm:$0xff] }
  0x25   : > { %v246_v50 = vsub.f32 1.0, %v245_v44  ;;  %v259_v54 = vsel %vm213_vm0, %v125_v32, -inf  ;;  %v256_v58 = vmax.f32 %v253_v48, %v255_v52  ;;  %v258_v59 = vmax.f32 %v254_v49, %v257_v53 }
  0x26   : > { %v322_v56 = vadd.f32 %v314_v38, %v306_v45  ;;  %v220_v57 = vadd.f32 %v219_v40, %v218_v47  ;;  %v261_v62 = vsel %vm213_vm0, %v127_v33, -inf  ;;  %v263_v63 = vsel %vm213_vm0, %v129_v34, -inf  ;;  %v130_v33 = vld [vmem:[%s641_s11 + $0x68] sm:$0xff] }
  0x27   : > { %v247_v61 = vmul.f32 %v663_v30, %v246_v50  ;;  %v265_v0 = vsel %vm213_vm0, %v131_v46, -inf  ;;  %v260_v2 = vmax.f32 %v256_v58, %v259_v54  ;;  %v262_v3 = vmax.f32 %v258_v59, %v261_v62 }
  0x28   : > { %561 = vmatmul.msk.f32.vlgmr.msra.gmra.mxu2 %vm213_vm0, %v322_v56  ;;  %552 = vmatpush.xpose.msk.msra.mxu0 %vm213_vm0, %v322_v56  ;;  %v222_v1 = vadd.f32 %v221_v41, %v220_v57  ;;  %v152_v5 = vmul.f32 0.25, %v120_v55  ;;  %vm249_vm2 = vweird.f32 %v663_v30  ;;  %v229_v9 = vsel %vm213_vm0, %v118_v51, 0.0 }
  0x29   : > { %568 = vmatpush.xpose.msk.msra.mxu3 %vm213_vm0, %v322_v56  ;;  %v248_v6 = vadd.f32 %v663_v30, %v247_v61  ;;  %v232_v10 = vsel %vm213_vm0, %v122_v60, 0.0  ;;  %v264_v12 = vmax.f32 %v260_v2, %v263_v63  ;;  %v266_v13 = vmax.f32 %v262_v3, %v265_v0 }
  0x2a   : > { %v224_v11 = vadd.f32 %v223_v42, %v222_v1  ;;  %v230_v14 = vsel %vm213_vm0, %v152_v5, 0.0  ;;  %v227_v15 = vsel %vm213_vm0, %v131_v46, 0.0  ;;  %v234_v17 = vsel %vm213_vm0, %v124_v4, 0.0 }
  0x2b   : > { %v231_v16 = vadd.f32 %v230_v14, %v229_v9  ;;  %v250_v19 = vsel %vm249_vm2, %v663_v30, %v248_v6  ;;  %v267_v20 = vmax.f32 %v264_v12, %v266_v13  ;;  %v236_v22 = vsel %vm213_vm0, %v126_v8, 0.0 }
  0x2c   : > { %v226_v18 = vadd.f32 %v225_v43, %v224_v11  ;;  %v268_v25 = vsel %vm213_vm0, %v118_v51, -inf  ;;  %v269_v26 = vsel %vm213_vm0, %v152_v5, -inf  ;;  %v270_v27 = vsel %vm213_vm0, %v122_v60, -inf }
  0x2d   : > { %v233_v24 = vadd.f32 %v232_v10, %v231_v16  ;;  %v271_v29 = vmax.f32 %v268_v25, %v270_v27  ;;  %v272_v31 = vsel %vm213_vm0, %v124_v4, -inf  ;;  %v274_v32 = vsel %vm213_vm0, %v126_v8, -inf }
  0x2e   : > { %v228_v28 = vadd.f32 %v227_v15, %v226_v18  ;;  %v238_v34 = vsel %vm213_vm0, %v128_v21, 0.0  ;;  %v273_v35 = vmax.f32 %v269_v26, %v272_v31  ;;  %v276_v36 = vsel %vm213_vm0, %v128_v21, -inf }
  0x2f   : > { %v235_v30 = vadd.f32 %v234_v17, %v233_v24  ;;  %v275_v38 = vmax.f32 %v271_v29, %v274_v32  ;;  %v278_v39 = vsel %vm213_vm0, %v130_v33, -inf  ;;  %v280_v40 = vsel %vm213_vm0, %v132_v23, -inf }
  0x30   : > { %v251_v37 = vmul.f32 %v250_v19, %v228_v28  ;;  %562 = vmatmul.msk.f32.gmra.mxu2 %vm213_vm0, %v690_v7  ;;  %v277_v42 = vmax.f32 %v273_v35, %v276_v36  ;;  %v240_v44 = vsel %vm213_vm0, %v130_v33, 0.0  ;;  %v242_v48 = vsel %vm213_vm0, %v132_v23, 0.0 }
  0x31   : > { %v237_v41 = vadd.f32 %v236_v22, %v235_v30  ;;  %v279_v46 = vmax.f32 %v275_v38, %v278_v39 }
  0x32   : > { %v283_v43 = vadd.f32 %v267_v20, %v251_v37  ;;  %v281_v47 = vmax.f32 %v277_v42, %v280_v40 }
  0x33   : > { %v239_v45 = vadd.f32 %v238_v34, %v237_v41 }
  0x34   : > { %553 = vmatmul.msk.f32.vlgmr.msra.gmra.mxu0 %vm213_vm0, %v283_v43  ;;  %557 = vmatmul.msk.f32.vlgmr.msra.gmra.mxu1 %vm213_vm0, %v283_v43  ;;  %v282_v52 = vmax.f32 %v279_v46, %v281_v47 }
  0x35   : > { %v241_v49 = vadd.f32 %v240_v44, %v239_v45 }
  0x37   : > { %v243_v50 = vadd.f32 %v242_v48, %v241_v49 }
  0x39   : > { %v252_v53 = vmul.f32 %v250_v19, %v243_v50 }
  0x3b   : > { %v284_v54 = vadd.f32 %v282_v52, %v252_v53 }
  0x3d   : > { %554 = vmatmul.msk.f32.vlgmr.msra.gmra.mxu3 %vm213_vm0, %v284_v54  ;;  %558 = vmatmul.msk.f32.gmra.mxu1 %vm213_vm0, %v284_v54 }
  0xab   : > { %v461_v7 = vpop.f32.mrf.mxu2 }
  0xac   : > { %v467_v55 = vmul.f32 0.25, %v461_v7 }
  0xae   : > { %v469_v56 = vsub.f32 0.0, %v467_v55 }
  0xb0   : > { %v471_v57 = vmul.f32 1.442695, %v469_v56 }
  0xb1   : > { %v385_v58 = vpop.f32.mrf.mxu0  ;;  %v426_v59 = vpop.f32.mrf.mxu1 }
  0xb2   : > { %v391_v51 = vmul.f32 0.25, %v385_v58  ;;  %v432_v60 = vmul.f32 0.25, %v426_v59  ;;  %583 = vpow2.f32 %v471_v57 }
  0xb3   : > { %v464_v61 = vpop.f32.mrf.mxu2 }
  0xb4   : > { %v393_v62 = vsub.f32 0.0, %v391_v51  ;;  %v434_v63 = vsub.f32 0.0, %v432_v60  ;;  %v468_v0 = vmul.f32 0.25, %v464_v61 }
  0xb6   : > { %v395_v1 = vmul.f32 1.442695, %v393_v62  ;;  %v436_v2 = vmul.f32 1.442695, %v434_v63  ;;  %v470_v3 = vsub.f32 0.0, %v468_v0 }
  0xb8   : > { %585 = vpow2.f32 %v395_v1  ;;  %v584_v4 = vpop.eup %583  ;;  %v473_v8 = vmul.f32 1.442695, %v470_v3 }
  0xb9   : > { %587 = vpow2.f32 %v436_v2  ;;  %v475_v9 = vadd.f32 1.0, %v584_v4 }
  0xba   : > { %v429_v5 = vpop.f32.mrf.mxu1  ;;  %589 = vpow2.f32 %v473_v8 }
  0xbb   : > { %v433_v6 = vmul.f32 0.25, %v429_v5  ;;  %591 = vrcp.f32 %v475_v9 }
  0xbd   : > { %v435_v10 = vsub.f32 0.0, %v433_v6 }
  0xbe   : > { %v586_v11 = vpop.eup %585 }
  0xbf   : > { %v588_v12 = vpop.eup %587  ;;  %v399_v13 = vadd.f32 1.0, %v586_v11  ;;  %v438_v14 = vmul.f32 1.442695, %v435_v10 }
  0xc0   : > { %v440_v15 = vadd.f32 1.0, %v588_v12  ;;  %v388_v16 = vpop.f32.mrf.mxu3  ;;  %v590_v19 = vpop.eup %589 }
  0xc1   : > { %593 = vrcp.f32 %v399_v13  ;;  %v392_v17 = vmul.f32 0.25, %v388_v16  ;;  %v592_v21 = vpop.eup %591  ;;  %v476_v28 = vadd.f32 1.0, %v590_v19 }
  0xc2   : > { %595 = vrcp.f32 %v440_v15 }
  0xc3   : > { %v394_v18 = vsub.f32 0.0, %v392_v17  ;;  %597 = vpow2.f32 %v438_v14 }
  0xc5   : > { %v397_v20 = vmul.f32 1.442695, %v394_v18 }
  0xc7   : > { %v594_v22 = vpop.eup %593  ;;  %599 = vpow2.f32 %v397_v20 }
  0xc8   : > { %v596_v23 = vpop.eup %595 }
  0xc9   : > { %v598_v24 = vpop.eup %597  ;;  %v479_v25 = vadd.f32 %v596_v23, %v594_v22 }
  0xca   : > { %v441_v26 = vadd.f32 1.0, %v598_v24 }
  0xcb   : > { %v481_v27 = vadd.f32 %v592_v21, %v479_v25 }
  0xcc   : > { %601 = vrcp.f32 %v441_v26 }
  0xcd   : > { %v600_v29 = vpop.eup %599  ;;  %v483_v31 = vmul.f32 0.33, %v481_v27  ;;  %603 = vrcp.f32 %v476_v28 }
  0xce   : > { %v400_v32 = vadd.f32 1.0, %v600_v29 }
  0xcf   : > { %485 = vst.msk [vmem:[%s116_s15] sm:$0xff] %vm213_vm0, %v483_v31 }
  0xd0   : > { %605 = vrcp.f32 %v400_v32 }
  0xd2   : > { %v602_v33 = vpop.eup %601 }
  0xd3   : > { %v604_v30 = vpop.eup %603 }
  0xd6   : > { %v606_v34 = vpop.eup %605 }
  0xd7   : > { %v480_v35 = vadd.f32 %v606_v34, %v602_v33 }
  0xd9   : > { %v482_v36 = vadd.f32 %v604_v30, %v480_v35 }
  0xdb   : > { %v484_v37 = vmul.f32 0.33, %v482_v36 }
  0xdd   : > { %486 = vst.msk [vmem:[%s116_s15 + $0x8] sm:$0xff] %vm213_vm0, %v484_v37 }
  0xde PF: > { %s11_s6 = sadd.s32 1, %s613_s6  }
  0xdf   : > { %p8_p4 = scmp.ge.s32.totalorder %s11_s6, 4  }
  0xe1   :  { %10 = sbr.rel (!%p8_p4) target bundleno = 1 (0x1), region = 54 }

// kernel: quaternion_pyramid_forward.12
= control target key start
LH: loop header
LB: loop body
LE: loop exit
PB: predicated region body
PF: predicated region fallthrough
CT: control target
= control target key end

     0   :  { %s1026_s18 = smov 0   ;;  %s1120_s0 = inlined_call_operand.vmem [shape: bf16[2,16,342], index: 0, kind: input, shape index: {}]   ;;  %s1121_s1 = inlined_call_operand.vmem [shape: bf16[9,8,16], index: 1, kind: input, shape index: {}]   ;;  %s1122_s2 = inlined_call_operand.vmem [shape: f32[8,1], index: 2, kind: input, shape index: {}]   ;;  %s1123_s3 = inlined_call_operand.vmem [shape: f32[1,288], index: 3, kind: input, shape index: {}]   ;;  %s1124_s4 = inlined_call_operand.vmem [shape: bf16[2,8,288], index: 4, kind: output, shape index: {0}]   ;;  %s1125_s5 = inlined_call_operand.vmem [shape: f32[2,8,2], index: 5, kind: output, shape index: {1}]  }
   0x1 LB: > { %s899_s19 = sadd.s32 4294967295, %s985_s18   ;;  %p903_p0 = scmp.ge.s32.totalorder %s985_s18, 1  ;;  %s985_s18 = sphi %s1026_s18, %s16_s18  }
   0x2   : > { %p190_p1 = scmp.lt.s32.totalorder %s985_s18, 3 }
   0x4   : > { %p191_p2 = pnand %p903_p0, %p190_p1 }
   0x5   : > { %p222_p3 = scmp.lt.s32.totalorder (!%p191_p2), %s899_s19, 1  ;;  %s987_s24 = smov (!%p191_p2), 127  }
   0x6   : > { %194 = sbr.rel (%p191_p2) target bundleno = 497 (0x1f1), region = 36  ;;  %s988_s25 = smov (!%p191_p2), 126  }
   0x7   : > { %s989_s26 = smov (!%p191_p2), 110   ;;  %s990_s27 = smov (!%p191_p2), 109  }
   0x8   : > { %s991_s28 = smov (!%p191_p2), 108   ;;  %s992_s29 = smov (!%p191_p2), 92  }
   0x9   : > { %s993_s30 = smov (!%p191_p2), 91   ;;  %s994_s6 = smov (!%p191_p2), 90  }
   0xb   : > { %s1127_s19 = smov (!%p222_p3, %s899_s19), 1  ;;  %vm269_vm0 = vcmask 130048   ;;  %v237_v9 = vld [vmem:[%s1121_s1] sm:$0xf]  ;;  %vm365_vm1 = vcmask 1031168   ;;  %vm263_vm2 = vcmask 1039360  }
   0xc   : > { %s959_s20 = smul.u32 24, %s1127_s19  ;;  %v1048_v13 = vld [vmem:[%s1121_s1 + $0x8] sm:$0xf]  ;;  %v907_v16 = vld [vmem:[%s1121_s1 + $0x4] sm:$0xf]  ;;  %vm424_vm3 = vcmask 900096  }
   0xd   : > { %v930_v27 = vld [vmem:[%s1121_s1 + $0xc] sm:$0xf]  ;;  %vm483_vm4 = vcmask 891904   ;;  %vm542_vm5 = vcmask 883712   ;;  %v938_v37 = vld [vmem:[%s1121_s1 + $0x14] sm:$0xf] }
   0xe   : > { %s226_s23 = scalar_lea.vmem %s1120_s0, %s959_s20  ;;  %vm601_vm6 = vcmask 752640   ;;  %vm660_vm7 = vcmask 744448   ;;  %v934_v45 = vld [vmem:[%s1121_s1 + $0x10] sm:$0xf]  ;;  %v942_v50 = vld [vmem:[%s1121_s1 + $0x18] sm:$0xf] }
   0xf   : > { %v918_v0 = vld [vmem:[%s226_s23 + $0x8] sm:$0xf]  ;;  %v958_v1 = vld [vmem:[%s226_s23 + $0x10] sm:$0xf0]  ;;  %v956_v2 = vld [vmem:[%s226_s23 + $0x4] sm:$0xf] }
  0x10   : > { %v919_v3 = vor.u32 %v958_v1, %v918_v0  ;;  %v912_v4 = vld [vmem:[%s226_s23 + $0xc] sm:$0xf0]  ;;  %v910_v5 = vld [vmem:[%s226_s23] sm:$0xf]  ;;  %v957_v6 = vld [vmem:[%s226_s23 + $0x8] sm:$0xf0] }
  0x11   : > { %v915_v7 = vor.u32 %v956_v2, %v912_v4  ;;  %v911_v8 = vor.u32 %v957_v6, %v910_v5  ;;  %vm719_vm8 = vcmask 736256   ;;  %v946_v54 = vld [vmem:[%s1121_s1 + $0x1c] sm:$0xf]  ;;  %v770_v57 = vld [vmem:[%s1122_s2] sm:$0xff]  ;;  %v995_v58 = vmov 0   ;;  %s906_s10 = sshll.u32 %s1127_s19, 3 }
  0x12   : > { %261 = vrot.lane.b32.xlu0 %v919_v3, %s987_s24  ;;  %v950_v59 = vld [vmem:[%s1121_s1 + $0x20] sm:$0xf]  ;;  %vm782_vm9 = vcmask 257024   ;;  %vm796_vm10 = vcmask 261120   ;;  %vm809_vm11 = vcmask 7168   ;;  %s235_s13 = scalar_lea.vmem %s1125_s5, %s906_s10  ;;  %vm811_vm12 = vcmask 15360  }
  0x13   : > { %259 = vrot.lane.b32.xlu1 %v915_v7, %s987_s24  ;;  %361 = vrot.lane.b32.xlu2 %v915_v7, %s988_s25 }
  0x14   : > { %325 = vmatpush.bf16.msra.mxu3 %v911_v8  ;;  %978 = vset.pattern.permute.xlu0 %v995_v58 }
  0x17   : > { %923 = vmatmul.msk.bf16.vlgmr.msra.gmra.mxu3 %vm269_vm0, %v237_v9 }
  0x1a   : > { %257 = vrot.lane.b32.xlu0 %v911_v8, %s987_s24 }
  0x1b   : > { %359 = vrot.lane.b32.xlu1 %v911_v8, %s988_s25  ;;  %363 = vrot.lane.b32.xlu2 %v919_v3, %s988_s25 }
  0x22   : > { %420 = vrot.lane.b32.xlu0 %v915_v7, %s989_s26 }
  0x23   : > { %422 = vrot.lane.b32.xlu1 %v919_v3, %s989_s26  ;;  %418 = vrot.lane.b32.xlu2 %v911_v8, %s989_s26 }
  0x2a   : > { %481 = vrot.lane.b32.xlu0 %v919_v3, %s990_s27 }
  0x2b   : > { %477 = vrot.lane.b32.xlu1 %v911_v8, %s990_s27  ;;  %479 = vrot.lane.b32.xlu2 %v915_v7, %s990_s27 }
  0x32   : > { %536 = vrot.lane.b32.xlu0 %v911_v8, %s991_s28 }
  0x33   : > { %538 = vrot.lane.b32.xlu1 %v915_v7, %s991_s28  ;;  %595 = vrot.lane.b32.xlu2 %v911_v8, %s992_s29 }
  0x3a   : > { %597 = vrot.lane.b32.xlu0 %v915_v7, %s992_s29 }
  0x3b   : > { %540 = vrot.lane.b32.xlu1 %v919_v3, %s991_s28  ;;  %599 = vrot.lane.b32.xlu2 %v919_v3, %s992_s29 }
  0x42   : > { %656 = vrot.lane.b32.xlu0 %v915_v7, %s993_s30 }
  0x43   : > { %658 = vrot.lane.b32.xlu1 %v919_v3, %s993_s30  ;;  %654 = vrot.lane.b32.xlu2 %v911_v8, %s993_s30 }
  0x4a   : > { %717 = vrot.lane.b32.xlu0 %v919_v3, %s994_s6 }
  0x4b   : > { %713 = vrot.lane.b32.xlu1 %v911_v8, %s994_s6  ;;  %715 = vrot.lane.b32.xlu2 %v915_v7, %s994_s6  ;;  %s960_s6 = smul.u32 12, %s1127_s19 }
  0x4d   : > { %s231_s9 = scalar_lea.vmem %s1124_s4, %s960_s6 }
  0x52   : > { %773 = vperm.xlu0 %978, %v770_v57  }
  0x6d   : > { %v362_v10 = vpop.permute.xlu2 %361 }
  0x75   : > { %v364_v11 = vpop.permute.xlu2 %363 }
  0x76   : > { %v367_v12 = vsel %vm365_vm1, %v362_v10, %v364_v11 }
  0x77   : > { %394 = vmatpush.bf16.msrb.mxu3 %v367_v12 }
  0x7a   : > { %928 = vmatmul.msk.bf16.vlgmr.msrb.gmra.mxu3 %vm269_vm0, %v1048_v13 }
  0x7d   : > { %v419_v22 = vpop.permute.xlu2 %418 }
  0x84   : > { %v262_v14 = vpop.permute.xlu0 %261 }
  0x85   : > { %v260_v15 = vpop.permute.xlu1 %259  ;;  %306 = vmatpush.bf16.msra.mxu2 %v262_v14  ;;  %v480_v28 = vpop.permute.xlu2 %479 }
  0x86   : > { %v265_v17 = vsel %vm263_vm2, %v260_v15, %v262_v14 }
  0x87   : > { %293 = vmatpush.bf16.msra.mxu1 %v265_v17 }
  0x88   : > { %922 = vmatmul.msk.bf16.vlgmr.msra.gmra.mxu2 %vm269_vm0, %v907_v16 }
  0x8a   : > { %921 = vmatmul.msk.bf16.vlgmr.msra.gmra.mxu1 %vm269_vm0, %v907_v16 }
  0x8b   : > { %351 = vmatpush.bf16.msrb.mxu1 %v919_v3 }
  0x8c   : > { %v258_v18 = vpop.permute.xlu0 %257 }
  0x8d   : > { %v360_v19 = vpop.permute.xlu1 %359  ;;  %v264_v20 = vsel %vm263_vm2, %v258_v18, %v260_v15  ;;  %v596_v33 = vpop.permute.xlu2 %595 }
  0x8e   : > { %280 = vmatpush.bf16.msra.mxu0 %v264_v20  ;;  %v366_v21 = vsel %vm365_vm1, %v360_v19, %v362_v10 }
  0x8f   : > { %381 = vmatpush.bf16.msrb.mxu2 %v366_v21 }
  0x91   : > { %920 = vmatmul.msk.bf16.vlgmr.msra.gmra.mxu0 %vm269_vm0, %v907_v16 }
  0x92   : > { %338 = vmatpush.bf16.msrb.mxu0 %v915_v7 }
  0x94   : > { %v421_v23 = vpop.permute.xlu0 %420 }
  0x95   : > { %v425_v24 = vsel %vm424_vm3, %v419_v22, %v421_v23  ;;  %v423_v25 = vpop.permute.xlu1 %422  ;;  %v600_v38 = vpop.permute.xlu2 %599 }
  0x96   : > { %407 = vmatpush.bf16.msra.mxu0 %v364_v11  ;;  %v426_v26 = vsel %vm424_vm3, %v421_v23, %v423_v25  ;;  %466 = vmatpush.bf16.msra.mxu3 %v423_v25 }
  0x97   : > { %440 = vmatpush.bf16.msra.mxu1 %v425_v24  ;;  %453 = vmatpush.bf16.msra.mxu2 %v426_v26 }
  0x98   : > { %927 = vmatmul.msk.bf16.vlgmr.msrb.gmra.mxu2 %vm269_vm0, %v1048_v13 }
  0x99   : > { %933 = vmatmul.msk.bf16.vlgmr.msra.gmra.mxu3 %vm269_vm0, %v930_v27 }
  0x9a   : > { %925 = vmatmul.msk.bf16.vlgmr.msrb.gmra.mxu1 %vm269_vm0, %v237_v9  ;;  %v327_v60 = vpop.f32.mrf.mxu3 }
  0x9c   : > { %v482_v29 = vpop.permute.xlu0 %481 }
  0x9d   : > { %v478_v30 = vpop.permute.xlu1 %477  ;;  %v485_v31 = vsel %vm483_vm4, %v480_v28, %v482_v29  ;;  %525 = vmatpush.bf16.msrb.mxu2 %v482_v29  ;;  %v655_v46 = vpop.permute.xlu2 %654 }
  0x9e   : > { %512 = vmatpush.bf16.msrb.mxu1 %v485_v31  ;;  %v484_v32 = vsel %vm483_vm4, %v478_v30, %v480_v28 }
  0xa1   : > { %924 = vmatmul.msk.bf16.vlgmr.msrb.gmra.mxu0 %vm269_vm0, %v237_v9 }
  0xa2   : > { %499 = vmatpush.bf16.msrb.mxu0 %v484_v32  ;;  %v329_v61 = vpop.f32.mrf.mxu3 }
  0xa4   : > { %v537_v34 = vpop.permute.xlu0 %536 }
  0xa5   : > { %v539_v35 = vpop.permute.xlu1 %538  ;;  %v716_v52 = vpop.permute.xlu2 %715 }
  0xa6   : > { %v543_v36 = vsel %vm542_vm5, %v537_v34, %v539_v35 }
  0xa7   : > { %558 = vmatpush.bf16.msrb.mxu3 %v543_v36 }
  0xa8   : > { %932 = vmatmul.msk.bf16.vlgmr.msra.gmra.mxu2 %vm269_vm0, %v930_v27 }
  0xaa   : > { %931 = vmatmul.msk.bf16.vlgmr.msra.gmra.mxu1 %vm269_vm0, %v930_v27  ;;  %939 = vmatmul.msk.bf16.vlgmr.msrb.gmra.mxu3 %vm269_vm0, %v938_v37 }
  0xac   : > { %v598_v39 = vpop.permute.xlu0 %597 }
  0xad   : > { %v541_v40 = vpop.permute.xlu1 %540  ;;  %v602_v41 = vsel %vm601_vm6, %v596_v33, %v598_v39  ;;  %v603_v42 = vsel %vm601_vm6, %v598_v39, %v600_v38 }
  0xae   : > { %617 = vmatpush.bf16.msra.mxu2 %v602_v41  ;;  %630 = vmatpush.bf16.msra.mxu3 %v603_v42  ;;  %v544_v43 = vsel %vm542_vm5, %v539_v35, %v541_v40 }
  0xaf   : > { %584 = vmatpush.bf16.msra.mxu1 %v541_v40 }
  0xb1   : > { %929 = vmatmul.msk.bf16.vlgmr.msra.gmra.mxu0 %vm269_vm0, %v1048_v13 }
  0xb2   : > { %571 = vmatpush.bf16.msra.mxu0 %v544_v43 }
  0xb4   : > { %v657_v44 = vpop.permute.xlu0 %656 }
  0xb5   : > { %v659_v47 = vpop.permute.xlu1 %658  ;;  %v661_v49 = vsel %vm660_vm7, %v655_v46, %v657_v44 }
  0xb6   : > { %v662_v48 = vsel %vm660_vm7, %v657_v44, %v659_v47  ;;  %702 = vmatpush.bf16.msrb.mxu3 %v659_v47 }
  0xb8   : > { %937 = vmatmul.msk.bf16.vlgmr.msrb.gmra.mxu2 %vm269_vm0, %v934_v45 }
  0xb9   : > { %689 = vmatpush.bf16.msrb.mxu2 %v662_v48 }
  0xba   : > { %936 = vmatmul.msk.bf16.vlgmr.msrb.gmra.mxu1 %vm269_vm0, %v934_v45  ;;  %944 = vmatmul.msk.bf16.vlgmr.msra.gmra.mxu3 %vm269_vm0, %v942_v50 }
  0xbb   : > { %676 = vmatpush.bf16.msrb.mxu1 %v661_v49 }
  0xbc   : > { %v718_v51 = vpop.permute.xlu0 %717 }
  0xbd   : > { %v721_v53 = vsel %vm719_vm8, %v716_v52, %v718_v51  ;;  %v714_v55 = vpop.permute.xlu1 %713 }
  0xbe   : > { %v720_v56 = vsel %vm719_vm8, %v714_v55, %v716_v52 }
  0xc1   : > { %935 = vmatmul.msk.bf16.vlgmr.msrb.gmra.mxu0 %vm269_vm0, %v934_v45 }
  0xc2   : > { %643 = vmatpush.bf16.msrb.mxu0 %v600_v38 }
  0xc8   : > { %943 = vmatmul.msk.bf16.vlgmr.msra.gmra.mxu2 %vm269_vm0, %v942_v50 }
  0xc9   : > { %761 = vmatpush.bf16.msra.mxu2 %v718_v51 }
  0xca   : > { %941 = vmatmul.msk.bf16.vlgmr.msra.gmra.mxu1 %vm269_vm0, %v938_v37  ;;  %949 = vmatmul.msk.bf16.vlgmr.msrb.gmra.mxu3 %vm269_vm0, %v946_v54 }
  0xcb   : > { %748 = vmatpush.bf16.msra.mxu1 %v721_v53 }
  0xd1   : > { %940 = vmatmul.msk.bf16.vlgmr.msra.gmra.mxu0 %vm269_vm0, %v938_v37 }
  0xd2   : > { %735 = vmatpush.bf16.msra.mxu0 %v720_v56 }
  0xd8   : > { %948 = vmatmul.msk.bf16.vlgmr.msrb.gmra.mxu2 %vm269_vm0, %v946_v54 }
  0xda   : > { %947 = vmatmul.msk.bf16.vlgmr.msrb.gmra.mxu1 %vm269_vm0, %v946_v54 }
  0xe1   : > { %945 = vmatmul.msk.bf16.vlgmr.msrb.gmra.mxu0 %vm269_vm0, %v942_v50 }
  0xe8   : > { %953 = vmatmul.msk.bf16.vlgmr.msra.gmra.mxu2 %vm269_vm0, %v950_v59 }
  0xea   : > { %952 = vmatmul.msk.bf16.vlgmr.msra.gmra.mxu1 %vm269_vm0, %v950_v59 }
  0xf1   : > { %951 = vmatmul.msk.bf16.vlgmr.msra.gmra.mxu0 %vm269_vm0, %v950_v59 }
  0xfd   : > { %v396_v62 = vpop.f32.mrf.mxu3 }
 0x105   : > { %v398_v0 = vpop.f32.mrf.mxu3 }
 0x107   : > { %v295_v63 = vpop.f32.mrf.mxu1 }
 0x10b   : > { %v308_v1 = vpop.f32.mrf.mxu2 }
 0x10e   : > { %v282_v2 = vpop.f32.mrf.mxu0 }
 0x10f   : > { %v297_v3 = vpop.f32.mrf.mxu1  ;;  %v328_v4 = vadd.f32 %v327_v60, %v282_v2  ;;  %v784_v2 = vld [vmem:[%s1123_s3] sm:$0x7] }
 0x113   : > { %v310_v5 = vpop.f32.mrf.mxu2 }
 0x116   : > { %v284_v6 = vpop.f32.mrf.mxu0 }
 0x117   : > { %v353_v7 = vpop.f32.mrf.mxu1  ;;  %v788_v6 = vperm.slane %v784_v2, 2 }
 0x118   : > { %v354_v8 = vadd.f32 %v353_v7, %v308_v1  ;;  %v774_v1 = vpop.permute.xlu0 %773 }
 0x11b   : > { %v383_v9 = vpop.f32.mrf.mxu2 }
 0x11c   : > { %v413_v10 = vadd.f32 %v383_v9, %v328_v4  ;;  %v468_v11 = vpop.f32.mrf.mxu3  ;;  %v787_v9 = vperm.slane %v784_v2, 1 }
 0x11e   : > { %v340_v12 = vpop.f32.mrf.mxu0 }
 0x11f   : > { %v341_v13 = vadd.f32 %v340_v12, %v295_v63  ;;  %v355_v14 = vpop.f32.mrf.mxu1 }
 0x120   : > { %v786_v14 = vperm.slane %v784_v2, 0 }
 0x121   : > { %v414_v15 = vadd.f32 %v396_v62, %v341_v13 }
 0x123   : > { %v385_v16 = vpop.f32.mrf.mxu2 }
 0x124   : > { %v470_v17 = vpop.f32.mrf.mxu3 }
 0x126   : > { %v342_v18 = vpop.f32.mrf.mxu0 }
 0x127   : > { %v442_v19 = vpop.f32.mrf.mxu1 }
 0x128   : > { %v472_v53 = vadd.f32 %v442_v19, %v413_v10 }
 0x12b   : > { %v455_v20 = vpop.f32.mrf.mxu2 }
 0x12c   : > { %v473_v47 = vadd.f32 %v455_v20, %v414_v15 }
 0x12d   : > { %v560_v21 = vpop.f32.mrf.mxu3 }
 0x12e   : > { %v409_v22 = vpop.f32.mrf.mxu0 }
 0x12f   : > { %v415_v23 = vadd.f32 %v409_v22, %v354_v8  ;;  %v444_v24 = vpop.f32.mrf.mxu1 }
 0x131   : > { %v474_v25 = vadd.f32 %v468_v11, %v415_v23 }
 0x133   : > { %v457_v26 = vpop.f32.mrf.mxu2 }
 0x135   : > { %v562_v27 = vpop.f32.mrf.mxu3 }
 0x136   : > { %v411_v28 = vpop.f32.mrf.mxu0 }
 0x137   : > { %v514_v29 = vpop.f32.mrf.mxu1 }
 0x138   : > { %v532_v49 = vadd.f32 %v514_v29, %v473_v47 }
 0x13b   : > { %v527_v30 = vpop.f32.mrf.mxu2 }
 0x13c   : > { %v533_v52 = vadd.f32 %v527_v30, %v474_v25 }
 0x13d   : > { %v632_v31 = vpop.f32.mrf.mxu3 }
 0x13e   : > { %v501_v32 = vpop.f32.mrf.mxu0 }
 0x13f   : > { %v516_v33 = vpop.f32.mrf.mxu1  ;;  %v531_v56 = vadd.f32 %v501_v32, %v472_v53 }
 0x141   : > { %v590_v62 = vadd.f32 %v560_v21, %v531_v56 }
 0x143   : > { %v529_v34 = vpop.f32.mrf.mxu2 }
 0x145   : > { %v634_v35 = vpop.f32.mrf.mxu3 }
 0x146   : > { %v503_v36 = vpop.f32.mrf.mxu0 }
 0x147   : > { %v586_v37 = vpop.f32.mrf.mxu1 }
 0x148   : > { %v592_v55 = vadd.f32 %v586_v37, %v533_v52 }
 0x14b   : > { %v619_v38 = vpop.f32.mrf.mxu2 }
 0x14c   : > { %v649_v3 = vadd.f32 %v619_v38, %v590_v62 }
 0x14d   : > { %v704_v39 = vpop.f32.mrf.mxu3 }
 0x14e   : > { %v573_v40 = vpop.f32.mrf.mxu0 }
 0x14f   : > { %v588_v41 = vpop.f32.mrf.mxu1  ;;  %v591_v51 = vadd.f32 %v573_v40, %v532_v49 }
 0x151   : > { %v650_v57 = vadd.f32 %v632_v31, %v591_v51 }
 0x153   : > { %v621_v42 = vpop.f32.mrf.mxu2 }
 0x155   : > { %v706_v43 = vpop.f32.mrf.mxu3 }
 0x156   : > { %v575_v44 = vpop.f32.mrf.mxu0 }
 0x157   : > { %v678_v45 = vpop.f32.mrf.mxu1 }
 0x158   : > { %v708_v7 = vadd.f32 %v678_v45, %v649_v3 }
 0x15b   : > { %v691_v46 = vpop.f32.mrf.mxu2 }
 0x15c   : > { %v709_v60 = vadd.f32 %v691_v46, %v650_v57 }
 0x15e   : > { %v645_v48 = vpop.f32.mrf.mxu0 }
 0x15f   : > { %v680_v50 = vpop.f32.mrf.mxu1  ;;  %v651_v58 = vadd.f32 %v645_v48, %v592_v55 }
 0x161   : > { %v710_v0 = vadd.f32 %v704_v39, %v651_v58 }
 0x163   : > { %v693_v54 = vpop.f32.mrf.mxu2 }
 0x166   : > { %v647_v59 = vpop.f32.mrf.mxu0 }
 0x167   : > { %v750_v61 = vpop.f32.mrf.mxu1 }
 0x168   : > { %v768_v63 = vadd.f32 %v750_v61, %v709_v60 }
 0x16a   : > { %v777_v8 = vadd.f32 %v774_v1, %v768_v63 }
 0x16b   : > { %v763_v4 = vpop.f32.mrf.mxu2 }
 0x16c   : > { %v769_v5 = vadd.f32 %v763_v4, %v710_v0  ;;  %v793_v18 = vmul.f32 %v787_v9, %v777_v8 }
 0x16e   : > { %v778_v10 = vadd.f32 %v774_v1, %v769_v5  ;;  %v737_v11 = vpop.f32.mrf.mxu0  ;;  %v802_v25 = vmul.f32 %v793_v18, %v777_v8 }
 0x16f   : > { %v767_v12 = vadd.f32 %v737_v11, %v708_v7  ;;  %v752_v13 = vpop.f32.mrf.mxu1 }
 0x170   : > { %v780_v15 = vpack.c.bf16 %v778_v10, %v778_v10  ;;  %v794_v16 = vmul.f32 %v788_v6, %v778_v10 }
 0x171   : > { %v776_v17 = vadd.f32 %v774_v1, %v767_v12 }
 0x172   : > { %783 = vst.msk [vmem:[%s231_s9 + $0x8] sm:$0xf] %vm782_vm9, %v780_v15  ;;  %v803_v22 = vmul.f32 %v794_v16, %v778_v10  ;;  %v797_v27 = vsel %vm796_vm10, %v794_v16, 0.0 }
 0x173   : > { %v779_v19 = vpack.c.bf16 %v777_v8, %v776_v17  ;;  %v765_v20 = vpop.f32.mrf.mxu2  ;;  %v792_v21 = vmul.f32 %v786_v14, %v776_v17 }
 0x174   : > { %v805_v30 = vsel %vm796_vm10, %v803_v22, 0.0 }
 0x175   : > { %781 = vst [vmem:[%s231_s9] sm:$0xff] %v779_v19  ;;  %v795_v23 = vadd.f32 %v793_v18, %v792_v21  ;;  %v801_v24 = vmul.f32 %v792_v21, %v776_v17 }
 0x176   : > { %v739_v26 = vpop.f32.mrf.mxu0 }
 0x177   : > { %v798_v28 = vadd.f32 %v797_v27, %v795_v23  ;;  %v804_v29 = vadd.f32 %v802_v25, %v801_v24 }
 0x179   : > { %799 = vadd.xlane.f32.xlu1 %v798_v28  ;;  %v806_v31 = vadd.f32 %v805_v30, %v804_v29 }
 0x17b   : > { %807 = vadd.xlane.f32.xlu2 %v806_v31 }
 0x1ec   : > { %v800_v32 = vpop.xlane.xlu1 %799 }
 0x1ee   : > { %v808_v33 = vpop.xlane.xlu2 %807 }
 0x1ef   : > { %v810_v34 = vsel %vm809_vm11, %v800_v32, %v808_v33 }
 0x1f0   : > { %812 = vst.msk [vmem:[%s235_s13] sm:$0xff] %vm811_vm12, %v810_v34 }
 0x1f1 PF: > { %s16_s18 = sadd.s32 1, %s985_s18  }
 0x1f2   : > { %p13_p4 = scmp.ge.s32.totalorder %s16_s18, 4  }
 0x1f4   :  { %15 = sbr.rel (!%p13_p4) target bundleno = 1 (0x1), region = 86 }

// kernel: quaternion_pyramid_forward.13
= control target key start
LH: loop header
LB: loop body
LE: loop exit
PB: predicated region body
PF: predicated region fallthrough
CT: control target
= control target key end

     0   :  { %s373_s9 = smov 0   ;;  %s375_s10 = smov 0   ;;  %s409_s0 = inlined_call_operand.vmem [shape: bf16[2,8,256], index: 0, kind: input, shape index: {}]   ;;  %s410_s1 = inlined_call_operand.vmem [shape: f32[8,2], index: 1, kind: input, shape index: {}]   ;;  %s411_s2 = inlined_call_operand.vmem [shape: f32[2,8,256], index: 2, kind: output, shape index: {}]  }
   0x1   :  { %s377_s11 = smov 0  }
   0x2 LB: > { %s24_s12 = sadd.s32 1, %s350_s10  ;;  %p295_p0 = scmp.ge.s32.totalorder %s354_s11, 1  ;;  %s354_s11 = sphi %s377_s11, %s12_s11   ;;  %s350_s10 = sphi %s375_s10, %s413_s10   ;;  %s346_s9 = sphi %s373_s9, %s412_s9  }
   0x3   : > { %p26_p1 = scmp.ge.s32.totalorder %s24_s12, 2  ;;  %p133_p2 = scmp.lt.s32.totalorder %s354_s11, 3 }
   0x5   : > { %s415_s12 = smov (%p26_p1, %s24_s12), 0  ;;  %p134_p3 = pnand %p295_p0, %p133_p2 }
   0x6   : > { %p164_p4 = scmp.lt.s32.totalorder (!%p134_p3), %s346_s9, 1 }
   0x7   : > { %137 = sbr.rel (%p134_p3) target bundleno = 144 (0x90), region = 28 }
   0xc   : > { %v186_v0 = vld [vmem:[%s410_s1] sm:$0xff]  ;;  %v356_v1 = vmov 0   ;;  %v357_v2 = vmov 1   ;;  %s417_s9 = smov (!%p164_p4, %s346_s9), 1 }
   0xd   : > { %330 = vset.pattern.permute.xlu0 %v356_v1  ;;  %s302_s15 = sshll.u32 %s417_s9, 3  ;;  %s303_s19 = sshll.u32 %s417_s9, 4 }
   0xe   : > { %189 = vperm.xlu0 %330, %v186_v0   ;;  %s171_s18 = scalar_lea.vmem %s409_s0, %s302_s15  ;;  %s181_s22 = scalar_lea.vmem %s411_s2, %s303_s19 }
   0xf   : > { %v183_v4 = vld [vmem:[%s171_s18] sm:$0xff] }
  0x10   : > { %v184_v5 = vunpack.c.l.bf16 %v183_v4  ;;  %v185_v6 = vunpack.c.h.bf16 %v183_v4 }
  0x16   : > { %331 = vset.pattern.permute.xlu0 %v357_v2 }
  0x17   : > { %195 = vperm.xlu0 %331, %v186_v0  }
  0x80   : > { %v190_v3 = vpop.permute.xlu0 %189 }
  0x81   : > { %v192_v7 = vmul.f32 %v190_v3, %v184_v5  ;;  %v193_v8 = vmul.f32 %v190_v3, %v185_v6 }
  0x89   : > { %v196_v9 = vpop.permute.xlu0 %195 }
  0x8a   : > { %v198_v10 = vadd.f32 %v196_v9, %v192_v7  ;;  %v199_v11 = vadd.f32 %v196_v9, %v193_v8 }
  0x8c   : > { %v200_v12 = vmax.f32 %v198_v10, 0.0  ;;  %v201_v13 = vmax.f32 %v199_v11, 0.0 }
  0x8e   : > { %202 = vst [vmem:[%s181_s22] sm:$0xff] %v200_v12 }
  0x8f   : > { %203 = vst [vmem:[%s181_s22 + $0x8] sm:$0xff] %v201_v13 }
  0x90 PF: > { %s12_s11 = sadd.s32 1, %s354_s11   ;;  %s412_s9 = smov %s350_s10 }
  0x91   : > { %p9_p5 = scmp.ge.s32.totalorder %s12_s11, 4   ;;  %s413_s10 = smov %s415_s12 }
  0x93   :  { %11 = sbr.rel (!%p9_p5) target bundleno = 2 (0x2), region = 58 }

</bundles_post_ra>
